<compile_context>
chip_gen: v7x
topology: tpu7x:2x2x1
jax: 0.10.0
libtpu: 0.0.40
codegen_flags: <defaults>
</compile_context>

<pallas_src>
import jax
import jax.numpy as jnp
from jax.experimental import pallas as pl
from jax.experimental.pallas import tpu as pltpu


_DIRS = ("up", "down", "left", "right")


# ----------------------------------------------------------------------------
# Fused 4-direction LSTM recurrence kernel.
#   xg_ref  : (T, Nblk, 16*Hid)  precomputed x@W_ih^T + bias, gate-major layout
#   whh_ref : (4*Hid, 16*Hid)    block-diagonal recurrent weight (gate-major)
#   o_ref   : (T, Nblk, 4*Hid)   hidden states h_all = [h_up|h_dn|h_lf|h_rt]
# Gate-major column layout: [ i(4*Hid) | f(4*Hid) | g(4*Hid) | o(4*Hid) ],
# each 4*Hid block ordered [up, down, left, right] x Hid.
# ----------------------------------------------------------------------------
def _fused_lstm_kernel(xg_ref, whh_ref, o_ref, h_scr, c_scr):
    T = xg_ref.shape[0]
    G = o_ref.shape[-1]  # 4 * Hid (= 128 lanes for Hid=32)

    # Each grid step is an independent recurrence over a batch tile.
    h_scr[...] = jnp.zeros_like(h_scr)
    c_scr[...] = jnp.zeros_like(c_scr)

    whh = whh_ref[...]  # load once, keep resident

    def step(t, carry):
        # (Nblk, 16*Hid): hoisted input projection + recurrent matmul
        gates = xg_ref[t] + jnp.dot(
            h_scr[...], whh, preferred_element_type=jnp.float32)

        # full-width (128-lane) gate blocks -> no masked sub-vreg slicing
        i_g = jax.nn.sigmoid(gates[:, 0 * G:1 * G])
        f_g = jax.nn.sigmoid(gates[:, 1 * G:2 * G])
        g_g = jnp.tanh(gates[:, 2 * G:3 * G])
        o_g = jax.nn.sigmoid(gates[:, 3 * G:4 * G])

        c_new = f_g * c_scr[...] + i_g * g_g
        h_new = o_g * jnp.tanh(c_new)

        c_scr[...] = c_new
        h_scr[...] = h_new
        o_ref[t] = h_new.astype(o_ref.dtype)  # lane-dense (G=128) store
        return carry

    # short static trip count -> fully unroll for LLO scheduling visibility
    unroll = True if T <= 32 else 4
    jax.lax.fori_loop(0, T, step, 0, unroll=unroll)


# ----------------------------------------------------------------------------
# Fuse per-direction LSTM parameters into the big gate-major layout.
#   W_ih_big : (2*C, 16*Hid)   rows [0:C]  feed up/down   (x_up channels)
#                              rows [C:2C] feed left/right (x_left channels)
#   W_hh_big : (4*Hid, 16*Hid) block-diagonal over directions
#   bias_big : (1, 1, 16*Hid)  b_ih + b_hh per direction
# Column index = gate*4*Hid + dir*Hid + h   (gate-major, dir, channel).
# ----------------------------------------------------------------------------
def _fuse_params(params, C, Hid):
    Wih = jnp.zeros((2 * C, 4, 4, Hid), jnp.float32)     # (in, gate, dir, hid)
    Whh = jnp.zeros((4 * Hid, 4, 4, Hid), jnp.float32)   # (in, gate, dir, hid)
    Bias = jnp.zeros((4, 4, Hid), jnp.float32)           # (gate, dir, hid)
    for d, name in enumerate(_DIRS):
        w_ih, w_hh, b_ih, b_hh = params[name]
        r0 = 0 if d < 2 else C                            # up/down vs left/right
        Wih = Wih.at[r0:r0 + C, :, d, :].set(w_ih.T.reshape(C, 4, Hid))
        Whh = Whh.at[d * Hid:(d + 1) * Hid, :, d, :].set(
            w_hh.T.reshape(Hid, 4, Hid))
        Bias = Bias.at[:, d, :].set((b_ih + b_hh).reshape(4, Hid))
    return (Wih.reshape(2 * C, 16 * Hid),
            Whh.reshape(4 * Hid, 16 * Hid),
            Bias.reshape(1, 1, 16 * Hid))


# ----------------------------------------------------------------------------
# MDLSTM forward (mirrors the PyTorch module exactly)
# ----------------------------------------------------------------------------
def mdlstm_forward(x, params):
    B, Hgt, W, C = x.shape
    assert Hgt == W, "original module's final sum requires height == width"
    Hid = params["up"][1].shape[1]
    T = Hgt
    N = B * W

    # Sequences (batch-first like torch), then time-major for the kernel.
    x_up = jnp.transpose(x, (0, 2, 1, 3)).reshape(N, T, C)          # (B*W, Hgt, C)
    # torch quirk: permute(0,1,3,2).view(B*H, W, C) -> row-major reshape of the
    # permuted tensor (scrambles C/W when C != W) -- intentional.
    x_left = jnp.transpose(x, (0, 1, 3, 2)).reshape(B * Hgt, W, C)  # (B*H, W, C)
    x_cat = jnp.concatenate([x_up, x_left], axis=-1)                # (N, T, 2C)
    x_cat_tm = jnp.transpose(x_cat, (1, 0, 2))                      # (T, N, 2C)

    Wih_big, Whh_big, bias_big = _fuse_params(params, C, Hid)

    # Hoisted input projection for ALL timesteps / all 4 directions at once:
    # one (T*N, 2C) @ (2C, 16*Hid) matmul instead of T tiny per-step matmuls.
    xg = jnp.einsum("tnc,cg->tng", x_cat_tm, Wih_big,
                    preferred_element_type=jnp.float32) + bias_big  # (T,N,16Hid)

    # Batch tiling: 2 independent tiles -> "parallel" grid (v7x megacore win,
    # harmless serialization on v5e/v6e). Tile sublane dim must stay % 8 == 0.
    n_tiles = 2 if (N % 16 == 0 and N >= 32) else 1
    n_blk = N // n_tiles

    out_all = pl.pallas_call(
        _fused_lstm_kernel,
        out_shape=jax.ShapeDtypeStruct((T, N, 4 * Hid), x.dtype),
        grid_spec=pltpu.PrefetchScalarGridSpec(
            num_scalar_prefetch=0,
            grid=(n_tiles,),
            in_specs=[
                pl.BlockSpec((T, n_blk, 16 * Hid), lambda i: (0, i, 0)),
                pl.BlockSpec((4 * Hid, 16 * Hid), lambda i: (0, 0)),
            ],
            out_specs=pl.BlockSpec((T, n_blk, 4 * Hid), lambda i: (0, i, 0)),
            scratch_shapes=[
                pltpu.VMEM((n_blk, 4 * Hid), jnp.float32),  # h state (all dirs)
                pltpu.VMEM((n_blk, 4 * Hid), jnp.float32),  # c state (all dirs)
            ],
        ),
        compiler_params=pltpu.CompilerParams(
            dimension_semantics=("parallel",)),
    )(xg, Whh_big)

    # Split fused hidden [up|down|left|right] and apply ONE layout change per
    # direction-pair (up/down and left/right share the same mapping).
    o_up = out_all[:, :, 0 * Hid:1 * Hid]
    o_dn = out_all[:, :, 1 * Hid:2 * Hid]
    o_lf = out_all[:, :, 2 * Hid:3 * Hid]
    o_rt = out_all[:, :, 3 * Hid:4 * Hid]

    def ud_layout(o):  # (Hgt, B*W, Hid) time-major -> (B, Hgt, W, Hid)
        return jnp.transpose(o.reshape(Hgt, B, W, Hid), (1, 0, 2, 3))

    def lr_layout(o):  # (W, B*Hgt, Hid) time-major -> (B, W, Hgt, Hid)
        return jnp.transpose(o.reshape(W, B, Hgt, Hid), (1, 0, 2, 3))

    # Sum mixes (B,Hgt,W,hid) and (B,W,Hgt,hid) -- valid because Hgt == W,
    # exactly as in the original module.
    return ud_layout(o_up + o_dn) + lr_layout(o_lf + o_rt)


# ----------------------------------------------------------------------------
# Pure-JAX reference (lax.scan per direction) for correctness checking
# ----------------------------------------------------------------------------
def lstm_ref(x_seq, w_ih, w_hh, b_ih, b_hh):
    N, _, _ = x_seq.shape
    Hid = w_hh.shape[1]

    def step(carry, x_t):
        h, c = carry
        gates = x_t @ w_ih.T + b_ih + h @ w_hh.T + b_hh
        i, f, g, o = jnp.split(gates, 4, axis=-1)
        i = jax.nn.sigmoid(i)
        f = jax.nn.sigmoid(f)
        g = jnp.tanh(g)
        o = jax.nn.sigmoid(o)
        c = f * c + i * g
        h = o * jnp.tanh(c)
        return (h, c), h

    h0 = jnp.zeros((N, Hid), x_seq.dtype)
    c0 = jnp.zeros((N, Hid), x_seq.dtype)
    _, ys = jax.lax.scan(step, (h0, c0), jnp.transpose(x_seq, (1, 0, 2)))
    return jnp.transpose(ys, (1, 0, 2))


def mdlstm_ref(x, params):
    B, Hgt, W, C = x.shape
    x_up = jnp.transpose(x, (0, 2, 1, 3)).reshape(B * W, Hgt, C)
    x_left = jnp.transpose(x, (0, 1, 3, 2)).reshape(B * Hgt, W, C)
    o_up = lstm_ref(x_up, *params["up"])
    o_dn = lstm_ref(x_up, *params["down"])
    o_lf = lstm_ref(x_left, *params["left"])
    o_rt = lstm_ref(x_left, *params["right"])
    hid = o_up.shape[-1]
    o_up = jnp.transpose(o_up.reshape(B, W, Hgt, hid), (0, 2, 1, 3))
    o_dn = jnp.transpose(o_dn.reshape(B, W, Hgt, hid), (0, 2, 1, 3))
    o_lf = jnp.transpose(o_lf.reshape(B, Hgt, W, hid), (0, 2, 1, 3))
    o_rt = jnp.transpose(o_rt.reshape(B, Hgt, W, hid), (0, 2, 1, 3))
    return o_up + o_dn + o_lf + o_rt


# ----------------------------------------------------------------------------
# Deterministic parameter init (PyTorch LSTM default: U(-1/sqrt(H), 1/sqrt(H)))
# ----------------------------------------------------------------------------
def init_params(key, input_channels, hidden_channels):
    bound = 1.0 / jnp.sqrt(jnp.float32(hidden_channels))
    params = {}
    for name in _DIRS:
        key, k1, k2, k3, k4 = jax.random.split(key, 5)
        w_ih = jax.random.uniform(
            k1, (4 * hidden_channels, input_channels), jnp.float32, -bound, bound)
        w_hh = jax.random.uniform(
            k2, (4 * hidden_channels, hidden_channels), jnp.float32, -bound, bound)
        b_ih = jax.random.uniform(
            k3, (4 * hidden_channels,), jnp.float32, -bound, bound)
        b_hh = jax.random.uniform(
            k4, (4 * hidden_channels,), jnp.float32, -bound, bound)
        params[name] = (w_ih, w_hh, b_ih, b_hh)
    return params


if __name__ == "__main__":
    B, Hgt, W = 2, 16, 16           # square spatial dims (required by the module)
    C_in, C_hid = 4, 32

    key = jax.random.PRNGKey(0)
    k_x, k_p = jax.random.split(key)
    x = jax.random.normal(k_x, (B, Hgt, W, C_in), jnp.float32)
    params = init_params(k_p, C_in, C_hid)

    out = jax.block_until_ready(jax.jit(mdlstm_forward)(x, params))
    assert out.shape == (B, Hgt, W, C_hid), out.shape

    ref = jax.block_until_ready(mdlstm_ref(x, params))
    assert jnp.allclose(out, ref, atol=1e-4, rtol=1e-4), float(
        jnp.max(jnp.abs(out - ref)))

    print("KERNEL_OK")
</pallas_src>

<mosaic_0001>
module attributes {stable_mosaic.version = 11 : i64} {
  func.func @_fused_lstm_kernel(%arg0: i32, %arg1: memref<16x16x512xf32, #tpu.memory_space<vmem>>, %arg2: memref<128x512xf32, #tpu.memory_space<vmem>>, %arg3: memref<16x16x128xf32, #tpu.memory_space<vmem>>, %arg4: memref<16x128xf32, #tpu.memory_space<vmem>>, %arg5: memref<16x128xf32, #tpu.memory_space<vmem>>) attributes {dimension_semantics = [#tpu.dimension_semantics<parallel>], iteration_bounds = array<i64: 2>, scalar_prefetch = 0 : i64, scratch_operands = 2 : i64, tpu.core_type = #tpu.core_type<tc>, window_params = [{transform_indices = @transform_0, window_bounds = array<i64: 16, 16, 512>}, {pipeline_mode = #tpu.pipeline_mode<synchronous>, transform_indices = @transform_1, window_bounds = array<i64: 128, 512>}, {transform_indices = @transform_2, window_bounds = array<i64: 16, 16, 128>}]} {
    %cst = arith.constant 0.000000e+00 : f32
    %0 = vector.broadcast %cst : f32 to vector<16x128xf32>
    %c0 = arith.constant 0 : index
    %c0_0 = arith.constant 0 : index
    %1 = vector.load %arg4[%c0, %c0_0] : memref<16x128xf32, #tpu.memory_space<vmem>>, vector<16x128xf32>
    tpu.vector_store %arg4[%c0, %c0_0], %0 {strides = array<i32>} : memref<16x128xf32, #tpu.memory_space<vmem>>, vector<16x128xf32>,
    %cst_1 = arith.constant 0.000000e+00 : f32
    %2 = vector.broadcast %cst_1 : f32 to vector<16x128xf32>
    %c0_2 = arith.constant 0 : index
    %c0_3 = arith.constant 0 : index
    %3 = vector.load %arg5[%c0_2, %c0_3] : memref<16x128xf32, #tpu.memory_space<vmem>>, vector<16x128xf32>
    tpu.vector_store %arg5[%c0_2, %c0_3], %2 {strides = array<i32>} : memref<16x128xf32, #tpu.memory_space<vmem>>, vector<16x128xf32>,
    %c0_4 = arith.constant 0 : index
    %c0_5 = arith.constant 0 : index
    %4 = vector.load %arg2[%c0_4, %c0_5] : memref<128x512xf32, #tpu.memory_space<vmem>>, vector<128x512xf32>
    %c0_i32 = arith.constant 0 : i32
    %5 = arith.index_cast %c0_i32 : i32 to index
    %c0_6 = arith.constant 0 : index
    %c0_7 = arith.constant 0 : index
    %6 = vector.load %arg1[%5, %c0_6, %c0_7] : memref<16x16x512xf32, #tpu.memory_space<vmem>>, vector<1x16x512xf32>
    %7 = vector.shape_cast %6 : vector<1x16x512xf32> to vector<16x512xf32>
    %c0_8 = arith.constant 0 : index
    %c0_9 = arith.constant 0 : index
    %8 = vector.load %arg4[%c0_8, %c0_9] : memref<16x128xf32, #tpu.memory_space<vmem>>, vector<16x128xf32>
    %cst_10 = arith.constant dense<0.000000e+00> : vector<16x512xf32>
    %9 = tpu.matmul %8, %4, %cst_10 {dimension_numbers = #tpu.dot_dimension_numbers<[1], [0], [0], [1], [0, 0, 1, 1], [], []>} : vector<16x128xf32>, vector<128x512xf32>, vector<16x512xf32> -> vector<16x512xf32>
    %10 = arith.addf %7, %9 : vector<16x512xf32>
    %11 = vector.extract_strided_slice %10 {offsets = [0, 0], sizes = [16, 128], strides = [1, 1]} : vector<16x512xf32> to vector<16x128xf32>
    %12 = arith.negf %11 : vector<16x128xf32>
    %13 = math.exp %12 : vector<16x128xf32>
    %cst_11 = arith.constant 1.000000e+00 : f32
    %14 = vector.broadcast %cst_11 : f32 to vector<16x128xf32>
    %15 = arith.addf %14, %13 : vector<16x128xf32>
    %16 = arith.divf %14, %15 : vector<16x128xf32>
    %17 = vector.extract_strided_slice %10 {offsets = [0, 128], sizes = [16, 128], strides = [1, 1]} : vector<16x512xf32> to vector<16x128xf32>
    %18 = arith.negf %17 : vector<16x128xf32>
    %19 = math.exp %18 : vector<16x128xf32>
    %cst_12 = arith.constant 1.000000e+00 : f32
    %20 = vector.broadcast %cst_12 : f32 to vector<16x128xf32>
    %21 = arith.addf %20, %19 : vector<16x128xf32>
    %22 = arith.divf %20, %21 : vector<16x128xf32>
    %23 = vector.extract_strided_slice %10 {offsets = [0, 256], sizes = [16, 128], strides = [1, 1]} : vector<16x512xf32> to vector<16x128xf32>
    %24 = math.tanh %23 : vector<16x128xf32>
    %25 = vector.extract_strided_slice %10 {offsets = [0, 384], sizes = [16, 128], strides = [1, 1]} : vector<16x512xf32> to vector<16x128xf32>
    %26 = arith.negf %25 : vector<16x128xf32>
    %27 = math.exp %26 : vector<16x128xf32>
    %cst_13 = arith.constant 1.000000e+00 : f32
    %28 = vector.broadcast %cst_13 : f32 to vector<16x128xf32>
    %29 = arith.addf %28, %27 : vector<16x128xf32>
    %30 = arith.divf %28, %29 : vector<16x128xf32>
    %c0_14 = arith.constant 0 : index
    %c0_15 = arith.constant 0 : index
    %31 = vector.load %arg5[%c0_14, %c0_15] : memref<16x128xf32, #tpu.memory_space<vmem>>, vector<16x128xf32>
    %32 = arith.mulf %22, %31 : vector<16x128xf32>
    %33 = arith.mulf %16, %24 : vector<16x128xf32>
    %34 = arith.addf %32, %33 : vector<16x128xf32>
    %35 = math.tanh %34 : vector<16x128xf32>
    %36 = arith.mulf %30, %35 : vector<16x128xf32>
    %c0_16 = arith.constant 0 : index
    %c0_17 = arith.constant 0 : index
    %37 = vector.load %arg5[%c0_16, %c0_17] : memref<16x128xf32, #tpu.memory_space<vmem>>, vector<16x128xf32>
    tpu.vector_store %arg5[%c0_16, %c0_17], %34 {strides = array<i32>} : memref<16x128xf32, #tpu.memory_space<vmem>>, vector<16x128xf32>,
    %c0_18 = arith.constant 0 : index
    %c0_19 = arith.constant 0 : index
    %38 = vector.load %arg4[%c0_18, %c0_19] : memref<16x128xf32, #tpu.memory_space<vmem>>, vector<16x128xf32>
    tpu.vector_store %arg4[%c0_18, %c0_19], %36 {strides = array<i32>} : memref<16x128xf32, #tpu.memory_space<vmem>>, vector<16x128xf32>,
    %39 = arith.index_cast %c0_i32 : i32 to index
    %c0_20 = arith.constant 0 : index
    %c0_21 = arith.constant 0 : index
    %40 = vector.load %arg3[%39, %c0_20, %c0_21] : memref<16x16x128xf32, #tpu.memory_space<vmem>>, vector<1x16x128xf32>
    %41 = vector.shape_cast %40 : vector<1x16x128xf32> to vector<16x128xf32>
    %42 = vector.shape_cast %36 : vector<16x128xf32> to vector<1x16x128xf32>
    tpu.vector_store %arg3[%39, %c0_20, %c0_21], %42 {strides = array<i32>} : memref<16x16x128xf32, #tpu.memory_space<vmem>>, vector<1x16x128xf32>,
    %c1_i32 = arith.constant 1 : i32
    %43 = arith.index_cast %c1_i32 : i32 to index
    %c0_22 = arith.constant 0 : index
    %c0_23 = arith.constant 0 : index
    %44 = vector.load %arg1[%43, %c0_22, %c0_23] : memref<16x16x512xf32, #tpu.memory_space<vmem>>, vector<1x16x512xf32>
    %45 = vector.shape_cast %44 : vector<1x16x512xf32> to vector<16x512xf32>
    %c0_24 = arith.constant 0 : index
    %c0_25 = arith.constant 0 : index
    %46 = vector.load %arg4[%c0_24, %c0_25] : memref<16x128xf32, #tpu.memory_space<vmem>>, vector<16x128xf32>
    %cst_26 = arith.constant dense<0.000000e+00> : vector<16x512xf32>
    %47 = tpu.matmul %46, %4, %cst_26 {dimension_numbers = #tpu.dot_dimension_numbers<[1], [0], [0], [1], [0, 0, 1, 1], [], []>} : vector<16x128xf32>, vector<128x512xf32>, vector<16x512xf32> -> vector<16x512xf32>
    %48 = arith.addf %45, %47 : vector<16x512xf32>
    %49 = vector.extract_strided_slice %48 {offsets = [0, 0], sizes = [16, 128], strides = [1, 1]} : vector<16x512xf32> to vector<16x128xf32>
    %50 = arith.negf %49 : vector<16x128xf32>
    %51 = math.exp %50 : vector<16x128xf32>
    %cst_27 = arith.constant 1.000000e+00 : f32
    %52 = vector.broadcast %cst_27 : f32 to vector<16x128xf32>
    %53 = arith.addf %52, %51 : vector<16x128xf32>
    %54 = arith.divf %52, %53 : vector<16x128xf32>
    %55 = vector.extract_strided_slice %48 {offsets = [0, 128], sizes = [16, 128], strides = [1, 1]} : vector<16x512xf32> to vector<16x128xf32>
    %56 = arith.negf %55 : vector<16x128xf32>
    %57 = math.exp %56 : vector<16x128xf32>
    %cst_28 = arith.constant 1.000000e+00 : f32
    %58 = vector.broadcast %cst_28 : f32 to vector<16x128xf32>
    %59 = arith.addf %58, %57 : vector<16x128xf32>
    %60 = arith.divf %58, %59 : vector<16x128xf32>
    %61 = vector.extract_strided_slice %48 {offsets = [0, 256], sizes = [16, 128], strides = [1, 1]} : vector<16x512xf32> to vector<16x128xf32>
    %62 = math.tanh %61 : vector<16x128xf32>
    %63 = vector.extract_strided_slice %48 {offsets = [0, 384], sizes = [16, 128], strides = [1, 1]} : vector<16x512xf32> to vector<16x128xf32>
    %64 = arith.negf %63 : vector<16x128xf32>
    %65 = math.exp %64 : vector<16x128xf32>
    %cst_29 = arith.constant 1.000000e+00 : f32
    %66 = vector.broadcast %cst_29 : f32 to vector<16x128xf32>
    %67 = arith.addf %66, %65 : vector<16x128xf32>
    %68 = arith.divf %66, %67 : vector<16x128xf32>
    %c0_30 = arith.constant 0 : index
    %c0_31 = arith.constant 0 : index
    %69 = vector.load %arg5[%c0_30, %c0_31] : memref<16x128xf32, #tpu.memory_space<vmem>>, vector<16x128xf32>
    %70 = arith.mulf %60, %69 : vector<16x128xf32>
    %71 = arith.mulf %54, %62 : vector<16x128xf32>
    %72 = arith.addf %70, %71 : vector<16x128xf32>
    %73 = math.tanh %72 : vector<16x128xf32>
    %74 = arith.mulf %68, %73 : vector<16x128xf32>
    %c0_32 = arith.constant 0 : index
    %c0_33 = arith.constant 0 : index
    %75 = vector.load %arg5[%c0_32, %c0_33] : memref<16x128xf32, #tpu.memory_space<vmem>>, vector<16x128xf32>
    tpu.vector_store %arg5[%c0_32, %c0_33], %72 {strides = array<i32>} : memref<16x128xf32, #tpu.memory_space<vmem>>, vector<16x128xf32>,
    %c0_34 = arith.constant 0 : index
    %c0_35 = arith.constant 0 : index
    %76 = vector.load %arg4[%c0_34, %c0_35] : memref<16x128xf32, #tpu.memory_space<vmem>>, vector<16x128xf32>
    tpu.vector_store %arg4[%c0_34, %c0_35], %74 {strides = array<i32>} : memref<16x128xf32, #tpu.memory_space<vmem>>, vector<16x128xf32>,
    %77 = arith.index_cast %c1_i32 : i32 to index
    %c0_36 = arith.constant 0 : index
    %c0_37 = arith.constant 0 : index
    %78 = vector.load %arg3[%77, %c0_36, %c0_37] : memref<16x16x128xf32, #tpu.memory_space<vmem>>, vector<1x16x128xf32>
    %79 = vector.shape_cast %78 : vector<1x16x128xf32> to vector<16x128xf32>
    %80 = vector.shape_cast %74 : vector<16x128xf32> to vector<1x16x128xf32>
    tpu.vector_store %arg3[%77, %c0_36, %c0_37], %80 {strides = array<i32>} : memref<16x16x128xf32, #tpu.memory_space<vmem>>, vector<1x16x128xf32>,
    %c2_i32 = arith.constant 2 : i32
    %81 = arith.index_cast %c2_i32 : i32 to index
    %c0_38 = arith.constant 0 : index
    %c0_39 = arith.constant 0 : index
    %82 = vector.load %arg1[%81, %c0_38, %c0_39] : memref<16x16x512xf32, #tpu.memory_space<vmem>>, vector<1x16x512xf32>
    %83 = vector.shape_cast %82 : vector<1x16x512xf32> to vector<16x512xf32>
    %c0_40 = arith.constant 0 : index
    %c0_41 = arith.constant 0 : index
    %84 = vector.load %arg4[%c0_40, %c0_41] : memref<16x128xf32, #tpu.memory_space<vmem>>, vector<16x128xf32>
    %cst_42 = arith.constant dense<0.000000e+00> : vector<16x512xf32>
    %85 = tpu.matmul %84, %4, %cst_42 {dimension_numbers = #tpu.dot_dimension_numbers<[1], [0], [0], [1], [0, 0, 1, 1], [], []>} : vector<16x128xf32>, vector<128x512xf32>, vector<16x512xf32> -> vector<16x512xf32>
    %86 = arith.addf %83, %85 : vector<16x512xf32>
    %87 = vector.extract_strided_slice %86 {offsets = [0, 0], sizes = [16, 128], strides = [1, 1]} : vector<16x512xf32> to vector<16x128xf32>
    %88 = arith.negf %87 : vector<16x128xf32>
    %89 = math.exp %88 : vector<16x128xf32>
    %cst_43 = arith.constant 1.000000e+00 : f32
    %90 = vector.broadcast %cst_43 : f32 to vector<16x128xf32>
    %91 = arith.addf %90, %89 : vector<16x128xf32>
    %92 = arith.divf %90, %91 : vector<16x128xf32>
    %93 = vector.extract_strided_slice %86 {offsets = [0, 128], sizes = [16, 128], strides = [1, 1]} : vector<16x512xf32> to vector<16x128xf32>
    %94 = arith.negf %93 : vector<16x128xf32>
    %95 = math.exp %94 : vector<16x128xf32>
    %cst_44 = arith.constant 1.000000e+00 : f32
    %96 = vector.broadcast %cst_44 : f32 to vector<16x128xf32>
    %97 = arith.addf %96, %95 : vector<16x128xf32>
    %98 = arith.divf %96, %97 : vector<16x128xf32>
    %99 = vector.extract_strided_slice %86 {offsets = [0, 256], sizes = [16, 128], strides = [1, 1]} : vector<16x512xf32> to vector<16x128xf32>
    %100 = math.tanh %99 : vector<16x128xf32>
    %101 = vector.extract_strided_slice %86 {offsets = [0, 384], sizes = [16, 128], strides = [1, 1]} : vector<16x512xf32> to vector<16x128xf32>
    %102 = arith.negf %101 : vector<16x128xf32>
    %103 = math.exp %102 : vector<16x128xf32>
    %cst_45 = arith.constant 1.000000e+00 : f32
    %104 = vector.broadcast %cst_45 : f32 to vector<16x128xf32>
    %105 = arith.addf %104, %103 : vector<16x128xf32>
    %106 = arith.divf %104, %105 : vector<16x128xf32>
    %c0_46 = arith.constant 0 : index
    %c0_47 = arith.constant 0 : index
    %107 = vector.load %arg5[%c0_46, %c0_47] : memref<16x128xf32, #tpu.memory_space<vmem>>, vector<16x128xf32>
    %108 = arith.mulf %98, %107 : vector<16x128xf32>
    %109 = arith.mulf %92, %100 : vector<16x128xf32>
    %110 = arith.addf %108, %109 : vector<16x128xf32>
    %111 = math.tanh %110 : vector<16x128xf32>
    %112 = arith.mulf %106, %111 : vector<16x128xf32>
    %c0_48 = arith.constant 0 : index
    %c0_49 = arith.constant 0 : index
    %113 = vector.load %arg5[%c0_48, %c0_49] : memref<16x128xf32, #tpu.memory_space<vmem>>, vector<16x128xf32>
    tpu.vector_store %arg5[%c0_48, %c0_49], %110 {strides = array<i32>} : memref<16x128xf32, #tpu.memory_space<vmem>>, vector<16x128xf32>,
    %c0_50 = arith.constant 0 : index
    %c0_51 = arith.constant 0 : index
    %114 = vector.load %arg4[%c0_50, %c0_51] : memref<16x128xf32, #tpu.memory_space<vmem>>, vector<16x128xf32>
    tpu.vector_store %arg4[%c0_50, %c0_51], %112 {strides = array<i32>} : memref<16x128xf32, #tpu.memory_space<vmem>>, vector<16x128xf32>,
    %115 = arith.index_cast %c2_i32 : i32 to index
    %c0_52 = arith.constant 0 : index
    %c0_53 = arith.constant 0 : index
    %116 = vector.load %arg3[%115, %c0_52, %c0_53] : memref<16x16x128xf32, #tpu.memory_space<vmem>>, vector<1x16x128xf32>
    %117 = vector.shape_cast %116 : vector<1x16x128xf32> to vector<16x128xf32>
    %118 = vector.shape_cast %112 : vector<16x128xf32> to vector<1x16x128xf32>
    tpu.vector_store %arg3[%115, %c0_52, %c0_53], %118 {strides = array<i32>} : memref<16x16x128xf32, #tpu.memory_space<vmem>>, vector<1x16x128xf32>,
    %c3_i32 = arith.constant 3 : i32
    %119 = arith.index_cast %c3_i32 : i32 to index
    %c0_54 = arith.constant 0 : index
    %c0_55 = arith.constant 0 : index
    %120 = vector.load %arg1[%119, %c0_54, %c0_55] : memref<16x16x512xf32, #tpu.memory_space<vmem>>, vector<1x16x512xf32>
    %121 = vector.shape_cast %120 : vector<1x16x512xf32> to vector<16x512xf32>
    %c0_56 = arith.constant 0 : index
    %c0_57 = arith.constant 0 : index
    %122 = vector.load %arg4[%c0_56, %c0_57] : memref<16x128xf32, #tpu.memory_space<vmem>>, vector<16x128xf32>
    %cst_58 = arith.constant dense<0.000000e+00> : vector<16x512xf32>
    %123 = tpu.matmul %122, %4, %cst_58 {dimension_numbers = #tpu.dot_dimension_numbers<[1], [0], [0], [1], [0, 0, 1, 1], [], []>} : vector<16x128xf32>, vector<128x512xf32>, vector<16x512xf32> -> vector<16x512xf32>
    %124 = arith.addf %121, %123 : vector<16x512xf32>
    %125 = vector.extract_strided_slice %124 {offsets = [0, 0], sizes = [16, 128], strides = [1, 1]} : vector<16x512xf32> to vector<16x128xf32>
    %126 = arith.negf %125 : vector<16x128xf32>
    %127 = math.exp %126 : vector<16x128xf32>
    %cst_59 = arith.constant 1.000000e+00 : f32
    %128 = vector.broadcast %cst_59 : f32 to vector<16x128xf32>
    %129 = arith.addf %128, %127 : vector<16x128xf32>
    %130 = arith.divf %128, %129 : vector<16x128xf32>
    %131 = vector.extract_strided_slice %124 {offsets = [0, 128], sizes = [16, 128], strides = [1, 1]} : vector<16x512xf32> to vector<16x128xf32>
    %132 = arith.negf %131 : vector<16x128xf32>
    %133 = math.exp %132 : vector<16x128xf32>
    %cst_60 = arith.constant 1.000000e+00 : f32
    %134 = vector.broadcast %cst_60 : f32 to vector<16x128xf32>
    %135 = arith.addf %134, %133 : vector<16x128xf32>
    %136 = arith.divf %134, %135 : vector<16x128xf32>
    %137 = vector.extract_strided_slice %124 {offsets = [0, 256], sizes = [16, 128], strides = [1, 1]} : vector<16x512xf32> to vector<16x128xf32>
    %138 = math.tanh %137 : vector<16x128xf32>
    %139 = vector.extract_strided_slice %124 {offsets = [0, 384], sizes = [16, 128], strides = [1, 1]} : vector<16x512xf32> to vector<16x128xf32>
    %140 = arith.negf %139 : vector<16x128xf32>
    %141 = math.exp %140 : vector<16x128xf32>
    %cst_61 = arith.constant 1.000000e+00 : f32
    %142 = vector.broadcast %cst_61 : f32 to vector<16x128xf32>
    %143 = arith.addf %142, %141 : vector<16x128xf32>
    %144 = arith.divf %142, %143 : vector<16x128xf32>
    %c0_62 = arith.constant 0 : index
    %c0_63 = arith.constant 0 : index
    %145 = vector.load %arg5[%c0_62, %c0_63] : memref<16x128xf32, #tpu.memory_space<vmem>>, vector<16x128xf32>
    %146 = arith.mulf %136, %145 : vector<16x128xf32>
    %147 = arith.mulf %130, %138 : vector<16x128xf32>
    %148 = arith.addf %146, %147 : vector<16x128xf32>
    %149 = math.tanh %148 : vector<16x128xf32>
    %150 = arith.mulf %144, %149 : vector<16x128xf32>
    %c0_64 = arith.constant 0 : index
    %c0_65 = arith.constant 0 : index
    %151 = vector.load %arg5[%c0_64, %c0_65] : memref<16x128xf32, #tpu.memory_space<vmem>>, vector<16x128xf32>
    tpu.vector_store %arg5[%c0_64, %c0_65], %148 {strides = array<i32>} : memref<16x128xf32, #tpu.memory_space<vmem>>, vector<16x128xf32>,
    %c0_66 = arith.constant 0 : index
    %c0_67 = arith.constant 0 : index
    %152 = vector.load %arg4[%c0_66, %c0_67] : memref<16x128xf32, #tpu.memory_space<vmem>>, vector<16x128xf32>
    tpu.vector_store %arg4[%c0_66, %c0_67], %150 {strides = array<i32>} : memref<16x128xf32, #tpu.memory_space<vmem>>, vector<16x128xf32>,
    %153 = arith.index_cast %c3_i32 : i32 to index
    %c0_68 = arith.constant 0 : index
    %c0_69 = arith.constant 0 : index
    %154 = vector.load %arg3[%153, %c0_68, %c0_69] : memref<16x16x128xf32, #tpu.memory_space<vmem>>, vector<1x16x128xf32>
    %155 = vector.shape_cast %154 : vector<1x16x128xf32> to vector<16x128xf32>
    %156 = vector.shape_cast %150 : vector<16x128xf32> to vector<1x16x128xf32>
    tpu.vector_store %arg3[%153, %c0_68, %c0_69], %156 {strides = array<i32>} : memref<16x16x128xf32, #tpu.memory_space<vmem>>, vector<1x16x128xf32>,
    %c4_i32 = arith.constant 4 : i32
    %157 = arith.index_cast %c4_i32 : i32 to index
    %c0_70 = arith.constant 0 : index
    %c0_71 = arith.constant 0 : index
    %158 = vector.load %arg1[%157, %c0_70, %c0_71] : memref<16x16x512xf32, #tpu.memory_space<vmem>>, vector<1x16x512xf32>
    %159 = vector.shape_cast %158 : vector<1x16x512xf32> to vector<16x512xf32>
    %c0_72 = arith.constant 0 : index
    %c0_73 = arith.constant 0 : index
    %160 = vector.load %arg4[%c0_72, %c0_73] : memref<16x128xf32, #tpu.memory_space<vmem>>, vector<16x128xf32>
    %cst_74 = arith.constant dense<0.000000e+00> : vector<16x512xf32>
    %161 = tpu.matmul %160, %4, %cst_74 {dimension_numbers = #tpu.dot_dimension_numbers<[1], [0], [0], [1], [0, 0, 1, 1], [], []>} : vector<16x128xf32>, vector<128x512xf32>, vector<16x512xf32> -> vector<16x512xf32>
    %162 = arith.addf %159, %161 : vector<16x512xf32>
    %163 = vector.extract_strided_slice %162 {offsets = [0, 0], sizes = [16, 128], strides = [1, 1]} : vector<16x512xf32> to vector<16x128xf32>
    %164 = arith.negf %163 : vector<16x128xf32>
    %165 = math.exp %164 : vector<16x128xf32>
    %cst_75 = arith.constant 1.000000e+00 : f32
    %166 = vector.broadcast %cst_75 : f32 to vector<16x128xf32>
    %167 = arith.addf %166, %165 : vector<16x128xf32>
    %168 = arith.divf %166, %167 : vector<16x128xf32>
    %169 = vector.extract_strided_slice %162 {offsets = [0, 128], sizes = [16, 128], strides = [1, 1]} : vector<16x512xf32> to vector<16x128xf32>
    %170 = arith.negf %169 : vector<16x128xf32>
    %171 = math.exp %170 : vector<16x128xf32>
    %cst_76 = arith.constant 1.000000e+00 : f32
    %172 = vector.broadcast %cst_76 : f32 to vector<16x128xf32>
    %173 = arith.addf %172, %171 : vector<16x128xf32>
    %174 = arith.divf %172, %173 : vector<16x128xf32>
    %175 = vector.extract_strided_slice %162 {offsets = [0, 256], sizes = [16, 128], strides = [1, 1]} : vector<16x512xf32> to vector<16x128xf32>
    %176 = math.tanh %175 : vector<16x128xf32>
    %177 = vector.extract_strided_slice %162 {offsets = [0, 384], sizes = [16, 128], strides = [1, 1]} : vector<16x512xf32> to vector<16x128xf32>
    %178 = arith.negf %177 : vector<16x128xf32>
    %179 = math.exp %178 : vector<16x128xf32>
    %cst_77 = arith.constant 1.000000e+00 : f32
    %180 = vector.broadcast %cst_77 : f32 to vector<16x128xf32>
    %181 = arith.addf %180, %179 : vector<16x128xf32>
    %182 = arith.divf %180, %181 : vector<16x128xf32>
    %c0_78 = arith.constant 0 : index
    %c0_79 = arith.constant 0 : index
    %183 = vector.load %arg5[%c0_78, %c0_79] : memref<16x128xf32, #tpu.memory_space<vmem>>, vector<16x128xf32>
    %184 = arith.mulf %174, %183 : vector<16x128xf32>
    %185 = arith.mulf %168, %176 : vector<16x128xf32>
    %186 = arith.addf %184, %185 : vector<16x128xf32>
    %187 = math.tanh %186 : vector<16x128xf32>
    %188 = arith.mulf %182, %187 : vector<16x128xf32>
    %c0_80 = arith.constant 0 : index
    %c0_81 = arith.constant 0 : index
    %189 = vector.load %arg5[%c0_80, %c0_81] : memref<16x128xf32, #tpu.memory_space<vmem>>, vector<16x128xf32>
    tpu.vector_store %arg5[%c0_80, %c0_81], %186 {strides = array<i32>} : memref<16x128xf32, #tpu.memory_space<vmem>>, vector<16x128xf32>,
    %c0_82 = arith.constant 0 : index
    %c0_83 = arith.constant 0 : index
    %190 = vector.load %arg4[%c0_82, %c0_83] : memref<16x128xf32, #tpu.memory_space<vmem>>, vector<16x128xf32>
    tpu.vector_store %arg4[%c0_82, %c0_83], %188 {strides = array<i32>} : memref<16x128xf32, #tpu.memory_space<vmem>>, vector<16x128xf32>,
    %191 = arith.index_cast %c4_i32 : i32 to index
    %c0_84 = arith.constant 0 : index
    %c0_85 = arith.constant 0 : index
    %192 = vector.load %arg3[%191, %c0_84, %c0_85] : memref<16x16x128xf32, #tpu.memory_space<vmem>>, vector<1x16x128xf32>
    %193 = vector.shape_cast %192 : vector<1x16x128xf32> to vector<16x128xf32>
    %194 = vector.shape_cast %188 : vector<16x128xf32> to vector<1x16x128xf32>
    tpu.vector_store %arg3[%191, %c0_84, %c0_85], %194 {strides = array<i32>} : memref<16x16x128xf32, #tpu.memory_space<vmem>>, vector<1x16x128xf32>,
    %c5_i32 = arith.constant 5 : i32
    %195 = arith.index_cast %c5_i32 : i32 to index
    %c0_86 = arith.constant 0 : index
    %c0_87 = arith.constant 0 : index
    %196 = vector.load %arg1[%195, %c0_86, %c0_87] : memref<16x16x512xf32, #tpu.memory_space<vmem>>, vector<1x16x512xf32>
    %197 = vector.shape_cast %196 : vector<1x16x512xf32> to vector<16x512xf32>
    %c0_88 = arith.constant 0 : index
    %c0_89 = arith.constant 0 : index
    %198 = vector.load %arg4[%c0_88, %c0_89] : memref<16x128xf32, #tpu.memory_space<vmem>>, vector<16x128xf32>
    %cst_90 = arith.constant dense<0.000000e+00> : vector<16x512xf32>
    %199 = tpu.matmul %198, %4, %cst_90 {dimension_numbers = #tpu.dot_dimension_numbers<[1], [0], [0], [1], [0, 0, 1, 1], [], []>} : vector<16x128xf32>, vector<128x512xf32>, vector<16x512xf32> -> vector<16x512xf32>
    %200 = arith.addf %197, %199 : vector<16x512xf32>
    %201 = vector.extract_strided_slice %200 {offsets = [0, 0], sizes = [16, 128], strides = [1, 1]} : vector<16x512xf32> to vector<16x128xf32>
    %202 = arith.negf %201 : vector<16x128xf32>
    %203 = math.exp %202 : vector<16x128xf32>
    %cst_91 = arith.constant 1.000000e+00 : f32
    %204 = vector.broadcast %cst_91 : f32 to vector<16x128xf32>
    %205 = arith.addf %204, %203 : vector<16x128xf32>
    %206 = arith.divf %204, %205 : vector<16x128xf32>
    %207 = vector.extract_strided_slice %200 {offsets = [0, 128], sizes = [16, 128], strides = [1, 1]} : vector<16x512xf32> to vector<16x128xf32>
    %208 = arith.negf %207 : vector<16x128xf32>
    %209 = math.exp %208 : vector<16x128xf32>
    %cst_92 = arith.constant 1.000000e+00 : f32
    %210 = vector.broadcast %cst_92 : f32 to vector<16x128xf32>
    %211 = arith.addf %210, %209 : vector<16x128xf32>
    %212 = arith.divf %210, %211 : vector<16x128xf32>
    %213 = vector.extract_strided_slice %200 {offsets = [0, 256], sizes = [16, 128], strides = [1, 1]} : vector<16x512xf32> to vector<16x128xf32>
    %214 = math.tanh %213 : vector<16x128xf32>
    %215 = vector.extract_strided_slice %200 {offsets = [0, 384], sizes = [16, 128], strides = [1, 1]} : vector<16x512xf32> to vector<16x128xf32>
    %216 = arith.negf %215 : vector<16x128xf32>
    %217 = math.exp %216 : vector<16x128xf32>
    %cst_93 = arith.constant 1.000000e+00 : f32
    %218 = vector.broadcast %cst_93 : f32 to vector<16x128xf32>
    %219 = arith.addf %218, %217 : vector<16x128xf32>
    %220 = arith.divf %218, %219 : vector<16x128xf32>
    %c0_94 = arith.constant 0 : index
    %c0_95 = arith.constant 0 : index
    %221 = vector.load %arg5[%c0_94, %c0_95] : memref<16x128xf32, #tpu.memory_space<vmem>>, vector<16x128xf32>
    %222 = arith.mulf %212, %221 : vector<16x128xf32>
    %223 = arith.mulf %206, %214 : vector<16x128xf32>
    %224 = arith.addf %222, %223 : vector<16x128xf32>
    %225 = math.tanh %224 : vector<16x128xf32>
    %226 = arith.mulf %220, %225 : vector<16x128xf32>
    %c0_96 = arith.constant 0 : index
    %c0_97 = arith.constant 0 : index
    %227 = vector.load %arg5[%c0_96, %c0_97] : memref<16x128xf32, #tpu.memory_space<vmem>>, vector<16x128xf32>
    tpu.vector_store %arg5[%c0_96, %c0_97], %224 {strides = array<i32>} : memref<16x128xf32, #tpu.memory_space<vmem>>, vector<16x128xf32>,
    %c0_98 = arith.constant 0 : index
    %c0_99 = arith.constant 0 : index
    %228 = vector.load %arg4[%c0_98, %c0_99] : memref<16x128xf32, #tpu.memory_space<vmem>>, vector<16x128xf32>
    tpu.vector_store %arg4[%c0_98, %c0_99], %226 {strides = array<i32>} : memref<16x128xf32, #tpu.memory_space<vmem>>, vector<16x128xf32>,
    %229 = arith.index_cast %c5_i32 : i32 to index
    %c0_100 = arith.constant 0 : index
    %c0_101 = arith.constant 0 : index
    %230 = vector.load %arg3[%229, %c0_100, %c0_101] : memref<16x16x128xf32, #tpu.memory_space<vmem>>, vector<1x16x128xf32>
    %231 = vector.shape_cast %230 : vector<1x16x128xf32> to vector<16x128xf32>
    %232 = vector.shape_cast %226 : vector<16x128xf32> to vector<1x16x128xf32>
    tpu.vector_store %arg3[%229, %c0_100, %c0_101], %232 {strides = array<i32>} : memref<16x16x128xf32, #tpu.memory_space<vmem>>, vector<1x16x128xf32>,
    %c6_i32 = arith.constant 6 : i32
    %233 = arith.index_cast %c6_i32 : i32 to index
    %c0_102 = arith.constant 0 : index
    %c0_103 = arith.constant 0 : index
    %234 = vector.load %arg1[%233, %c0_102, %c0_103] : memref<16x16x512xf32, #tpu.memory_space<vmem>>, vector<1x16x512xf32>
    %235 = vector.shape_cast %234 : vector<1x16x512xf32> to vector<16x512xf32>
    %c0_104 = arith.constant 0 : index
    %c0_105 = arith.constant 0 : index
    %236 = vector.load %arg4[%c0_104, %c0_105] : memref<16x128xf32, #tpu.memory_space<vmem>>, vector<16x128xf32>
    %cst_106 = arith.constant dense<0.000000e+00> : vector<16x512xf32>
    %237 = tpu.matmul %236, %4, %cst_106 {dimension_numbers = #tpu.dot_dimension_numbers<[1], [0], [0], [1], [0, 0, 1, 1], [], []>} : vector<16x128xf32>, vector<128x512xf32>, vector<16x512xf32> -> vector<16x512xf32>
    %238 = arith.addf %235, %237 : vector<16x512xf32>
    %239 = vector.extract_strided_slice %238 {offsets = [0, 0], sizes = [16, 128], strides = [1, 1]} : vector<16x512xf32> to vector<16x128xf32>
    %240 = arith.negf %239 : vector<16x128xf32>
    %241 = math.exp %240 : vector<16x128xf32>
    %cst_107 = arith.constant 1.000000e+00 : f32
    %242 = vector.broadcast %cst_107 : f32 to vector<16x128xf32>
    %243 = arith.addf %242, %241 : vector<16x128xf32>
    %244 = arith.divf %242, %243 : vector<16x128xf32>
    %245 = vector.extract_strided_slice %238 {offsets = [0, 128], sizes = [16, 128], strides = [1, 1]} : vector<16x512xf32> to vector<16x128xf32>
    %246 = arith.negf %245 : vector<16x128xf32>
    %247 = math.exp %246 : vector<16x128xf32>
    %cst_108 = arith.constant 1.000000e+00 : f32
    %248 = vector.broadcast %cst_108 : f32 to vector<16x128xf32>
    %249 = arith.addf %248, %247 : vector<16x128xf32>
    %250 = arith.divf %248, %249 : vector<16x128xf32>
    %251 = vector.extract_strided_slice %238 {offsets = [0, 256], sizes = [16, 128], strides = [1, 1]} : vector<16x512xf32> to vector<16x128xf32>
    %252 = math.tanh %251 : vector<16x128xf32>
    %253 = vector.extract_strided_slice %238 {offsets = [0, 384], sizes = [16, 128], strides = [1, 1]} : vector<16x512xf32> to vector<16x128xf32>
    %254 = arith.negf %253 : vector<16x128xf32>
    %255 = math.exp %254 : vector<16x128xf32>
    %cst_109 = arith.constant 1.000000e+00 : f32
    %256 = vector.broadcast %cst_109 : f32 to vector<16x128xf32>
    %257 = arith.addf %256, %255 : vector<16x128xf32>
    %258 = arith.divf %256, %257 : vector<16x128xf32>
    %c0_110 = arith.constant 0 : index
    %c0_111 = arith.constant 0 : index
    %259 = vector.load %arg5[%c0_110, %c0_111] : memref<16x128xf32, #tpu.memory_space<vmem>>, vector<16x128xf32>
    %260 = arith.mulf %250, %259 : vector<16x128xf32>
    %261 = arith.mulf %244, %252 : vector<16x128xf32>
    %262 = arith.addf %260, %261 : vector<16x128xf32>
    %263 = math.tanh %262 : vector<16x128xf32>
    %264 = arith.mulf %258, %263 : vector<16x128xf32>
    %c0_112 = arith.constant 0 : index
    %c0_113 = arith.constant 0 : index
    %265 = vector.load %arg5[%c0_112, %c0_113] : memref<16x128xf32, #tpu.memory_space<vmem>>, vector<16x128xf32>
    tpu.vector_store %arg5[%c0_112, %c0_113], %262 {strides = array<i32>} : memref<16x128xf32, #tpu.memory_space<vmem>>, vector<16x128xf32>,
    %c0_114 = arith.constant 0 : index
    %c0_115 = arith.constant 0 : index
    %266 = vector.load %arg4[%c0_114, %c0_115] : memref<16x128xf32, #tpu.memory_space<vmem>>, vector<16x128xf32>
    tpu.vector_store %arg4[%c0_114, %c0_115], %264 {strides = array<i32>} : memref<16x128xf32, #tpu.memory_space<vmem>>, vector<16x128xf32>,
    %267 = arith.index_cast %c6_i32 : i32 to index
    %c0_116 = arith.constant 0 : index
    %c0_117 = arith.constant 0 : index
    %268 = vector.load %arg3[%267, %c0_116, %c0_117] : memref<16x16x128xf32, #tpu.memory_space<vmem>>, vector<1x16x128xf32>
    %269 = vector.shape_cast %268 : vector<1x16x128xf32> to vector<16x128xf32>
    %270 = vector.shape_cast %264 : vector<16x128xf32> to vector<1x16x128xf32>
    tpu.vector_store %arg3[%267, %c0_116, %c0_117], %270 {strides = array<i32>} : memref<16x16x128xf32, #tpu.memory_space<vmem>>, vector<1x16x128xf32>,
    %c7_i32 = arith.constant 7 : i32
    %271 = arith.index_cast %c7_i32 : i32 to index
    %c0_118 = arith.constant 0 : index
    %c0_119 = arith.constant 0 : index
    %272 = vector.load %arg1[%271, %c0_118, %c0_119] : memref<16x16x512xf32, #tpu.memory_space<vmem>>, vector<1x16x512xf32>
    %273 = vector.shape_cast %272 : vector<1x16x512xf32> to vector<16x512xf32>
    %c0_120 = arith.constant 0 : index
    %c0_121 = arith.constant 0 : index
    %274 = vector.load %arg4[%c0_120, %c0_121] : memref<16x128xf32, #tpu.memory_space<vmem>>, vector<16x128xf32>
    %cst_122 = arith.constant dense<0.000000e+00> : vector<16x512xf32>
    %275 = tpu.matmul %274, %4, %cst_122 {dimension_numbers = #tpu.dot_dimension_numbers<[1], [0], [0], [1], [0, 0, 1, 1], [], []>} : vector<16x128xf32>, vector<128x512xf32>, vector<16x512xf32> -> vector<16x512xf32>
    %276 = arith.addf %273, %275 : vector<16x512xf32>
    %277 = vector.extract_strided_slice %276 {offsets = [0, 0], sizes = [16, 128], strides = [1, 1]} : vector<16x512xf32> to vector<16x128xf32>
    %278 = arith.negf %277 : vector<16x128xf32>
    %279 = math.exp %278 : vector<16x128xf32>
    %cst_123 = arith.constant 1.000000e+00 : f32
    %280 = vector.broadcast %cst_123 : f32 to vector<16x128xf32>
    %281 = arith.addf %280, %279 : vector<16x128xf32>
    %282 = arith.divf %280, %281 : vector<16x128xf32>
    %283 = vector.extract_strided_slice %276 {offsets = [0, 128], sizes = [16, 128], strides = [1, 1]} : vector<16x512xf32> to vector<16x128xf32>
    %284 = arith.negf %283 : vector<16x128xf32>
    %285 = math.exp %284 : vector<16x128xf32>
    %cst_124 = arith.constant 1.000000e+00 : f32
    %286 = vector.broadcast %cst_124 : f32 to vector<16x128xf32>
    %287 = arith.addf %286, %285 : vector<16x128xf32>
    %288 = arith.divf %286, %287 : vector<16x128xf32>
    %289 = vector.extract_strided_slice %276 {offsets = [0, 256], sizes = [16, 128], strides = [1, 1]} : vector<16x512xf32> to vector<16x128xf32>
    %290 = math.tanh %289 : vector<16x128xf32>
    %291 = vector.extract_strided_slice %276 {offsets = [0, 384], sizes = [16, 128], strides = [1, 1]} : vector<16x512xf32> to vector<16x128xf32>
    %292 = arith.negf %291 : vector<16x128xf32>
    %293 = math.exp %292 : vector<16x128xf32>
    %cst_125 = arith.constant 1.000000e+00 : f32
    %294 = vector.broadcast %cst_125 : f32 to vector<16x128xf32>
    %295 = arith.addf %294, %293 : vector<16x128xf32>
    %296 = arith.divf %294, %295 : vector<16x128xf32>
    %c0_126 = arith.constant 0 : index
    %c0_127 = arith.constant 0 : index
    %297 = vector.load %arg5[%c0_126, %c0_127] : memref<16x128xf32, #tpu.memory_space<vmem>>, vector<16x128xf32>
    %298 = arith.mulf %288, %297 : vector<16x128xf32>
    %299 = arith.mulf %282, %290 : vector<16x128xf32>
    %300 = arith.addf %298, %299 : vector<16x128xf32>
    %301 = math.tanh %300 : vector<16x128xf32>
    %302 = arith.mulf %296, %301 : vector<16x128xf32>
    %c0_128 = arith.constant 0 : index
    %c0_129 = arith.constant 0 : index
    %303 = vector.load %arg5[%c0_128, %c0_129] : memref<16x128xf32, #tpu.memory_space<vmem>>, vector<16x128xf32>
    tpu.vector_store %arg5[%c0_128, %c0_129], %300 {strides = array<i32>} : memref<16x128xf32, #tpu.memory_space<vmem>>, vector<16x128xf32>,
    %c0_130 = arith.constant 0 : index
    %c0_131 = arith.constant 0 : index
    %304 = vector.load %arg4[%c0_130, %c0_131] : memref<16x128xf32, #tpu.memory_space<vmem>>, vector<16x128xf32>
    tpu.vector_store %arg4[%c0_130, %c0_131], %302 {strides = array<i32>} : memref<16x128xf32, #tpu.memory_space<vmem>>, vector<16x128xf32>,
    %305 = arith.index_cast %c7_i32 : i32 to index
    %c0_132 = arith.constant 0 : index
    %c0_133 = arith.constant 0 : index
    %306 = vector.load %arg3[%305, %c0_132, %c0_133] : memref<16x16x128xf32, #tpu.memory_space<vmem>>, vector<1x16x128xf32>
    %307 = vector.shape_cast %306 : vector<1x16x128xf32> to vector<16x128xf32>
    %308 = vector.shape_cast %302 : vector<16x128xf32> to vector<1x16x128xf32>
    tpu.vector_store %arg3[%305, %c0_132, %c0_133], %308 {strides = array<i32>} : memref<16x16x128xf32, #tpu.memory_space<vmem>>, vector<1x16x128xf32>,
    %c8_i32 = arith.constant 8 : i32
    %309 = arith.index_cast %c8_i32 : i32 to index
    %c0_134 = arith.constant 0 : index
    %c0_135 = arith.constant 0 : index
    %310 = vector.load %arg1[%309, %c0_134, %c0_135] : memref<16x16x512xf32, #tpu.memory_space<vmem>>, vector<1x16x512xf32>
    %311 = vector.shape_cast %310 : vector<1x16x512xf32> to vector<16x512xf32>
    %c0_136 = arith.constant 0 : index
    %c0_137 = arith.constant 0 : index
    %312 = vector.load %arg4[%c0_136, %c0_137] : memref<16x128xf32, #tpu.memory_space<vmem>>, vector<16x128xf32>
    %cst_138 = arith.constant dense<0.000000e+00> : vector<16x512xf32>
    %313 = tpu.matmul %312, %4, %cst_138 {dimension_numbers = #tpu.dot_dimension_numbers<[1], [0], [0], [1], [0, 0, 1, 1], [], []>} : vector<16x128xf32>, vector<128x512xf32>, vector<16x512xf32> -> vector<16x512xf32>
    %314 = arith.addf %311, %313 : vector<16x512xf32>
    %315 = vector.extract_strided_slice %314 {offsets = [0, 0], sizes = [16, 128], strides = [1, 1]} : vector<16x512xf32> to vector<16x128xf32>
    %316 = arith.negf %315 : vector<16x128xf32>
    %317 = math.exp %316 : vector<16x128xf32>
    %cst_139 = arith.constant 1.000000e+00 : f32
    %318 = vector.broadcast %cst_139 : f32 to vector<16x128xf32>
    %319 = arith.addf %318, %317 : vector<16x128xf32>
    %320 = arith.divf %318, %319 : vector<16x128xf32>
    %321 = vector.extract_strided_slice %314 {offsets = [0, 128], sizes = [16, 128], strides = [1, 1]} : vector<16x512xf32> to vector<16x128xf32>
    %322 = arith.negf %321 : vector<16x128xf32>
    %323 = math.exp %322 : vector<16x128xf32>
    %cst_140 = arith.constant 1.000000e+00 : f32
    %324 = vector.broadcast %cst_140 : f32 to vector<16x128xf32>
    %325 = arith.addf %324, %323 : vector<16x128xf32>
    %326 = arith.divf %324, %325 : vector<16x128xf32>
    %327 = vector.extract_strided_slice %314 {offsets = [0, 256], sizes = [16, 128], strides = [1, 1]} : vector<16x512xf32> to vector<16x128xf32>
    %328 = math.tanh %327 : vector<16x128xf32>
    %329 = vector.extract_strided_slice %314 {offsets = [0, 384], sizes = [16, 128], strides = [1, 1]} : vector<16x512xf32> to vector<16x128xf32>
    %330 = arith.negf %329 : vector<16x128xf32>
    %331 = math.exp %330 : vector<16x128xf32>
    %cst_141 = arith.constant 1.000000e+00 : f32
    %332 = vector.broadcast %cst_141 : f32 to vector<16x128xf32>
    %333 = arith.addf %332, %331 : vector<16x128xf32>
    %334 = arith.divf %332, %333 : vector<16x128xf32>
    %c0_142 = arith.constant 0 : index
    %c0_143 = arith.constant 0 : index
    %335 = vector.load %arg5[%c0_142, %c0_143] : memref<16x128xf32, #tpu.memory_space<vmem>>, vector<16x128xf32>
    %336 = arith.mulf %326, %335 : vector<16x128xf32>
    %337 = arith.mulf %320, %328 : vector<16x128xf32>
    %338 = arith.addf %336, %337 : vector<16x128xf32>
    %339 = math.tanh %338 : vector<16x128xf32>
    %340 = arith.mulf %334, %339 : vector<16x128xf32>
    %c0_144 = arith.constant 0 : index
    %c0_145 = arith.constant 0 : index
    %341 = vector.load %arg5[%c0_144, %c0_145] : memref<16x128xf32, #tpu.memory_space<vmem>>, vector<16x128xf32>
    tpu.vector_store %arg5[%c0_144, %c0_145], %338 {strides = array<i32>} : memref<16x128xf32, #tpu.memory_space<vmem>>, vector<16x128xf32>,
    %c0_146 = arith.constant 0 : index
    %c0_147 = arith.constant 0 : index
    %342 = vector.load %arg4[%c0_146, %c0_147] : memref<16x128xf32, #tpu.memory_space<vmem>>, vector<16x128xf32>
    tpu.vector_store %arg4[%c0_146, %c0_147], %340 {strides = array<i32>} : memref<16x128xf32, #tpu.memory_space<vmem>>, vector<16x128xf32>,
    %343 = arith.index_cast %c8_i32 : i32 to index
    %c0_148 = arith.constant 0 : index
    %c0_149 = arith.constant 0 : index
    %344 = vector.load %arg3[%343, %c0_148, %c0_149] : memref<16x16x128xf32, #tpu.memory_space<vmem>>, vector<1x16x128xf32>
    %345 = vector.shape_cast %344 : vector<1x16x128xf32> to vector<16x128xf32>
    %346 = vector.shape_cast %340 : vector<16x128xf32> to vector<1x16x128xf32>
    tpu.vector_store %arg3[%343, %c0_148, %c0_149], %346 {strides = array<i32>} : memref<16x16x128xf32, #tpu.memory_space<vmem>>, vector<1x16x128xf32>,
    %c9_i32 = arith.constant 9 : i32
    %347 = arith.index_cast %c9_i32 : i32 to index
    %c0_150 = arith.constant 0 : index
    %c0_151 = arith.constant 0 : index
    %348 = vector.load %arg1[%347, %c0_150, %c0_151] : memref<16x16x512xf32, #tpu.memory_space<vmem>>, vector<1x16x512xf32>
    %349 = vector.shape_cast %348 : vector<1x16x512xf32> to vector<16x512xf32>
    %c0_152 = arith.constant 0 : index
    %c0_153 = arith.constant 0 : index
    %350 = vector.load %arg4[%c0_152, %c0_153] : memref<16x128xf32, #tpu.memory_space<vmem>>, vector<16x128xf32>
    %cst_154 = arith.constant dense<0.000000e+00> : vector<16x512xf32>
    %351 = tpu.matmul %350, %4, %cst_154 {dimension_numbers = #tpu.dot_dimension_numbers<[1], [0], [0], [1], [0, 0, 1, 1], [], []>} : vector<16x128xf32>, vector<128x512xf32>, vector<16x512xf32> -> vector<16x512xf32>
    %352 = arith.addf %349, %351 : vector<16x512xf32>
    %353 = vector.extract_strided_slice %352 {offsets = [0, 0], sizes = [16, 128], strides = [1, 1]} : vector<16x512xf32> to vector<16x128xf32>
    %354 = arith.negf %353 : vector<16x128xf32>
    %355 = math.exp %354 : vector<16x128xf32>
    %cst_155 = arith.constant 1.000000e+00 : f32
    %356 = vector.broadcast %cst_155 : f32 to vector<16x128xf32>
    %357 = arith.addf %356, %355 : vector<16x128xf32>
    %358 = arith.divf %356, %357 : vector<16x128xf32>
    %359 = vector.extract_strided_slice %352 {offsets = [0, 128], sizes = [16, 128], strides = [1, 1]} : vector<16x512xf32> to vector<16x128xf32>
    %360 = arith.negf %359 : vector<16x128xf32>
    %361 = math.exp %360 : vector<16x128xf32>
    %cst_156 = arith.constant 1.000000e+00 : f32
    %362 = vector.broadcast %cst_156 : f32 to vector<16x128xf32>
    %363 = arith.addf %362, %361 : vector<16x128xf32>
    %364 = arith.divf %362, %363 : vector<16x128xf32>
    %365 = vector.extract_strided_slice %352 {offsets = [0, 256], sizes = [16, 128], strides = [1, 1]} : vector<16x512xf32> to vector<16x128xf32>
    %366 = math.tanh %365 : vector<16x128xf32>
    %367 = vector.extract_strided_slice %352 {offsets = [0, 384], sizes = [16, 128], strides = [1, 1]} : vector<16x512xf32> to vector<16x128xf32>
    %368 = arith.negf %367 : vector<16x128xf32>
    %369 = math.exp %368 : vector<16x128xf32>
    %cst_157 = arith.constant 1.000000e+00 : f32
    %370 = vector.broadcast %cst_157 : f32 to vector<16x128xf32>
    %371 = arith.addf %370, %369 : vector<16x128xf32>
    %372 = arith.divf %370, %371 : vector<16x128xf32>
    %c0_158 = arith.constant 0 : index
    %c0_159 = arith.constant 0 : index
    %373 = vector.load %arg5[%c0_158, %c0_159] : memref<16x128xf32, #tpu.memory_space<vmem>>, vector<16x128xf32>
    %374 = arith.mulf %364, %373 : vector<16x128xf32>
    %375 = arith.mulf %358, %366 : vector<16x128xf32>
    %376 = arith.addf %374, %375 : vector<16x128xf32>
    %377 = math.tanh %376 : vector<16x128xf32>
    %378 = arith.mulf %372, %377 : vector<16x128xf32>
    %c0_160 = arith.constant 0 : index
    %c0_161 = arith.constant 0 : index
    %379 = vector.load %arg5[%c0_160, %c0_161] : memref<16x128xf32, #tpu.memory_space<vmem>>, vector<16x128xf32>
    tpu.vector_store %arg5[%c0_160, %c0_161], %376 {strides = array<i32>} : memref<16x128xf32, #tpu.memory_space<vmem>>, vector<16x128xf32>,
    %c0_162 = arith.constant 0 : index
    %c0_163 = arith.constant 0 : index
    %380 = vector.load %arg4[%c0_162, %c0_163] : memref<16x128xf32, #tpu.memory_space<vmem>>, vector<16x128xf32>
    tpu.vector_store %arg4[%c0_162, %c0_163], %378 {strides = array<i32>} : memref<16x128xf32, #tpu.memory_space<vmem>>, vector<16x128xf32>,
    %381 = arith.index_cast %c9_i32 : i32 to index
    %c0_164 = arith.constant 0 : index
    %c0_165 = arith.constant 0 : index
    %382 = vector.load %arg3[%381, %c0_164, %c0_165] : memref<16x16x128xf32, #tpu.memory_space<vmem>>, vector<1x16x128xf32>
    %383 = vector.shape_cast %382 : vector<1x16x128xf32> to vector<16x128xf32>
    %384 = vector.shape_cast %378 : vector<16x128xf32> to vector<1x16x128xf32>
    tpu.vector_store %arg3[%381, %c0_164, %c0_165], %384 {strides = array<i32>} : memref<16x16x128xf32, #tpu.memory_space<vmem>>, vector<1x16x128xf32>,
    %c10_i32 = arith.constant 10 : i32
    %385 = arith.index_cast %c10_i32 : i32 to index
    %c0_166 = arith.constant 0 : index
    %c0_167 = arith.constant 0 : index
    %386 = vector.load %arg1[%385, %c0_166, %c0_167] : memref<16x16x512xf32, #tpu.memory_space<vmem>>, vector<1x16x512xf32>
    %387 = vector.shape_cast %386 : vector<1x16x512xf32> to vector<16x512xf32>
    %c0_168 = arith.constant 0 : index
    %c0_169 = arith.constant 0 : index
    %388 = vector.load %arg4[%c0_168, %c0_169] : memref<16x128xf32, #tpu.memory_space<vmem>>, vector<16x128xf32>
    %cst_170 = arith.constant dense<0.000000e+00> : vector<16x512xf32>
    %389 = tpu.matmul %388, %4, %cst_170 {dimension_numbers = #tpu.dot_dimension_numbers<[1], [0], [0], [1], [0, 0, 1, 1], [], []>} : vector<16x128xf32>, vector<128x512xf32>, vector<16x512xf32> -> vector<16x512xf32>
    %390 = arith.addf %387, %389 : vector<16x512xf32>
    %391 = vector.extract_strided_slice %390 {offsets = [0, 0], sizes = [16, 128], strides = [1, 1]} : vector<16x512xf32> to vector<16x128xf32>
    %392 = arith.negf %391 : vector<16x128xf32>
    %393 = math.exp %392 : vector<16x128xf32>
    %cst_171 = arith.constant 1.000000e+00 : f32
    %394 = vector.broadcast %cst_171 : f32 to vector<16x128xf32>
    %395 = arith.addf %394, %393 : vector<16x128xf32>
    %396 = arith.divf %394, %395 : vector<16x128xf32>
    %397 = vector.extract_strided_slice %390 {offsets = [0, 128], sizes = [16, 128], strides = [1, 1]} : vector<16x512xf32> to vector<16x128xf32>
    %398 = arith.negf %397 : vector<16x128xf32>
    %399 = math.exp %398 : vector<16x128xf32>
    %cst_172 = arith.constant 1.000000e+00 : f32
    %400 = vector.broadcast %cst_172 : f32 to vector<16x128xf32>
    %401 = arith.addf %400, %399 : vector<16x128xf32>
    %402 = arith.divf %400, %401 : vector<16x128xf32>
    %403 = vector.extract_strided_slice %390 {offsets = [0, 256], sizes = [16, 128], strides = [1, 1]} : vector<16x512xf32> to vector<16x128xf32>
    %404 = math.tanh %403 : vector<16x128xf32>
    %405 = vector.extract_strided_slice %390 {offsets = [0, 384], sizes = [16, 128], strides = [1, 1]} : vector<16x512xf32> to vector<16x128xf32>
    %406 = arith.negf %405 : vector<16x128xf32>
    %407 = math.exp %406 : vector<16x128xf32>
    %cst_173 = arith.constant 1.000000e+00 : f32
    %408 = vector.broadcast %cst_173 : f32 to vector<16x128xf32>
    %409 = arith.addf %408, %407 : vector<16x128xf32>
    %410 = arith.divf %408, %409 : vector<16x128xf32>
    %c0_174 = arith.constant 0 : index
    %c0_175 = arith.constant 0 : index
    %411 = vector.load %arg5[%c0_174, %c0_175] : memref<16x128xf32, #tpu.memory_space<vmem>>, vector<16x128xf32>
    %412 = arith.mulf %402, %411 : vector<16x128xf32>
    %413 = arith.mulf %396, %404 : vector<16x128xf32>
    %414 = arith.addf %412, %413 : vector<16x128xf32>
    %415 = math.tanh %414 : vector<16x128xf32>
    %416 = arith.mulf %410, %415 : vector<16x128xf32>
    %c0_176 = arith.constant 0 : index
    %c0_177 = arith.constant 0 : index
    %417 = vector.load %arg5[%c0_176, %c0_177] : memref<16x128xf32, #tpu.memory_space<vmem>>, vector<16x128xf32>
    tpu.vector_store %arg5[%c0_176, %c0_177], %414 {strides = array<i32>} : memref<16x128xf32, #tpu.memory_space<vmem>>, vector<16x128xf32>,
    %c0_178 = arith.constant 0 : index
    %c0_179 = arith.constant 0 : index
    %418 = vector.load %arg4[%c0_178, %c0_179] : memref<16x128xf32, #tpu.memory_space<vmem>>, vector<16x128xf32>
    tpu.vector_store %arg4[%c0_178, %c0_179], %416 {strides = array<i32>} : memref<16x128xf32, #tpu.memory_space<vmem>>, vector<16x128xf32>,
    %419 = arith.index_cast %c10_i32 : i32 to index
    %c0_180 = arith.constant 0 : index
    %c0_181 = arith.constant 0 : index
    %420 = vector.load %arg3[%419, %c0_180, %c0_181] : memref<16x16x128xf32, #tpu.memory_space<vmem>>, vector<1x16x128xf32>
    %421 = vector.shape_cast %420 : vector<1x16x128xf32> to vector<16x128xf32>
    %422 = vector.shape_cast %416 : vector<16x128xf32> to vector<1x16x128xf32>
    tpu.vector_store %arg3[%419, %c0_180, %c0_181], %422 {strides = array<i32>} : memref<16x16x128xf32, #tpu.memory_space<vmem>>, vector<1x16x128xf32>,
    %c11_i32 = arith.constant 11 : i32
    %423 = arith.index_cast %c11_i32 : i32 to index
    %c0_182 = arith.constant 0 : index
    %c0_183 = arith.constant 0 : index
    %424 = vector.load %arg1[%423, %c0_182, %c0_183] : memref<16x16x512xf32, #tpu.memory_space<vmem>>, vector<1x16x512xf32>
    %425 = vector.shape_cast %424 : vector<1x16x512xf32> to vector<16x512xf32>
    %c0_184 = arith.constant 0 : index
    %c0_185 = arith.constant 0 : index
    %426 = vector.load %arg4[%c0_184, %c0_185] : memref<16x128xf32, #tpu.memory_space<vmem>>, vector<16x128xf32>
    %cst_186 = arith.constant dense<0.000000e+00> : vector<16x512xf32>
    %427 = tpu.matmul %426, %4, %cst_186 {dimension_numbers = #tpu.dot_dimension_numbers<[1], [0], [0], [1], [0, 0, 1, 1], [], []>} : vector<16x128xf32>, vector<128x512xf32>, vector<16x512xf32> -> vector<16x512xf32>
    %428 = arith.addf %425, %427 : vector<16x512xf32>
    %429 = vector.extract_strided_slice %428 {offsets = [0, 0], sizes = [16, 128], strides = [1, 1]} : vector<16x512xf32> to vector<16x128xf32>
    %430 = arith.negf %429 : vector<16x128xf32>
    %431 = math.exp %430 : vector<16x128xf32>
    %cst_187 = arith.constant 1.000000e+00 : f32
    %432 = vector.broadcast %cst_187 : f32 to vector<16x128xf32>
    %433 = arith.addf %432, %431 : vector<16x128xf32>
    %434 = arith.divf %432, %433 : vector<16x128xf32>
    %435 = vector.extract_strided_slice %428 {offsets = [0, 128], sizes = [16, 128], strides = [1, 1]} : vector<16x512xf32> to vector<16x128xf32>
    %436 = arith.negf %435 : vector<16x128xf32>
    %437 = math.exp %436 : vector<16x128xf32>
    %cst_188 = arith.constant 1.000000e+00 : f32
    %438 = vector.broadcast %cst_188 : f32 to vector<16x128xf32>
    %439 = arith.addf %438, %437 : vector<16x128xf32>
    %440 = arith.divf %438, %439 : vector<16x128xf32>
    %441 = vector.extract_strided_slice %428 {offsets = [0, 256], sizes = [16, 128], strides = [1, 1]} : vector<16x512xf32> to vector<16x128xf32>
    %442 = math.tanh %441 : vector<16x128xf32>
    %443 = vector.extract_strided_slice %428 {offsets = [0, 384], sizes = [16, 128], strides = [1, 1]} : vector<16x512xf32> to vector<16x128xf32>
    %444 = arith.negf %443 : vector<16x128xf32>
    %445 = math.exp %444 : vector<16x128xf32>
    %cst_189 = arith.constant 1.000000e+00 : f32
    %446 = vector.broadcast %cst_189 : f32 to vector<16x128xf32>
    %447 = arith.addf %446, %445 : vector<16x128xf32>
    %448 = arith.divf %446, %447 : vector<16x128xf32>
    %c0_190 = arith.constant 0 : index
    %c0_191 = arith.constant 0 : index
    %449 = vector.load %arg5[%c0_190, %c0_191] : memref<16x128xf32, #tpu.memory_space<vmem>>, vector<16x128xf32>
    %450 = arith.mulf %440, %449 : vector<16x128xf32>
    %451 = arith.mulf %434, %442 : vector<16x128xf32>
    %452 = arith.addf %450, %451 : vector<16x128xf32>
    %453 = math.tanh %452 : vector<16x128xf32>
    %454 = arith.mulf %448, %453 : vector<16x128xf32>
    %c0_192 = arith.constant 0 : index
    %c0_193 = arith.constant 0 : index
    %455 = vector.load %arg5[%c0_192, %c0_193] : memref<16x128xf32, #tpu.memory_space<vmem>>, vector<16x128xf32>
    tpu.vector_store %arg5[%c0_192, %c0_193], %452 {strides = array<i32>} : memref<16x128xf32, #tpu.memory_space<vmem>>, vector<16x128xf32>,
    %c0_194 = arith.constant 0 : index
    %c0_195 = arith.constant 0 : index
    %456 = vector.load %arg4[%c0_194, %c0_195] : memref<16x128xf32, #tpu.memory_space<vmem>>, vector<16x128xf32>
    tpu.vector_store %arg4[%c0_194, %c0_195], %454 {strides = array<i32>} : memref<16x128xf32, #tpu.memory_space<vmem>>, vector<16x128xf32>,
    %457 = arith.index_cast %c11_i32 : i32 to index
    %c0_196 = arith.constant 0 : index
    %c0_197 = arith.constant 0 : index
    %458 = vector.load %arg3[%457, %c0_196, %c0_197] : memref<16x16x128xf32, #tpu.memory_space<vmem>>, vector<1x16x128xf32>
    %459 = vector.shape_cast %458 : vector<1x16x128xf32> to vector<16x128xf32>
    %460 = vector.shape_cast %454 : vector<16x128xf32> to vector<1x16x128xf32>
    tpu.vector_store %arg3[%457, %c0_196, %c0_197], %460 {strides = array<i32>} : memref<16x16x128xf32, #tpu.memory_space<vmem>>, vector<1x16x128xf32>,
    %c12_i32 = arith.constant 12 : i32
    %461 = arith.index_cast %c12_i32 : i32 to index
    %c0_198 = arith.constant 0 : index
    %c0_199 = arith.constant 0 : index
    %462 = vector.load %arg1[%461, %c0_198, %c0_199] : memref<16x16x512xf32, #tpu.memory_space<vmem>>, vector<1x16x512xf32>
    %463 = vector.shape_cast %462 : vector<1x16x512xf32> to vector<16x512xf32>
    %c0_200 = arith.constant 0 : index
    %c0_201 = arith.constant 0 : index
    %464 = vector.load %arg4[%c0_200, %c0_201] : memref<16x128xf32, #tpu.memory_space<vmem>>, vector<16x128xf32>
    %cst_202 = arith.constant dense<0.000000e+00> : vector<16x512xf32>
    %465 = tpu.matmul %464, %4, %cst_202 {dimension_numbers = #tpu.dot_dimension_numbers<[1], [0], [0], [1], [0, 0, 1, 1], [], []>} : vector<16x128xf32>, vector<128x512xf32>, vector<16x512xf32> -> vector<16x512xf32>
    %466 = arith.addf %463, %465 : vector<16x512xf32>
    %467 = vector.extract_strided_slice %466 {offsets = [0, 0], sizes = [16, 128], strides = [1, 1]} : vector<16x512xf32> to vector<16x128xf32>
    %468 = arith.negf %467 : vector<16x128xf32>
    %469 = math.exp %468 : vector<16x128xf32>
    %cst_203 = arith.constant 1.000000e+00 : f32
    %470 = vector.broadcast %cst_203 : f32 to vector<16x128xf32>
    %471 = arith.addf %470, %469 : vector<16x128xf32>
    %472 = arith.divf %470, %471 : vector<16x128xf32>
    %473 = vector.extract_strided_slice %466 {offsets = [0, 128], sizes = [16, 128], strides = [1, 1]} : vector<16x512xf32> to vector<16x128xf32>
    %474 = arith.negf %473 : vector<16x128xf32>
    %475 = math.exp %474 : vector<16x128xf32>
    %cst_204 = arith.constant 1.000000e+00 : f32
    %476 = vector.broadcast %cst_204 : f32 to vector<16x128xf32>
    %477 = arith.addf %476, %475 : vector<16x128xf32>
    %478 = arith.divf %476, %477 : vector<16x128xf32>
    %479 = vector.extract_strided_slice %466 {offsets = [0, 256], sizes = [16, 128], strides = [1, 1]} : vector<16x512xf32> to vector<16x128xf32>
    %480 = math.tanh %479 : vector<16x128xf32>
    %481 = vector.extract_strided_slice %466 {offsets = [0, 384], sizes = [16, 128], strides = [1, 1]} : vector<16x512xf32> to vector<16x128xf32>
    %482 = arith.negf %481 : vector<16x128xf32>
    %483 = math.exp %482 : vector<16x128xf32>
    %cst_205 = arith.constant 1.000000e+00 : f32
    %484 = vector.broadcast %cst_205 : f32 to vector<16x128xf32>
    %485 = arith.addf %484, %483 : vector<16x128xf32>
    %486 = arith.divf %484, %485 : vector<16x128xf32>
    %c0_206 = arith.constant 0 : index
    %c0_207 = arith.constant 0 : index
    %487 = vector.load %arg5[%c0_206, %c0_207] : memref<16x128xf32, #tpu.memory_space<vmem>>, vector<16x128xf32>
    %488 = arith.mulf %478, %487 : vector<16x128xf32>
    %489 = arith.mulf %472, %480 : vector<16x128xf32>
    %490 = arith.addf %488, %489 : vector<16x128xf32>
    %491 = math.tanh %490 : vector<16x128xf32>
    %492 = arith.mulf %486, %491 : vector<16x128xf32>
    %c0_208 = arith.constant 0 : index
    %c0_209 = arith.constant 0 : index
    %493 = vector.load %arg5[%c0_208, %c0_209] : memref<16x128xf32, #tpu.memory_space<vmem>>, vector<16x128xf32>
    tpu.vector_store %arg5[%c0_208, %c0_209], %490 {strides = array<i32>} : memref<16x128xf32, #tpu.memory_space<vmem>>, vector<16x128xf32>,
    %c0_210 = arith.constant 0 : index
    %c0_211 = arith.constant 0 : index
    %494 = vector.load %arg4[%c0_210, %c0_211] : memref<16x128xf32, #tpu.memory_space<vmem>>, vector<16x128xf32>
    tpu.vector_store %arg4[%c0_210, %c0_211], %492 {strides = array<i32>} : memref<16x128xf32, #tpu.memory_space<vmem>>, vector<16x128xf32>,
    %495 = arith.index_cast %c12_i32 : i32 to index
    %c0_212 = arith.constant 0 : index
    %c0_213 = arith.constant 0 : index
    %496 = vector.load %arg3[%495, %c0_212, %c0_213] : memref<16x16x128xf32, #tpu.memory_space<vmem>>, vector<1x16x128xf32>
    %497 = vector.shape_cast %496 : vector<1x16x128xf32> to vector<16x128xf32>
    %498 = vector.shape_cast %492 : vector<16x128xf32> to vector<1x16x128xf32>
    tpu.vector_store %arg3[%495, %c0_212, %c0_213], %498 {strides = array<i32>} : memref<16x16x128xf32, #tpu.memory_space<vmem>>, vector<1x16x128xf32>,
    %c13_i32 = arith.constant 13 : i32
    %499 = arith.index_cast %c13_i32 : i32 to index
    %c0_214 = arith.constant 0 : index
    %c0_215 = arith.constant 0 : index
    %500 = vector.load %arg1[%499, %c0_214, %c0_215] : memref<16x16x512xf32, #tpu.memory_space<vmem>>, vector<1x16x512xf32>
    %501 = vector.shape_cast %500 : vector<1x16x512xf32> to vector<16x512xf32>
    %c0_216 = arith.constant 0 : index
    %c0_217 = arith.constant 0 : index
    %502 = vector.load %arg4[%c0_216, %c0_217] : memref<16x128xf32, #tpu.memory_space<vmem>>, vector<16x128xf32>
    %cst_218 = arith.constant dense<0.000000e+00> : vector<16x512xf32>
    %503 = tpu.matmul %502, %4, %cst_218 {dimension_numbers = #tpu.dot_dimension_numbers<[1], [0], [0], [1], [0, 0, 1, 1], [], []>} : vector<16x128xf32>, vector<128x512xf32>, vector<16x512xf32> -> vector<16x512xf32>
    %504 = arith.addf %501, %503 : vector<16x512xf32>
    %505 = vector.extract_strided_slice %504 {offsets = [0, 0], sizes = [16, 128], strides = [1, 1]} : vector<16x512xf32> to vector<16x128xf32>
    %506 = arith.negf %505 : vector<16x128xf32>
    %507 = math.exp %506 : vector<16x128xf32>
    %cst_219 = arith.constant 1.000000e+00 : f32
    %508 = vector.broadcast %cst_219 : f32 to vector<16x128xf32>
    %509 = arith.addf %508, %507 : vector<16x128xf32>
    %510 = arith.divf %508, %509 : vector<16x128xf32>
    %511 = vector.extract_strided_slice %504 {offsets = [0, 128], sizes = [16, 128], strides = [1, 1]} : vector<16x512xf32> to vector<16x128xf32>
    %512 = arith.negf %511 : vector<16x128xf32>
    %513 = math.exp %512 : vector<16x128xf32>
    %cst_220 = arith.constant 1.000000e+00 : f32
    %514 = vector.broadcast %cst_220 : f32 to vector<16x128xf32>
    %515 = arith.addf %514, %513 : vector<16x128xf32>
    %516 = arith.divf %514, %515 : vector<16x128xf32>
    %517 = vector.extract_strided_slice %504 {offsets = [0, 256], sizes = [16, 128], strides = [1, 1]} : vector<16x512xf32> to vector<16x128xf32>
    %518 = math.tanh %517 : vector<16x128xf32>
    %519 = vector.extract_strided_slice %504 {offsets = [0, 384], sizes = [16, 128], strides = [1, 1]} : vector<16x512xf32> to vector<16x128xf32>
    %520 = arith.negf %519 : vector<16x128xf32>
    %521 = math.exp %520 : vector<16x128xf32>
    %cst_221 = arith.constant 1.000000e+00 : f32
    %522 = vector.broadcast %cst_221 : f32 to vector<16x128xf32>
    %523 = arith.addf %522, %521 : vector<16x128xf32>
    %524 = arith.divf %522, %523 : vector<16x128xf32>
    %c0_222 = arith.constant 0 : index
    %c0_223 = arith.constant 0 : index
    %525 = vector.load %arg5[%c0_222, %c0_223] : memref<16x128xf32, #tpu.memory_space<vmem>>, vector<16x128xf32>
    %526 = arith.mulf %516, %525 : vector<16x128xf32>
    %527 = arith.mulf %510, %518 : vector<16x128xf32>
    %528 = arith.addf %526, %527 : vector<16x128xf32>
    %529 = math.tanh %528 : vector<16x128xf32>
    %530 = arith.mulf %524, %529 : vector<16x128xf32>
    %c0_224 = arith.constant 0 : index
    %c0_225 = arith.constant 0 : index
    %531 = vector.load %arg5[%c0_224, %c0_225] : memref<16x128xf32, #tpu.memory_space<vmem>>, vector<16x128xf32>
    tpu.vector_store %arg5[%c0_224, %c0_225], %528 {strides = array<i32>} : memref<16x128xf32, #tpu.memory_space<vmem>>, vector<16x128xf32>,
    %c0_226 = arith.constant 0 : index
    %c0_227 = arith.constant 0 : index
    %532 = vector.load %arg4[%c0_226, %c0_227] : memref<16x128xf32, #tpu.memory_space<vmem>>, vector<16x128xf32>
    tpu.vector_store %arg4[%c0_226, %c0_227], %530 {strides = array<i32>} : memref<16x128xf32, #tpu.memory_space<vmem>>, vector<16x128xf32>,
    %533 = arith.index_cast %c13_i32 : i32 to index
    %c0_228 = arith.constant 0 : index
    %c0_229 = arith.constant 0 : index
    %534 = vector.load %arg3[%533, %c0_228, %c0_229] : memref<16x16x128xf32, #tpu.memory_space<vmem>>, vector<1x16x128xf32>
    %535 = vector.shape_cast %534 : vector<1x16x128xf32> to vector<16x128xf32>
    %536 = vector.shape_cast %530 : vector<16x128xf32> to vector<1x16x128xf32>
    tpu.vector_store %arg3[%533, %c0_228, %c0_229], %536 {strides = array<i32>} : memref<16x16x128xf32, #tpu.memory_space<vmem>>, vector<1x16x128xf32>,
    %c14_i32 = arith.constant 14 : i32
    %537 = arith.index_cast %c14_i32 : i32 to index
    %c0_230 = arith.constant 0 : index
    %c0_231 = arith.constant 0 : index
    %538 = vector.load %arg1[%537, %c0_230, %c0_231] : memref<16x16x512xf32, #tpu.memory_space<vmem>>, vector<1x16x512xf32>
    %539 = vector.shape_cast %538 : vector<1x16x512xf32> to vector<16x512xf32>
    %c0_232 = arith.constant 0 : index
    %c0_233 = arith.constant 0 : index
    %540 = vector.load %arg4[%c0_232, %c0_233] : memref<16x128xf32, #tpu.memory_space<vmem>>, vector<16x128xf32>
    %cst_234 = arith.constant dense<0.000000e+00> : vector<16x512xf32>
    %541 = tpu.matmul %540, %4, %cst_234 {dimension_numbers = #tpu.dot_dimension_numbers<[1], [0], [0], [1], [0, 0, 1, 1], [], []>} : vector<16x128xf32>, vector<128x512xf32>, vector<16x512xf32> -> vector<16x512xf32>
    %542 = arith.addf %539, %541 : vector<16x512xf32>
    %543 = vector.extract_strided_slice %542 {offsets = [0, 0], sizes = [16, 128], strides = [1, 1]} : vector<16x512xf32> to vector<16x128xf32>
    %544 = arith.negf %543 : vector<16x128xf32>
    %545 = math.exp %544 : vector<16x128xf32>
    %cst_235 = arith.constant 1.000000e+00 : f32
    %546 = vector.broadcast %cst_235 : f32 to vector<16x128xf32>
    %547 = arith.addf %546, %545 : vector<16x128xf32>
    %548 = arith.divf %546, %547 : vector<16x128xf32>
    %549 = vector.extract_strided_slice %542 {offsets = [0, 128], sizes = [16, 128], strides = [1, 1]} : vector<16x512xf32> to vector<16x128xf32>
    %550 = arith.negf %549 : vector<16x128xf32>
    %551 = math.exp %550 : vector<16x128xf32>
    %cst_236 = arith.constant 1.000000e+00 : f32
    %552 = vector.broadcast %cst_236 : f32 to vector<16x128xf32>
    %553 = arith.addf %552, %551 : vector<16x128xf32>
    %554 = arith.divf %552, %553 : vector<16x128xf32>
    %555 = vector.extract_strided_slice %542 {offsets = [0, 256], sizes = [16, 128], strides = [1, 1]} : vector<16x512xf32> to vector<16x128xf32>
    %556 = math.tanh %555 : vector<16x128xf32>
    %557 = vector.extract_strided_slice %542 {offsets = [0, 384], sizes = [16, 128], strides = [1, 1]} : vector<16x512xf32> to vector<16x128xf32>
    %558 = arith.negf %557 : vector<16x128xf32>
    %559 = math.exp %558 : vector<16x128xf32>
    %cst_237 = arith.constant 1.000000e+00 : f32
    %560 = vector.broadcast %cst_237 : f32 to vector<16x128xf32>
    %561 = arith.addf %560, %559 : vector<16x128xf32>
    %562 = arith.divf %560, %561 : vector<16x128xf32>
    %c0_238 = arith.constant 0 : index
    %c0_239 = arith.constant 0 : index
    %563 = vector.load %arg5[%c0_238, %c0_239] : memref<16x128xf32, #tpu.memory_space<vmem>>, vector<16x128xf32>
    %564 = arith.mulf %554, %563 : vector<16x128xf32>
    %565 = arith.mulf %548, %556 : vector<16x128xf32>
    %566 = arith.addf %564, %565 : vector<16x128xf32>
    %567 = math.tanh %566 : vector<16x128xf32>
    %568 = arith.mulf %562, %567 : vector<16x128xf32>
    %c0_240 = arith.constant 0 : index
    %c0_241 = arith.constant 0 : index
    %569 = vector.load %arg5[%c0_240, %c0_241] : memref<16x128xf32, #tpu.memory_space<vmem>>, vector<16x128xf32>
    tpu.vector_store %arg5[%c0_240, %c0_241], %566 {strides = array<i32>} : memref<16x128xf32, #tpu.memory_space<vmem>>, vector<16x128xf32>,
    %c0_242 = arith.constant 0 : index
    %c0_243 = arith.constant 0 : index
    %570 = vector.load %arg4[%c0_242, %c0_243] : memref<16x128xf32, #tpu.memory_space<vmem>>, vector<16x128xf32>
    tpu.vector_store %arg4[%c0_242, %c0_243], %568 {strides = array<i32>} : memref<16x128xf32, #tpu.memory_space<vmem>>, vector<16x128xf32>,
    %571 = arith.index_cast %c14_i32 : i32 to index
    %c0_244 = arith.constant 0 : index
    %c0_245 = arith.constant 0 : index
    %572 = vector.load %arg3[%571, %c0_244, %c0_245] : memref<16x16x128xf32, #tpu.memory_space<vmem>>, vector<1x16x128xf32>
    %573 = vector.shape_cast %572 : vector<1x16x128xf32> to vector<16x128xf32>
    %574 = vector.shape_cast %568 : vector<16x128xf32> to vector<1x16x128xf32>
    tpu.vector_store %arg3[%571, %c0_244, %c0_245], %574 {strides = array<i32>} : memref<16x16x128xf32, #tpu.memory_space<vmem>>, vector<1x16x128xf32>,
    %c15_i32 = arith.constant 15 : i32
    %575 = arith.index_cast %c15_i32 : i32 to index
    %c0_246 = arith.constant 0 : index
    %c0_247 = arith.constant 0 : index
    %576 = vector.load %arg1[%575, %c0_246, %c0_247] : memref<16x16x512xf32, #tpu.memory_space<vmem>>, vector<1x16x512xf32>
    %577 = vector.shape_cast %576 : vector<1x16x512xf32> to vector<16x512xf32>
    %c0_248 = arith.constant 0 : index
    %c0_249 = arith.constant 0 : index
    %578 = vector.load %arg4[%c0_248, %c0_249] : memref<16x128xf32, #tpu.memory_space<vmem>>, vector<16x128xf32>
    %cst_250 = arith.constant dense<0.000000e+00> : vector<16x512xf32>
    %579 = tpu.matmul %578, %4, %cst_250 {dimension_numbers = #tpu.dot_dimension_numbers<[1], [0], [0], [1], [0, 0, 1, 1], [], []>} : vector<16x128xf32>, vector<128x512xf32>, vector<16x512xf32> -> vector<16x512xf32>
    %580 = arith.addf %577, %579 : vector<16x512xf32>
    %581 = vector.extract_strided_slice %580 {offsets = [0, 0], sizes = [16, 128], strides = [1, 1]} : vector<16x512xf32> to vector<16x128xf32>
    %582 = arith.negf %581 : vector<16x128xf32>
    %583 = math.exp %582 : vector<16x128xf32>
    %cst_251 = arith.constant 1.000000e+00 : f32
    %584 = vector.broadcast %cst_251 : f32 to vector<16x128xf32>
    %585 = arith.addf %584, %583 : vector<16x128xf32>
    %586 = arith.divf %584, %585 : vector<16x128xf32>
    %587 = vector.extract_strided_slice %580 {offsets = [0, 128], sizes = [16, 128], strides = [1, 1]} : vector<16x512xf32> to vector<16x128xf32>
    %588 = arith.negf %587 : vector<16x128xf32>
    %589 = math.exp %588 : vector<16x128xf32>
    %cst_252 = arith.constant 1.000000e+00 : f32
    %590 = vector.broadcast %cst_252 : f32 to vector<16x128xf32>
    %591 = arith.addf %590, %589 : vector<16x128xf32>
    %592 = arith.divf %590, %591 : vector<16x128xf32>
    %593 = vector.extract_strided_slice %580 {offsets = [0, 256], sizes = [16, 128], strides = [1, 1]} : vector<16x512xf32> to vector<16x128xf32>
    %594 = math.tanh %593 : vector<16x128xf32>
    %595 = vector.extract_strided_slice %580 {offsets = [0, 384], sizes = [16, 128], strides = [1, 1]} : vector<16x512xf32> to vector<16x128xf32>
    %596 = arith.negf %595 : vector<16x128xf32>
    %597 = math.exp %596 : vector<16x128xf32>
    %cst_253 = arith.constant 1.000000e+00 : f32
    %598 = vector.broadcast %cst_253 : f32 to vector<16x128xf32>
    %599 = arith.addf %598, %597 : vector<16x128xf32>
    %600 = arith.divf %598, %599 : vector<16x128xf32>
    %c0_254 = arith.constant 0 : index
    %c0_255 = arith.constant 0 : index
    %601 = vector.load %arg5[%c0_254, %c0_255] : memref<16x128xf32, #tpu.memory_space<vmem>>, vector<16x128xf32>
    %602 = arith.mulf %592, %601 : vector<16x128xf32>
    %603 = arith.mulf %586, %594 : vector<16x128xf32>
    %604 = arith.addf %602, %603 : vector<16x128xf32>
    %605 = math.tanh %604 : vector<16x128xf32>
    %606 = arith.mulf %600, %605 : vector<16x128xf32>
    %c0_256 = arith.constant 0 : index
    %c0_257 = arith.constant 0 : index
    %607 = vector.load %arg5[%c0_256, %c0_257] : memref<16x128xf32, #tpu.memory_space<vmem>>, vector<16x128xf32>
    tpu.vector_store %arg5[%c0_256, %c0_257], %604 {strides = array<i32>} : memref<16x128xf32, #tpu.memory_space<vmem>>, vector<16x128xf32>,
    %c0_258 = arith.constant 0 : index
    %c0_259 = arith.constant 0 : index
    %608 = vector.load %arg4[%c0_258, %c0_259] : memref<16x128xf32, #tpu.memory_space<vmem>>, vector<16x128xf32>
    tpu.vector_store %arg4[%c0_258, %c0_259], %606 {strides = array<i32>} : memref<16x128xf32, #tpu.memory_space<vmem>>, vector<16x128xf32>,
    %609 = arith.index_cast %c15_i32 : i32 to index
    %c0_260 = arith.constant 0 : index
    %c0_261 = arith.constant 0 : index
    %610 = vector.load %arg3[%609, %c0_260, %c0_261] : memref<16x16x128xf32, #tpu.memory_space<vmem>>, vector<1x16x128xf32>
    %611 = vector.shape_cast %610 : vector<1x16x128xf32> to vector<16x128xf32>
    %612 = vector.shape_cast %606 : vector<16x128xf32> to vector<1x16x128xf32>
    tpu.vector_store %arg3[%609, %c0_260, %c0_261], %612 {strides = array<i32>} : memref<16x16x128xf32, #tpu.memory_space<vmem>>, vector<1x16x128xf32>,
    %c16_i32 = arith.constant 16 : i32
    return
  }
  func.func @transform_0(%arg0: i32) -> (i32, i32, i32) {
    %c0_i32 = arith.constant 0 : i32
    %c0_i32_0 = arith.constant 0 : i32
    %c0_i32_1 = arith.constant 0 : i32
    return %c0_i32, %arg0, %c0_i32_0 : i32, i32, i32
  }
  func.func @transform_1(%arg0: i32) -> (i32, i32) {
    %c0_i32 = arith.constant 0 : i32
    %c0_i32_0 = arith.constant 0 : i32
    %c0_i32_1 = arith.constant 0 : i32
    return %c0_i32, %c0_i32_0 : i32, i32
  }
  func.func @transform_2(%arg0: i32) -> (i32, i32, i32) {
    %c0_i32 = arith.constant 0 : i32
    %c0_i32_0 = arith.constant 0 : i32
    %c0_i32_1 = arith.constant 0 : i32
    return %c0_i32, %arg0, %c0_i32_0 : i32, i32, i32
  }
}

</mosaic_0001>

<bundles_post_ra>
// kernel: mdlstm_forward.1
= control target key start
LH: loop header
LB: loop body
LE: loop exit
PB: predicated region body
PF: predicated region fallthrough
CT: control target
= control target key end

     0   :  { %s6249_s9 = smov 0   ;;  %s6251_s10 = smov 0   ;;  %s7759_s0 = inlined_call_operand.vmem [shape: f32[16,32,512], index: 0, kind: input, shape index: {}]   ;;  %s7760_s1 = inlined_call_operand.vmem [shape: f32[128,512], index: 1, kind: input, shape index: {}]   ;;  %s7761_s2 = inlined_call_operand.vmem [shape: f32[16,32,128], index: 2, kind: output, shape index: {}]  }
   0x1   :  { %s6253_s11 = smov 0  }
   0x2 LB: > { %s4383_s12 = sadd.s32 4294967295, %s6231_s11   ;;  %s6266_s13 = sadd.s32 1, %s6231_s11   ;;  %s6231_s11 = sphi %s6253_s11, %s7765_s11   ;;  %s6227_s10 = sphi %s6251_s10, %s7764_s10   ;;  %s6223_s9 = sphi %s6249_s9, %s7763_s9  }
   0x3   : > { %s16_s14 = ssub.s32 %s6231_s11, %s6266_s13  ;;  %s19_s15 = sadd.s32 1, %s6227_s10 }
   0x4   : > { %p17_p0 = scmp.eq.s32.totalorder %s16_s14, 0  ;;  %p26_p1 = scmp.ne.s32.totalorder %s6227_s10, %s6223_s9 }
   0x5   : > { %p27_p2 = scmp.eq.s32.totalorder %s6231_s11, 0  ;;  %p77_p3 = scmp.eq.s32.totalorder %s4383_s12, 1 }
   0x6   : > { %s6277_s16 = scalar_select %p17_p0, %s6227_s10, %s19_s15  }
   0x7   : > { %p28_p4 = por %p27_p2, %p26_p1  ;;  %p6279_p5 = por %p77_p3, %p26_p1 }
   0x8   : > { %p4386_p6 = scmp.ge.s32.totalorder %s6231_s11, 2 }
   0xa   : > { %102 = sbr.rel (%p4386_p6) target bundleno = 85 (0x55), region = 20 }
  0x11   : > { %105 = sbr.rel (!%p28_p4) target bundleno = 85 (0x55), region = 24  ;;  %s107_s18 = sand.u32 (%p28_p4), 1, %s6227_s10  }
  0x12   : > { %s4646_s19 = sshll.u32 (%p28_p4), %s6231_s11, 6  ;;  %s4387_s20 = sshll.u32 (%p28_p4), %s107_s18, 10 }
  0x13   : > { %s6289_s23 = scalar_lea.vmem (%p28_p4), %s7759_s0, %s4646_s19  ;;  %s6294_s24 = scalar_lea.vmem (%p28_p4), [#allocation4], %s4387_s20 }
  0x14   : > { %v126_v0 = vld [vmem:[%s6289_s23] sm:$0xff] (%p28_p4)  ;;  %v128_v1 = vld [vmem:[%s6289_s23 + $0x8] sm:$0xff] (%p28_p4)  ;;  %v130_v2 = vld [vmem:[%s6289_s23 + $0x10] sm:$0xff] (%p28_p4) }
  0x15   : > { %127 = vst [vmem:[%s6294_s24] sm:$0xff] (%p28_p4), %v126_v0  ;;  %129 = vst [vmem:[%s6294_s24 + $0x8] sm:$0xff] (%p28_p4), %v128_v1  ;;  %v132_v3 = vld [vmem:[%s6289_s23 + $0x18] sm:$0xff] (%p28_p4)  ;;  %v134_v4 = vld [vmem:[%s6289_s23 + $0x20] sm:$0xff] (%p28_p4) }
  0x16   : > { %131 = vst [vmem:[%s6294_s24 + $0x10] sm:$0xff] (%p28_p4), %v130_v2  ;;  %v136_v5 = vld [vmem:[%s6289_s23 + $0x28] sm:$0xff] (%p28_p4)  ;;  %133 = vst [vmem:[%s6294_s24 + $0x18] sm:$0xff] (%p28_p4), %v132_v3  ;;  %v138_v6 = vld [vmem:[%s6289_s23 + $0x30] sm:$0xff] (%p28_p4) }
  0x17   : > { %135 = vst [vmem:[%s6294_s24 + $0x20] sm:$0xff] (%p28_p4), %v134_v4  ;;  %137 = vst [vmem:[%s6294_s24 + $0x28] sm:$0xff] (%p28_p4), %v136_v5  ;;  %v140_v7 = vld [vmem:[%s6289_s23 + $0x38] sm:$0xff] (%p28_p4)  ;;  %v142_v8 = vld [vmem:[%s6289_s23 + $0x80] sm:$0xff] (%p28_p4) }
  0x18   : > { %139 = vst [vmem:[%s6294_s24 + $0x30] sm:$0xff] %v138_v6  ;;  %141 = vst [vmem:[%s6294_s24 + $0x38] sm:$0xff] %v140_v7  ;;  %v144_v9 = vld [vmem:[%s6289_s23 + $0x88] sm:$0xff]  ;;  %v146_v10 = vld [vmem:[%s6289_s23 + $0x90] sm:$0xff] }
  0x19   : > { %143 = vst [vmem:[%s6294_s24 + $0x40] sm:$0xff] %v142_v8  ;;  %v148_v11 = vld [vmem:[%s6289_s23 + $0x98] sm:$0xff]  ;;  %145 = vst [vmem:[%s6294_s24 + $0x48] sm:$0xff] %v144_v9  ;;  %v150_v12 = vld [vmem:[%s6289_s23 + $0xa0] sm:$0xff] }
  0x1a   : > { %147 = vst [vmem:[%s6294_s24 + $0x50] sm:$0xff] %v146_v10  ;;  %149 = vst [vmem:[%s6294_s24 + $0x58] sm:$0xff] %v148_v11  ;;  %v152_v13 = vld [vmem:[%s6289_s23 + $0xa8] sm:$0xff]  ;;  %v154_v14 = vld [vmem:[%s6289_s23 + $0xb0] sm:$0xff] }
  0x1b   : > { %151 = vst [vmem:[%s6294_s24 + $0x60] sm:$0xff] %v150_v12  ;;  %153 = vst [vmem:[%s6294_s24 + $0x68] sm:$0xff] %v152_v13  ;;  %v156_v15 = vld [vmem:[%s6289_s23 + $0xb8] sm:$0xff]  ;;  %v158_v16 = vld [vmem:[%s6289_s23 + $0x100] sm:$0xff] }
  0x1c   : > { %155 = vst [vmem:[%s6294_s24 + $0x70] sm:$0xff] %v154_v14  ;;  %v160_v17 = vld [vmem:[%s6289_s23 + $0x108] sm:$0xff]  ;;  %157 = vst [vmem:[%s6294_s24 + $0x78] sm:$0xff] %v156_v15  ;;  %v162_v18 = vld [vmem:[%s6289_s23 + $0x110] sm:$0xff] }
  0x1d   : > { %159 = vst [vmem:[%s6294_s24 + $0x80] sm:$0xff] %v158_v16  ;;  %161 = vst [vmem:[%s6294_s24 + $0x88] sm:$0xff] %v160_v17  ;;  %v164_v19 = vld [vmem:[%s6289_s23 + $0x118] sm:$0xff]  ;;  %v166_v20 = vld [vmem:[%s6289_s23 + $0x120] sm:$0xff] }
  0x1e   : > { %163 = vst [vmem:[%s6294_s24 + $0x90] sm:$0xff] %v162_v18  ;;  %165 = vst [vmem:[%s6294_s24 + $0x98] sm:$0xff] %v164_v19  ;;  %v168_v21 = vld [vmem:[%s6289_s23 + $0x128] sm:$0xff]  ;;  %v170_v22 = vld [vmem:[%s6289_s23 + $0x130] sm:$0xff] }
  0x1f   : > { %167 = vst [vmem:[%s6294_s24 + $0xa0] sm:$0xff] %v166_v20  ;;  %v172_v23 = vld [vmem:[%s6289_s23 + $0x138] sm:$0xff]  ;;  %169 = vst [vmem:[%s6294_s24 + $0xa8] sm:$0xff] %v168_v21  ;;  %v174_v24 = vld [vmem:[%s6289_s23 + $0x180] sm:$0xff] }
  0x20   : > { %171 = vst [vmem:[%s6294_s24 + $0xb0] sm:$0xff] %v170_v22  ;;  %173 = vst [vmem:[%s6294_s24 + $0xb8] sm:$0xff] %v172_v23  ;;  %v176_v25 = vld [vmem:[%s6289_s23 + $0x188] sm:$0xff]  ;;  %v178_v26 = vld [vmem:[%s6289_s23 + $0x190] sm:$0xff] }
  0x21   : > { %175 = vst [vmem:[%s6294_s24 + $0xc0] sm:$0xff] %v174_v24  ;;  %177 = vst [vmem:[%s6294_s24 + $0xc8] sm:$0xff] %v176_v25  ;;  %v180_v27 = vld [vmem:[%s6289_s23 + $0x198] sm:$0xff]  ;;  %v182_v28 = vld [vmem:[%s6289_s23 + $0x1a0] sm:$0xff] }
  0x22   : > { %179 = vst [vmem:[%s6294_s24 + $0xd0] sm:$0xff] %v178_v26  ;;  %v184_v29 = vld [vmem:[%s6289_s23 + $0x1a8] sm:$0xff]  ;;  %181 = vst [vmem:[%s6294_s24 + $0xd8] sm:$0xff] %v180_v27  ;;  %v186_v30 = vld [vmem:[%s6289_s23 + $0x1b0] sm:$0xff] }
  0x23   : > { %183 = vst [vmem:[%s6294_s24 + $0xe0] sm:$0xff] %v182_v28  ;;  %185 = vst [vmem:[%s6294_s24 + $0xe8] sm:$0xff] %v184_v29  ;;  %v188_v31 = vld [vmem:[%s6289_s23 + $0x1b8] sm:$0xff]  ;;  %v190_v32 = vld [vmem:[%s6289_s23 + $0x200] sm:$0xff] }
  0x24   : > { %187 = vst [vmem:[%s6294_s24 + $0xf0] sm:$0xff] %v186_v30  ;;  %189 = vst [vmem:[%s6294_s24 + $0xf8] sm:$0xff] %v188_v31  ;;  %v192_v33 = vld [vmem:[%s6289_s23 + $0x208] sm:$0xff]  ;;  %v194_v34 = vld [vmem:[%s6289_s23 + $0x210] sm:$0xff] }
  0x25   : > { %191 = vst [vmem:[%s6294_s24 + $0x100] sm:$0xff] %v190_v32  ;;  %v196_v35 = vld [vmem:[%s6289_s23 + $0x218] sm:$0xff]  ;;  %193 = vst [vmem:[%s6294_s24 + $0x108] sm:$0xff] %v192_v33  ;;  %v198_v36 = vld [vmem:[%s6289_s23 + $0x220] sm:$0xff] }
  0x26   : > { %195 = vst [vmem:[%s6294_s24 + $0x110] sm:$0xff] %v194_v34  ;;  %197 = vst [vmem:[%s6294_s24 + $0x118] sm:$0xff] %v196_v35  ;;  %v200_v37 = vld [vmem:[%s6289_s23 + $0x228] sm:$0xff]  ;;  %v202_v38 = vld [vmem:[%s6289_s23 + $0x230] sm:$0xff] }
  0x27   : > { %199 = vst [vmem:[%s6294_s24 + $0x120] sm:$0xff] %v198_v36  ;;  %201 = vst [vmem:[%s6294_s24 + $0x128] sm:$0xff] %v200_v37  ;;  %v204_v39 = vld [vmem:[%s6289_s23 + $0x238] sm:$0xff]  ;;  %v206_v40 = vld [vmem:[%s6289_s23 + $0x280] sm:$0xff] }
  0x28   : > { %203 = vst [vmem:[%s6294_s24 + $0x130] sm:$0xff] %v202_v38  ;;  %v208_v41 = vld [vmem:[%s6289_s23 + $0x288] sm:$0xff]  ;;  %205 = vst [vmem:[%s6294_s24 + $0x138] sm:$0xff] %v204_v39  ;;  %v210_v42 = vld [vmem:[%s6289_s23 + $0x290] sm:$0xff] }
  0x29   : > { %207 = vst [vmem:[%s6294_s24 + $0x140] sm:$0xff] %v206_v40  ;;  %209 = vst [vmem:[%s6294_s24 + $0x148] sm:$0xff] %v208_v41  ;;  %v212_v43 = vld [vmem:[%s6289_s23 + $0x298] sm:$0xff]  ;;  %v214_v44 = vld [vmem:[%s6289_s23 + $0x2a0] sm:$0xff] }
  0x2a   : > { %211 = vst [vmem:[%s6294_s24 + $0x150] sm:$0xff] %v210_v42  ;;  %213 = vst [vmem:[%s6294_s24 + $0x158] sm:$0xff] %v212_v43  ;;  %v216_v45 = vld [vmem:[%s6289_s23 + $0x2a8] sm:$0xff]  ;;  %v218_v46 = vld [vmem:[%s6289_s23 + $0x2b0] sm:$0xff] }
  0x2b   : > { %215 = vst [vmem:[%s6294_s24 + $0x160] sm:$0xff] %v214_v44  ;;  %v220_v47 = vld [vmem:[%s6289_s23 + $0x2b8] sm:$0xff]  ;;  %217 = vst [vmem:[%s6294_s24 + $0x168] sm:$0xff] %v216_v45  ;;  %v222_v48 = vld [vmem:[%s6289_s23 + $0x300] sm:$0xff] }
  0x2c   : > { %219 = vst [vmem:[%s6294_s24 + $0x170] sm:$0xff] %v218_v46  ;;  %221 = vst [vmem:[%s6294_s24 + $0x178] sm:$0xff] %v220_v47  ;;  %v224_v49 = vld [vmem:[%s6289_s23 + $0x308] sm:$0xff]  ;;  %v226_v50 = vld [vmem:[%s6289_s23 + $0x310] sm:$0xff] }
  0x2d   : > { %223 = vst [vmem:[%s6294_s24 + $0x180] sm:$0xff] %v222_v48  ;;  %225 = vst [vmem:[%s6294_s24 + $0x188] sm:$0xff] %v224_v49  ;;  %v228_v51 = vld [vmem:[%s6289_s23 + $0x318] sm:$0xff]  ;;  %v230_v52 = vld [vmem:[%s6289_s23 + $0x320] sm:$0xff] }
  0x2e   : > { %227 = vst [vmem:[%s6294_s24 + $0x190] sm:$0xff] %v226_v50  ;;  %v232_v53 = vld [vmem:[%s6289_s23 + $0x328] sm:$0xff]  ;;  %229 = vst [vmem:[%s6294_s24 + $0x198] sm:$0xff] %v228_v51  ;;  %v234_v54 = vld [vmem:[%s6289_s23 + $0x330] sm:$0xff] }
  0x2f   : > { %231 = vst [vmem:[%s6294_s24 + $0x1a0] sm:$0xff] %v230_v52  ;;  %233 = vst [vmem:[%s6294_s24 + $0x1a8] sm:$0xff] %v232_v53  ;;  %v236_v55 = vld [vmem:[%s6289_s23 + $0x338] sm:$0xff]  ;;  %v238_v56 = vld [vmem:[%s6289_s23 + $0x380] sm:$0xff] }
  0x30   : > { %235 = vst [vmem:[%s6294_s24 + $0x1b0] sm:$0xff] %v234_v54  ;;  %237 = vst [vmem:[%s6294_s24 + $0x1b8] sm:$0xff] %v236_v55  ;;  %v240_v57 = vld [vmem:[%s6289_s23 + $0x388] sm:$0xff]  ;;  %v242_v58 = vld [vmem:[%s6289_s23 + $0x390] sm:$0xff] }
  0x31   : > { %239 = vst [vmem:[%s6294_s24 + $0x1c0] sm:$0xff] %v238_v56  ;;  %v244_v59 = vld [vmem:[%s6289_s23 + $0x398] sm:$0xff]  ;;  %241 = vst [vmem:[%s6294_s24 + $0x1c8] sm:$0xff] %v240_v57  ;;  %v246_v60 = vld [vmem:[%s6289_s23 + $0x3a0] sm:$0xff] }
  0x32   : > { %243 = vst [vmem:[%s6294_s24 + $0x1d0] sm:$0xff] %v242_v58  ;;  %245 = vst [vmem:[%s6294_s24 + $0x1d8] sm:$0xff] %v244_v59  ;;  %v248_v61 = vld [vmem:[%s6289_s23 + $0x3a8] sm:$0xff]  ;;  %v250_v62 = vld [vmem:[%s6289_s23 + $0x3b0] sm:$0xff] }
  0x33   : > { %247 = vst [vmem:[%s6294_s24 + $0x1e0] sm:$0xff] %v246_v60  ;;  %249 = vst [vmem:[%s6294_s24 + $0x1e8] sm:$0xff] %v248_v61  ;;  %v252_v63 = vld [vmem:[%s6289_s23 + $0x3b8] sm:$0xff]  ;;  %v254_v0 = vld [vmem:[%s6289_s23 + $0x400] sm:$0xff] }
  0x34   : > { %251 = vst [vmem:[%s6294_s24 + $0x1f0] sm:$0xff] %v250_v62  ;;  %v256_v1 = vld [vmem:[%s6289_s23 + $0x408] sm:$0xff]  ;;  %253 = vst [vmem:[%s6294_s24 + $0x1f8] sm:$0xff] %v252_v63  ;;  %v258_v2 = vld [vmem:[%s6289_s23 + $0x410] sm:$0xff] }
  0x35   : > { %255 = vst [vmem:[%s6294_s24 + $0x200] sm:$0xff] %v254_v0  ;;  %257 = vst [vmem:[%s6294_s24 + $0x208] sm:$0xff] %v256_v1  ;;  %v260_v3 = vld [vmem:[%s6289_s23 + $0x418] sm:$0xff]  ;;  %v262_v4 = vld [vmem:[%s6289_s23 + $0x420] sm:$0xff] }
  0x36   : > { %259 = vst [vmem:[%s6294_s24 + $0x210] sm:$0xff] %v258_v2  ;;  %261 = vst [vmem:[%s6294_s24 + $0x218] sm:$0xff] %v260_v3  ;;  %v264_v5 = vld [vmem:[%s6289_s23 + $0x428] sm:$0xff]  ;;  %v266_v6 = vld [vmem:[%s6289_s23 + $0x430] sm:$0xff] }
  0x37   : > { %263 = vst [vmem:[%s6294_s24 + $0x220] sm:$0xff] %v262_v4  ;;  %v268_v7 = vld [vmem:[%s6289_s23 + $0x438] sm:$0xff]  ;;  %265 = vst [vmem:[%s6294_s24 + $0x228] sm:$0xff] %v264_v5  ;;  %v270_v8 = vld [vmem:[%s6289_s23 + $0x480] sm:$0xff] }
  0x38   : > { %267 = vst [vmem:[%s6294_s24 + $0x230] sm:$0xff] %v266_v6  ;;  %269 = vst [vmem:[%s6294_s24 + $0x238] sm:$0xff] %v268_v7  ;;  %v272_v9 = vld [vmem:[%s6289_s23 + $0x488] sm:$0xff]  ;;  %v274_v10 = vld [vmem:[%s6289_s23 + $0x490] sm:$0xff] }
  0x39   : > { %271 = vst [vmem:[%s6294_s24 + $0x240] sm:$0xff] %v270_v8  ;;  %273 = vst [vmem:[%s6294_s24 + $0x248] sm:$0xff] %v272_v9  ;;  %v276_v11 = vld [vmem:[%s6289_s23 + $0x498] sm:$0xff]  ;;  %v278_v12 = vld [vmem:[%s6289_s23 + $0x4a0] sm:$0xff] }
  0x3a   : > { %275 = vst [vmem:[%s6294_s24 + $0x250] sm:$0xff] %v274_v10  ;;  %v280_v13 = vld [vmem:[%s6289_s23 + $0x4a8] sm:$0xff]  ;;  %277 = vst [vmem:[%s6294_s24 + $0x258] sm:$0xff] %v276_v11  ;;  %v282_v14 = vld [vmem:[%s6289_s23 + $0x4b0] sm:$0xff] }
  0x3b   : > { %279 = vst [vmem:[%s6294_s24 + $0x260] sm:$0xff] %v278_v12  ;;  %281 = vst [vmem:[%s6294_s24 + $0x268] sm:$0xff] %v280_v13  ;;  %v284_v15 = vld [vmem:[%s6289_s23 + $0x4b8] sm:$0xff]  ;;  %v286_v16 = vld [vmem:[%s6289_s23 + $0x500] sm:$0xff] }
  0x3c   : > { %283 = vst [vmem:[%s6294_s24 + $0x270] sm:$0xff] %v282_v14  ;;  %285 = vst [vmem:[%s6294_s24 + $0x278] sm:$0xff] %v284_v15  ;;  %v288_v17 = vld [vmem:[%s6289_s23 + $0x508] sm:$0xff]  ;;  %v290_v18 = vld [vmem:[%s6289_s23 + $0x510] sm:$0xff] }
  0x3d   : > { %287 = vst [vmem:[%s6294_s24 + $0x280] sm:$0xff] %v286_v16  ;;  %v292_v19 = vld [vmem:[%s6289_s23 + $0x518] sm:$0xff]  ;;  %289 = vst [vmem:[%s6294_s24 + $0x288] sm:$0xff] %v288_v17  ;;  %v294_v20 = vld [vmem:[%s6289_s23 + $0x520] sm:$0xff] }
  0x3e   : > { %291 = vst [vmem:[%s6294_s24 + $0x290] sm:$0xff] %v290_v18  ;;  %293 = vst [vmem:[%s6294_s24 + $0x298] sm:$0xff] %v292_v19  ;;  %v296_v21 = vld [vmem:[%s6289_s23 + $0x528] sm:$0xff]  ;;  %v298_v22 = vld [vmem:[%s6289_s23 + $0x530] sm:$0xff] }
  0x3f   : > { %295 = vst [vmem:[%s6294_s24 + $0x2a0] sm:$0xff] %v294_v20  ;;  %297 = vst [vmem:[%s6294_s24 + $0x2a8] sm:$0xff] %v296_v21  ;;  %v300_v23 = vld [vmem:[%s6289_s23 + $0x538] sm:$0xff]  ;;  %v302_v24 = vld [vmem:[%s6289_s23 + $0x580] sm:$0xff] }
  0x40   : > { %299 = vst [vmem:[%s6294_s24 + $0x2b0] sm:$0xff] %v298_v22  ;;  %v304_v25 = vld [vmem:[%s6289_s23 + $0x588] sm:$0xff]  ;;  %301 = vst [vmem:[%s6294_s24 + $0x2b8] sm:$0xff] %v300_v23  ;;  %v306_v26 = vld [vmem:[%s6289_s23 + $0x590] sm:$0xff] }
  0x41   : > { %303 = vst [vmem:[%s6294_s24 + $0x2c0] sm:$0xff] %v302_v24  ;;  %305 = vst [vmem:[%s6294_s24 + $0x2c8] sm:$0xff] %v304_v25  ;;  %v308_v27 = vld [vmem:[%s6289_s23 + $0x598] sm:$0xff]  ;;  %v310_v28 = vld [vmem:[%s6289_s23 + $0x5a0] sm:$0xff] }
  0x42   : > { %307 = vst [vmem:[%s6294_s24 + $0x2d0] sm:$0xff] %v306_v26  ;;  %309 = vst [vmem:[%s6294_s24 + $0x2d8] sm:$0xff] %v308_v27  ;;  %v312_v29 = vld [vmem:[%s6289_s23 + $0x5a8] sm:$0xff]  ;;  %v314_v30 = vld [vmem:[%s6289_s23 + $0x5b0] sm:$0xff] }
  0x43   : > { %311 = vst [vmem:[%s6294_s24 + $0x2e0] sm:$0xff] %v310_v28  ;;  %v316_v31 = vld [vmem:[%s6289_s23 + $0x5b8] sm:$0xff]  ;;  %313 = vst [vmem:[%s6294_s24 + $0x2e8] sm:$0xff] %v312_v29  ;;  %v318_v32 = vld [vmem:[%s6289_s23 + $0x600] sm:$0xff] }
  0x44   : > { %315 = vst [vmem:[%s6294_s24 + $0x2f0] sm:$0xff] %v314_v30  ;;  %317 = vst [vmem:[%s6294_s24 + $0x2f8] sm:$0xff] %v316_v31  ;;  %v320_v33 = vld [vmem:[%s6289_s23 + $0x608] sm:$0xff]  ;;  %v322_v34 = vld [vmem:[%s6289_s23 + $0x610] sm:$0xff] }
  0x45   : > { %319 = vst [vmem:[%s6294_s24 + $0x300] sm:$0xff] %v318_v32  ;;  %321 = vst [vmem:[%s6294_s24 + $0x308] sm:$0xff] %v320_v33  ;;  %v324_v35 = vld [vmem:[%s6289_s23 + $0x618] sm:$0xff]  ;;  %v326_v36 = vld [vmem:[%s6289_s23 + $0x620] sm:$0xff] }
  0x46   : > { %323 = vst [vmem:[%s6294_s24 + $0x310] sm:$0xff] %v322_v34  ;;  %v328_v37 = vld [vmem:[%s6289_s23 + $0x628] sm:$0xff]  ;;  %325 = vst [vmem:[%s6294_s24 + $0x318] sm:$0xff] %v324_v35  ;;  %v330_v38 = vld [vmem:[%s6289_s23 + $0x630] sm:$0xff] }
  0x47   : > { %327 = vst [vmem:[%s6294_s24 + $0x320] sm:$0xff] %v326_v36  ;;  %329 = vst [vmem:[%s6294_s24 + $0x328] sm:$0xff] %v328_v37  ;;  %v332_v39 = vld [vmem:[%s6289_s23 + $0x638] sm:$0xff]  ;;  %v334_v40 = vld [vmem:[%s6289_s23 + $0x680] sm:$0xff] }
  0x48   : > { %331 = vst [vmem:[%s6294_s24 + $0x330] sm:$0xff] %v330_v38  ;;  %333 = vst [vmem:[%s6294_s24 + $0x338] sm:$0xff] %v332_v39  ;;  %v336_v41 = vld [vmem:[%s6289_s23 + $0x688] sm:$0xff]  ;;  %v338_v42 = vld [vmem:[%s6289_s23 + $0x690] sm:$0xff] }
  0x49   : > { %335 = vst [vmem:[%s6294_s24 + $0x340] sm:$0xff] %v334_v40  ;;  %v340_v43 = vld [vmem:[%s6289_s23 + $0x698] sm:$0xff]  ;;  %337 = vst [vmem:[%s6294_s24 + $0x348] sm:$0xff] %v336_v41  ;;  %v342_v44 = vld [vmem:[%s6289_s23 + $0x6a0] sm:$0xff] }
  0x4a   : > { %339 = vst [vmem:[%s6294_s24 + $0x350] sm:$0xff] %v338_v42  ;;  %341 = vst [vmem:[%s6294_s24 + $0x358] sm:$0xff] %v340_v43  ;;  %v344_v45 = vld [vmem:[%s6289_s23 + $0x6a8] sm:$0xff]  ;;  %v346_v46 = vld [vmem:[%s6289_s23 + $0x6b0] sm:$0xff] }
  0x4b   : > { %343 = vst [vmem:[%s6294_s24 + $0x360] sm:$0xff] %v342_v44  ;;  %345 = vst [vmem:[%s6294_s24 + $0x368] sm:$0xff] %v344_v45  ;;  %v348_v47 = vld [vmem:[%s6289_s23 + $0x6b8] sm:$0xff]  ;;  %v350_v48 = vld [vmem:[%s6289_s23 + $0x700] sm:$0xff] }
  0x4c   : > { %347 = vst [vmem:[%s6294_s24 + $0x370] sm:$0xff] %v346_v46  ;;  %v352_v49 = vld [vmem:[%s6289_s23 + $0x708] sm:$0xff]  ;;  %349 = vst [vmem:[%s6294_s24 + $0x378] sm:$0xff] %v348_v47  ;;  %v354_v50 = vld [vmem:[%s6289_s23 + $0x710] sm:$0xff] }
  0x4d   : > { %351 = vst [vmem:[%s6294_s24 + $0x380] sm:$0xff] %v350_v48  ;;  %353 = vst [vmem:[%s6294_s24 + $0x388] sm:$0xff] %v352_v49  ;;  %v356_v51 = vld [vmem:[%s6289_s23 + $0x718] sm:$0xff]  ;;  %v358_v52 = vld [vmem:[%s6289_s23 + $0x720] sm:$0xff] }
  0x4e   : > { %355 = vst [vmem:[%s6294_s24 + $0x390] sm:$0xff] %v354_v50  ;;  %357 = vst [vmem:[%s6294_s24 + $0x398] sm:$0xff] %v356_v51  ;;  %v360_v53 = vld [vmem:[%s6289_s23 + $0x728] sm:$0xff]  ;;  %v362_v54 = vld [vmem:[%s6289_s23 + $0x730] sm:$0xff] }
  0x4f   : > { %359 = vst [vmem:[%s6294_s24 + $0x3a0] sm:$0xff] %v358_v52  ;;  %v364_v55 = vld [vmem:[%s6289_s23 + $0x738] sm:$0xff]  ;;  %361 = vst [vmem:[%s6294_s24 + $0x3a8] sm:$0xff] %v360_v53  ;;  %v366_v56 = vld [vmem:[%s6289_s23 + $0x780] sm:$0xff] }
  0x50   : > { %363 = vst [vmem:[%s6294_s24 + $0x3b0] sm:$0xff] %v362_v54  ;;  %365 = vst [vmem:[%s6294_s24 + $0x3b8] sm:$0xff] %v364_v55  ;;  %v368_v57 = vld [vmem:[%s6289_s23 + $0x788] sm:$0xff]  ;;  %v370_v58 = vld [vmem:[%s6289_s23 + $0x790] sm:$0xff] }
  0x51   : > { %367 = vst [vmem:[%s6294_s24 + $0x3c0] sm:$0xff] %v366_v56  ;;  %369 = vst [vmem:[%s6294_s24 + $0x3c8] sm:$0xff] %v368_v57  ;;  %v372_v59 = vld [vmem:[%s6289_s23 + $0x798] sm:$0xff]  ;;  %v374_v60 = vld [vmem:[%s6289_s23 + $0x7a0] sm:$0xff] }
  0x52   : > { %371 = vst [vmem:[%s6294_s24 + $0x3d0] sm:$0xff] %v370_v58  ;;  %v376_v61 = vld [vmem:[%s6289_s23 + $0x7a8] sm:$0xff]  ;;  %373 = vst [vmem:[%s6294_s24 + $0x3d8] sm:$0xff] %v372_v59  ;;  %v378_v62 = vld [vmem:[%s6289_s23 + $0x7b0] sm:$0xff] }
  0x53   : > { %375 = vst [vmem:[%s6294_s24 + $0x3e0] sm:$0xff] %v374_v60  ;;  %377 = vst [vmem:[%s6294_s24 + $0x3e8] sm:$0xff] %v376_v61  ;;  %v380_v63 = vld [vmem:[%s6289_s23 + $0x7b8] sm:$0xff] }
  0x54   : > { %379 = vst [vmem:[%s6294_s24 + $0x3f0] sm:$0xff] %v378_v62  ;;  %381 = vst [vmem:[%s6294_s24 + $0x3f8] sm:$0xff] %v380_v63 }
  0x55 PF: > { %p4391_p7 = scmp.ge.s32.totalorder %s6231_s11, 1  ;;  %p386_p8 = scmp.lt.s32.totalorder %s6231_s11, 3 }
  0x57   : > { %p387_p9 = pnand %p4391_p7, %p386_p8 }
  0x58   : > { %v420_v0 = vld [vmem:[%s7760_s1 + $0x8] sm:$0xff] (!%p387_p9)  ;;  %v419_v2 = vld [vmem:[%s7760_s1] sm:$0xff] (!%p387_p9)  ;;  %v6233_v7 = vmov (!%p387_p9), 0.0   ;;  %v422_v19 = vld [vmem:[%s7760_s1 + $0x18] sm:$0xff] (!%p387_p9)  ;;  %s393_s27 = sand.u32 (!%p387_p9), 1, %s6223_s9  }
  0x59   : > { %390 = sbr.rel (%p387_p9) target bundleno = 4265 (0x10a9), region = 47  ;;  %v424_v1 = vld [vmem:[%s7760_s1 + $0x28] sm:$0xff] (!%p387_p9)  ;;  %v423_v4 = vld [vmem:[%s7760_s1 + $0x20] sm:$0xff] (!%p387_p9)  ;;  %557 = vmatprep.mubr.f32.mxu0 (!%p387_p9), %v6233_v7  ;;  %634 = vmatprep.mubr.f32.mxu1 (!%p387_p9), %v6233_v7  ;;  %v426_v20 = vld [vmem:[%s7760_s1 + $0x38] sm:$0xff] (!%p387_p9)  ;;  %s4392_s28 = sshll.u32 (!%p387_p9), %s393_s27, 10 }
  0x5a   : > { %v6560_v3 = vpack.c.bf16 (!%p387_p9), %v424_v1, %v420_v0  ;;  %v428_v5 = vld [vmem:[%s7760_s1 + $0x48] sm:$0xff] (!%p387_p9)  ;;  %v6573_v8 = vpack.c.bf16 (!%p387_p9), %v423_v4, %v419_v2  ;;  %v427_v10 = vld [vmem:[%s7760_s1 + $0x40] sm:$0xff] (!%p387_p9)  ;;  %v6614_v22 = vpack.c.bf16 (!%p387_p9), %v426_v20, %v422_v19  ;;  %v421_v23 = vld [vmem:[%s7760_s1 + $0x10] sm:$0xff] (!%p387_p9)  ;;  %s6886_s29 = scalar_lea.vmem (!%p387_p9), [#allocation4], %s4392_s28  ;;  %s4393_s30 = sshll.u32 (!%p387_p9), %s393_s27, 8 }
  0x5b   : > { %v432_v6 = vld [vmem:[%s7760_s1 + $0x68] sm:$0xff] (!%p387_p9)  ;;  %v431_v11 = vld [vmem:[%s7760_s1 + $0x60] sm:$0xff] (!%p387_p9)  ;;  %v425_v24 = vld [vmem:[%s7760_s1 + $0x30] sm:$0xff] (!%p387_p9)  ;;  %s6904_s3 = scalar_lea.vmem (!%p387_p9), [#allocation5], %s4393_s30 }
  0x5c   : > { %v6575_v9 = vpack.c.bf16 (!%p387_p9), %v432_v6, %v428_v5  ;;  %v436_v12 = vld [vmem:[%s7760_s1 + $0x88] sm:$0xff] (!%p387_p9)  ;;  %4649 = vmatprep.subr.bf16.mxu0 (!%p387_p9), %v6560_v3  ;;  %v6591_v14 = vpack.c.bf16 (!%p387_p9), %v431_v11, %v427_v10  ;;  %v435_v15 = vld [vmem:[%s7760_s1 + $0x80] sm:$0xff] (!%p387_p9)  ;;  %v6622_v25 = vpack.c.bf16 (!%p387_p9), %v425_v24, %v421_v23  ;;  %4681 = vmatprep.subr.bf16.mxu1 (!%p387_p9), %v6614_v22  ;;  %v430_v27 = vld [vmem:[%s7760_s1 + $0x58] sm:$0xff] (!%p387_p9) }
  0x5d   : > { %v440_v13 = vld [vmem:[%s7760_s1 + $0xa8] sm:$0xff] (!%p387_p9)  ;;  %4651 = vmatpush1.bf16.msra.mxu0 (!%p387_p9), %v6573_v8  ;;  %v439_v16 = vld [vmem:[%s7760_s1 + $0xa0] sm:$0xff] (!%p387_p9)  ;;  %v434_v28 = vld [vmem:[%s7760_s1 + $0x78] sm:$0xff] (!%p387_p9) }
  0x5e   : > { %4653 = vmatprep.subr.bf16.mxu0 (!%p387_p9), %v6575_v9  ;;  %v6600_v17 = vpack.c.bf16 (!%p387_p9), %v440_v13, %v436_v12  ;;  %v444_v18 = vld [vmem:[%s7760_s1 + $0xc8] sm:$0xff] (!%p387_p9)  ;;  %v6625_v26 = vpack.c.bf16 (!%p387_p9), %v439_v16, %v435_v15  ;;  %v429_v29 = vld [vmem:[%s7760_s1 + $0x50] sm:$0xff] (!%p387_p9)  ;;  %v443_v31 = vld [vmem:[%s7760_s1 + $0xc0] sm:$0xff] (!%p387_p9)  ;;  %4683 = vmatpush1.bf16.msra.mxu1 (!%p387_p9), %v6622_v25  ;;  %v6647_v33 = vpack.c.bf16 (!%p387_p9), %v434_v28, %v430_v27 }
  0x5f   : > { %v448_v21 = vld [vmem:[%s7760_s1 + $0xe8] sm:$0xff] (!%p387_p9)  ;;  %v447_v32 = vld [vmem:[%s7760_s1 + $0xe0] sm:$0xff] (!%p387_p9)  ;;  %v433_v34 = vld [vmem:[%s7760_s1 + $0x70] sm:$0xff] (!%p387_p9) }
  0x60   : > { %v6638_v30 = vpack.c.bf16 %v448_v21, %v444_v18  ;;  %v452_v35 = vld [vmem:[%s7760_s1 + $0x108] sm:$0xff]  ;;  %v6658_v37 = vpack.c.bf16 %v433_v34, %v429_v29  ;;  %v438_v38 = vld [vmem:[%s7760_s1 + $0x98] sm:$0xff]  ;;  %4685 = vmatprep.subr.bf16.mxu1 %v6647_v33  ;;  %v437_v40 = vld [vmem:[%s7760_s1 + $0x90] sm:$0xff]  ;;  %v6674_v42 = vpack.c.bf16 %v447_v32, %v443_v31  ;;  %s4647_s9 = sshll.u32 (%p6279_p5), %s4383_s12, 4 }
  0x61   : > { %4655 = vmatpush1.bf16.msra.mxu0 %v6591_v14  ;;  %v456_v36 = vld [vmem:[%s7760_s1 + $0x128] sm:$0xff]  ;;  %v442_v39 = vld [vmem:[%s7760_s1 + $0xb8] sm:$0xff]  ;;  %v441_v41 = vld [vmem:[%s7760_s1 + $0xb0] sm:$0xff]  ;;  %s7686_s17 = scalar_lea.vmem (%p6279_p5), %s7761_s2, %s4647_s9 }
  0x62   : > { %4657 = vmatprep.subr.bf16.mxu0 %v6600_v17  ;;  %v451_v43 = vld [vmem:[%s7760_s1 + $0x100] sm:$0xff]  ;;  %v6682_v45 = vpack.c.bf16 %v442_v39, %v438_v38  ;;  %v6685_v46 = vpack.c.bf16 %v456_v36, %v452_v35  ;;  %4687 = vmatpush1.bf16.msra.mxu1 %v6658_v37  ;;  %v460_v47 = vld [vmem:[%s7760_s1 + $0x148] sm:$0xff]  ;;  %v6691_v48 = vpack.c.bf16 %v441_v41, %v437_v40  ;;  %v446_v49 = vld [vmem:[%s7760_s1 + $0xd8] sm:$0xff] }
  0x63   : > { %v455_v44 = vld [vmem:[%s7760_s1 + $0x120] sm:$0xff]  ;;  %v450_v50 = vld [vmem:[%s7760_s1 + $0xf8] sm:$0xff]  ;;  %v464_v51 = vld [vmem:[%s7760_s1 + $0x168] sm:$0xff] }
  0x64   : > { %4689 = vmatprep.subr.bf16.mxu1 %v6682_v45  ;;  %v6703_v52 = vpack.c.bf16 %v450_v50, %v446_v49  ;;  %v445_v53 = vld [vmem:[%s7760_s1 + $0xd0] sm:$0xff]  ;;  %v6712_v55 = vpack.c.bf16 %v455_v44, %v451_v43  ;;  %v454_v56 = vld [vmem:[%s7760_s1 + $0x118] sm:$0xff]  ;;  %v6721_v58 = vpack.c.bf16 %v464_v51, %v460_v47  ;;  %v459_v59 = vld [vmem:[%s7760_s1 + $0x140] sm:$0xff] }
  0x65   : > { %4659 = vmatpush1.bf16.msra.mxu0 %v6625_v26  ;;  %v449_v54 = vld [vmem:[%s7760_s1 + $0xf0] sm:$0xff]  ;;  %v458_v57 = vld [vmem:[%s7760_s1 + $0x138] sm:$0xff]  ;;  %v463_v60 = vld [vmem:[%s7760_s1 + $0x160] sm:$0xff] }
  0x66   : > { %4661 = vmatprep.subr.bf16.mxu0 %v6638_v30  ;;  %4691 = vmatpush1.bf16.msra.mxu1 %v6691_v48  ;;  %v468_v61 = vld [vmem:[%s7760_s1 + $0x188] sm:$0xff]  ;;  %v6733_v62 = vpack.c.bf16 %v449_v54, %v445_v53  ;;  %v6739_v0 = vpack.c.bf16 %v458_v57, %v454_v56  ;;  %v453_v1 = vld [vmem:[%s7760_s1 + $0x110] sm:$0xff]  ;;  %v462_v4 = vld [vmem:[%s7760_s1 + $0x158] sm:$0xff]  ;;  %v6754_v6 = vpack.c.bf16 %v463_v60, %v459_v59 }
  0x67   : > { %v472_v63 = vld [vmem:[%s7760_s1 + $0x1a8] sm:$0xff]  ;;  %4693 = vmatprep.subr.bf16.mxu1 %v6703_v52  ;;  %v457_v2 = vld [vmem:[%s7760_s1 + $0x130] sm:$0xff]  ;;  %v466_v5 = vld [vmem:[%s7760_s1 + $0x178] sm:$0xff] }
  0x68   : > { %v6757_v10 = vpack.c.bf16 %v472_v63, %v468_v61  ;;  %v467_v11 = vld [vmem:[%s7760_s1 + $0x180] sm:$0xff]  ;;  %v476_v13 = vld [vmem:[%s7760_s1 + $0x1c8] sm:$0xff]  ;;  %v6769_v15 = vpack.c.bf16 %v457_v2, %v453_v1  ;;  %v6775_v18 = vpack.c.bf16 %v466_v5, %v462_v4  ;;  %v461_v19 = vld [vmem:[%s7760_s1 + $0x150] sm:$0xff] }
  0x69   : > { %4663 = vmatpush1.bf16.msra.mxu0 %v6674_v42  ;;  %v471_v12 = vld [vmem:[%s7760_s1 + $0x1a0] sm:$0xff]  ;;  %v480_v16 = vld [vmem:[%s7760_s1 + $0x1e8] sm:$0xff]  ;;  %v465_v20 = vld [vmem:[%s7760_s1 + $0x170] sm:$0xff] }
  0x6a   : > { %4665 = vmatprep.subr.bf16.mxu0 %v6685_v46  ;;  %4695 = vmatpush1.bf16.msra.mxu1 %v6733_v62  ;;  %v470_v21 = vld [vmem:[%s7760_s1 + $0x198] sm:$0xff]  ;;  %v6790_v24 = vpack.c.bf16 %v471_v12, %v467_v11  ;;  %v6793_v27 = vpack.c.bf16 %v480_v16, %v476_v13  ;;  %v475_v28 = vld [vmem:[%s7760_s1 + $0x1c0] sm:$0xff]  ;;  %v6802_v31 = vpack.c.bf16 %v465_v20, %v461_v19  ;;  %v469_v34 = vld [vmem:[%s7760_s1 + $0x190] sm:$0xff] }
  0x6b   : > { %4697 = vmatprep.subr.bf16.mxu1 %v6739_v0  ;;  %v474_v23 = vld [vmem:[%s7760_s1 + $0x1b8] sm:$0xff]  ;;  %v479_v29 = vld [vmem:[%s7760_s1 + $0x1e0] sm:$0xff]  ;;  %v473_v35 = vld [vmem:[%s7760_s1 + $0x1b0] sm:$0xff] }
  0x6c   : > { %v6805_v32 = vpack.c.bf16 %v474_v23, %v470_v21  ;;  %v478_v36 = vld [vmem:[%s7760_s1 + $0x1d8] sm:$0xff]  ;;  %v6820_v39 = vpack.c.bf16 %v479_v29, %v475_v28  ;;  %v6824_v40 = vpack.c.bf16 %v473_v35, %v469_v34  ;;  %v477_v43 = vld [vmem:[%s7760_s1 + $0x1d0] sm:$0xff]  ;;  %v483_v49 = vld [vmem:[%s6886_s29] sm:$0xff] }
  0x6d   : > { %4667 = vmatpush1.bf16.msra.mxu0 %v6712_v55  ;;  %v482_v38 = vld [vmem:[%s7760_s1 + $0x1f8] sm:$0xff]  ;;  %v481_v44 = vld [vmem:[%s7760_s1 + $0x1f0] sm:$0xff]  ;;  %v484_v50 = vld [vmem:[%s6886_s29 + $0x8] sm:$0xff] }
  0x6e   : > { %4669 = vmatprep.subr.bf16.mxu0 %v6721_v58  ;;  %4699 = vmatpush1.bf16.msra.mxu1 %v6769_v15  ;;  %v6827_v41 = vpack.c.bf16 %v482_v38, %v478_v36  ;;  %v6837_v47 = vpack.c.bf16 %v481_v44, %v477_v43  ;;  %v487_v57 = vld [vmem:[%s6886_s29 + $0x20] sm:$0xff]  ;;  %v488_v60 = vld [vmem:[%s6886_s29 + $0x28] sm:$0xff]  ;;  %v486_v1 = vld [vmem:[%s6886_s29 + $0x18] sm:$0xff] }
  0x6f   : > { %4701 = vmatprep.subr.bf16.mxu1 %v6775_v18  ;;  %v490_v20 = vld [vmem:[%s6886_s29 + $0x38] sm:$0xff]  ;;  %v485_v21 = vld [vmem:[%s6886_s29 + $0x10] sm:$0xff] }
  0x70   : > { %v489_v36 = vld [vmem:[%s6886_s29 + $0x30] sm:$0xff] }
  0x71   : > { %4671 = vmatpush1.bf16.msra.mxu0 %v6754_v6 }
  0x72   : > { %4673 = vmatprep.subr.bf16.mxu0 %v6757_v10  ;;  %4703 = vmatpush1.bf16.msra.mxu1 %v6802_v31 }
  0x73   : > { %4705 = vmatprep.subr.bf16.mxu1 %v6805_v32 }
  0x75   : > { %4675 = vmatpush1.bf16.msra.mxu0 %v6790_v24 }
  0x76   : > { %4677 = vmatprep.subr.bf16.mxu0 %v6793_v27  ;;  %4707 = vmatpush1.bf16.msra.mxu1 %v6824_v40 }
  0x77   : > { %4709 = vmatprep.subr.bf16.mxu1 %v6827_v41 }
  0x79   : > { %4679 = vmatpush1.bf16.msra.mxu0 %v6820_v39 }
  0x7a   : > { %4713 = vmatprep.subr.bf16.mxu0 %v6560_v3  ;;  %4711 = vmatpush1.bf16.msra.mxu1 %v6837_v47 }
  0x7b   : > { %4745 = vmatprep.subr.bf16.mxu1 %v6614_v22 }
  0x7c   : > { %558 = vmatmul.mubr.f32.vlgmr.msra.gmra.mrb[0].mxu0 %v6233_v7 }
  0x7d   : > { %563 = vmatprep.mubr.f32.mxu0 %v6233_v7  ;;  %4715 = vmatpush1.bf16.msra.mxu0 %v6573_v8 }
  0x7e   : > { %4717 = vmatprep.subr.bf16.mxu0 %v6575_v9  ;;  %635 = vmatmul.mubr.f32.vlgmr.msra.gmra.mrb[0].mxu1 %v6233_v7 }
  0x7f   : > { %640 = vmatprep.mubr.f32.mxu1 %v6233_v7  ;;  %4747 = vmatpush1.bf16.msra.mxu1 %v6622_v25 }
  0x80   : > { %564 = vmatmul.mubr.f32.gmra.mrb[2].mxu0 %v6233_v7  ;;  %4749 = vmatprep.subr.bf16.mxu1 %v6647_v33 }
  0x81   : > { %4719 = vmatpush1.bf16.msra.mxu0 %v6591_v14  ;;  %786 = vmatprep.mubr.f32.mxu0 %v6233_v7 }
  0x82   : > { %4721 = vmatprep.subr.bf16.mxu0 %v6600_v17  ;;  %641 = vmatmul.mubr.f32.gmra.mrb[2].mxu1 %v6233_v7 }
  0x83   : > { %4751 = vmatpush1.bf16.msra.mxu1 %v6658_v37  ;;  %863 = vmatprep.mubr.f32.mxu1 %v6233_v7 }
  0x84   : > { %4753 = vmatprep.subr.bf16.mxu1 %v6682_v45 }
  0x85   : > { %4723 = vmatpush1.bf16.msra.mxu0 %v6625_v26 }
  0x86   : > { %4725 = vmatprep.subr.bf16.mxu0 %v6638_v30 }
  0x87   : > { %4755 = vmatpush1.bf16.msra.mxu1 %v6691_v48 }
  0x88   : > { %4757 = vmatprep.subr.bf16.mxu1 %v6703_v52 }
  0x89   : > { %4727 = vmatpush1.bf16.msra.mxu0 %v6674_v42 }
  0x8a   : > { %4729 = vmatprep.subr.bf16.mxu0 %v6685_v46 }
  0x8b   : > { %4759 = vmatpush1.bf16.msra.mxu1 %v6733_v62 }
  0x8c   : > { %4761 = vmatprep.subr.bf16.mxu1 %v6739_v0 }
  0x8d   : > { %4731 = vmatpush1.bf16.msra.mxu0 %v6712_v55 }
  0x8e   : > { %4733 = vmatprep.subr.bf16.mxu0 %v6721_v58 }
  0x8f   : > { %4763 = vmatpush1.bf16.msra.mxu1 %v6769_v15 }
  0x90   : > { %4765 = vmatprep.subr.bf16.mxu1 %v6775_v18 }
  0x91   : > { %4735 = vmatpush1.bf16.msra.mxu0 %v6754_v6 }
  0x92   : > { %4737 = vmatprep.subr.bf16.mxu0 %v6757_v10 }
  0x93   : > { %4767 = vmatpush1.bf16.msra.mxu1 %v6802_v31 }
  0x94   : > { %4769 = vmatprep.subr.bf16.mxu1 %v6805_v32 }
  0x95   : > { %4739 = vmatpush1.bf16.msra.mxu0 %v6790_v24 }
  0x96   : > { %4741 = vmatprep.subr.bf16.mxu0 %v6793_v27 }
  0x97   : > { %4771 = vmatpush1.bf16.msra.mxu1 %v6824_v40 }
  0x98   : > { %4773 = vmatprep.subr.bf16.mxu1 %v6827_v41 }
  0x99   : > { %4743 = vmatpush1.bf16.msra.mxu0 %v6820_v39 }
  0x9a   : > { %4777 = vmatprep.subr.bf16.mxu0 %v6560_v3 }
  0x9b   : > { %4775 = vmatpush1.bf16.msra.mxu1 %v6837_v47 }
  0x9c   : > { %4809 = vmatprep.subr.bf16.mxu1 %v6614_v22 }
 0x14f   : > { %v559_v51 = vpop.f32.mrb[0].mxu0 }
 0x150   : > { %v647_v53 = vadd.f32 %v559_v51, %v483_v49  ;;  %v561_v54 = vpop.f32.mrb[1].mxu0 }
 0x151   : > { %v648_v56 = vadd.f32 %v561_v54, %v484_v50  ;;  %v636_v5 = vpop.f32.mrb[0].mxu1 }
 0x152   : > { %v4394_v59 = vmul.f32 -1.442695, %v647_v53  ;;  %v638_v12 = vpop.f32.mrb[1].mxu1  ;;  %v649_v35 = vadd.f32 %v636_v5, %v485_v21 }
 0x153   : > { %v4396_v61 = vmul.f32 -1.442695, %v648_v56  ;;  %v565_v63 = vpop.f32.mrb[2].mxu0  ;;  %v650_v16 = vadd.f32 %v638_v12, %v486_v1 }
 0x154   : > { %5697 = vpow2.f32 %v4394_v59  ;;  %v651_v2 = vadd.f32 %v565_v63, %v487_v57  ;;  %v567_v4 = vpop.f32.mrb[3].mxu0 }
 0x155   : > { %5699 = vpow2.f32 %v4396_v61  ;;  %v652_v11 = vadd.f32 %v567_v4, %v488_v60  ;;  %v642_v23 = vpop.f32.mrb[2].mxu1  ;;  %v4398_v29 = vmul.f32 -1.442695, %v650_v16 }
 0x156   : > { %v4395_v13 = vmul.f32 -1.442695, %v651_v2  ;;  %v644_v28 = vpop.f32.mrb[3].mxu1  ;;  %v653_v50 = vadd.f32 %v642_v23, %v489_v36 }
 0x157   : > { %v4397_v19 = vmul.f32 -1.442695, %v652_v11  ;;  %v654_v34 = vadd.f32 %v644_v28, %v490_v20 }
 0x158   : > { %5701 = vpow2.f32 %v4395_v13 }
 0x159   : > { %5703 = vpow2.f32 %v4397_v19  ;;  %v4399_v38 = vmul.f32 -1.442695, %v654_v34 }
 0x15a   : > { %5705 = vpow2.f32 %v4398_v29 }
 0x15b   : > { %5707 = vtanh.f32 %v649_v35 }
 0x15c   : > { %5709 = vpow2.f32 %v4399_v38 }
 0x15e   : > { %v5698_v43 = vpop.eup %5697 }
 0x15f   : > { %v5700_v44 = vpop.eup %5699  ;;  %v661_v49 = vadd.f32 1.0, %v5698_v43  ;;  %v4400_v43 = vld [vmem:[%s6886_s29 + $0x40] sm:$0xff] }
 0x160   : > { %v673_v51 = vadd.f32 1.0, %v5700_v44  ;;  %v4401_v44 = vld [vmem:[%s6886_s29 + $0x48] sm:$0xff] }
 0x161   : > { %5711 = vrcp.f32 %v661_v49 }
 0x162   : > { %v5702_v53 = vpop.eup %5701  ;;  %5713 = vrcp.f32 %v673_v51 }
 0x163   : > { %v5704_v54 = vpop.eup %5703  ;;  %v662_v56 = vadd.f32 1.0, %v5702_v53  ;;  %5715 = vtanh.f32 %v653_v50 }
 0x164   : > { %v674_v57 = vadd.f32 1.0, %v5704_v54  ;;  %v5706_v59 = vpop.eup %5705 }
 0x165   : > { %5717 = vrcp.f32 %v662_v56  ;;  %v5708_v60 = vpop.eup %5707  ;;  %v687_v1 = vadd.f32 1.0, %v5706_v59 }
 0x166   : > { %5719 = vrcp.f32 %v674_v57  ;;  %v5710_v61 = vpop.eup %5709  ;;  %v4404_v57 = vld [vmem:[%s6886_s29 + $0x60] sm:$0xff] }
 0x167   : > { %5721 = vrcp.f32 %v687_v1  ;;  %v688_v16 = vadd.f32 1.0, %v5710_v61 }
 0x16b   : > { %v5712_v63 = vpop.eup %5711 }
 0x16c   : > { %v5714_v2 = vpop.eup %5713  ;;  %v697_v4 = vmul.f32 %v5712_v63, %v5708_v60  ;;  %v4405_v60 = vld [vmem:[%s6886_s29 + $0x68] sm:$0xff] }
 0x16d   : > { %v5716_v5 = vpop.eup %5715  ;;  %v695_v11 = vmul.f32 0.0, %v5714_v2  ;;  %v4403_v2 = vld [vmem:[%s6886_s29 + $0x58] sm:$0xff] }
 0x16f   : > { %v5718_v12 = vpop.eup %5717  ;;  %v6896_v13 = vadd.f32 %v697_v4, %v695_v11 }
 0x170   : > { %v5720_v19 = vpop.eup %5719  ;;  %v698_v20 = vmul.f32 %v5718_v12, %v5716_v5 }
 0x171   : > { %v696_v21 = vmul.f32 0.0, %v5720_v19  ;;  %5723 = vtanh.f32 %v6896_v13  ;;  %v5722_v28 = vpop.eup %5721 }
 0x172   : > { %5725 = vrcp.f32 %v688_v16 }
 0x173   : > { %v6899_v23 = vadd.f32 %v698_v20, %v696_v21  ;;  %v4407_v21 = vld [vmem:[%s6886_s29 + $0x78] sm:$0xff] }
 0x175   : > { %5727 = vtanh.f32 %v6899_v23 }
 0x17b   : > { %v5724_v29 = vpop.eup %5723 }
 0x17c   : > { %v703_v34 = vmul.f32 %v5724_v29, %v5722_v28  ;;  %v5726_v35 = vpop.eup %5725  ;;  %v4402_v28 = vld [vmem:[%s6886_s29 + $0x50] sm:$0xff] }
 0x17e   : > { %709 = vst [vmem:[%s6904_s3] sm:$0xff] %v703_v34  ;;  %787 = vmatmul.mubr.f32.vlgmr.msra.gmra.mrb[4].mxu0 %v703_v34  ;;  %864 = vmatmul.mubr.f32.vlgmr.msra.gmra.mrb[4].mxu1 %v703_v34 }
 0x17f   : > { %v5728_v36 = vpop.eup %5727  ;;  %792 = vmatprep.mubr.f32.mxu0 %v6233_v7  ;;  %869 = vmatprep.mubr.f32.mxu1 %v6233_v7 }
 0x180   : > { %v704_v38 = vmul.f32 %v5728_v36, %v5726_v35  ;;  %4779 = vmatpush1.bf16.msra.mxu0 %v6573_v8  ;;  %4811 = vmatpush1.bf16.msra.mxu1 %v6622_v25  ;;  %v4406_v36 = vld [vmem:[%s6886_s29 + $0x70] sm:$0xff] }
 0x181   : > { %4781 = vmatprep.subr.bf16.mxu0 %v6575_v9  ;;  %4813 = vmatprep.subr.bf16.mxu1 %v6647_v33 }
 0x182   : > { %710 = vst [vmem:[%s6904_s3 + $0x8] sm:$0xff] %v704_v38  ;;  %793 = vmatmul.mubr.f32.gmra.mrb[6].mxu0 %v704_v38  ;;  %870 = vmatmul.mubr.f32.gmra.mrb[6].mxu1 %v704_v38 }
 0x183   : > { %1016 = vmatprep.mubr.f32.mxu0 %v6233_v7  ;;  %1093 = vmatprep.mubr.f32.mxu1 %v6233_v7 }
 0x184   : > { %4783 = vmatpush1.bf16.msra.mxu0 %v6591_v14  ;;  %4815 = vmatpush1.bf16.msra.mxu1 %v6658_v37 }
 0x185   : > { %4785 = vmatprep.subr.bf16.mxu0 %v6600_v17  ;;  %4817 = vmatprep.subr.bf16.mxu1 %v6682_v45 }
 0x188   : > { %4787 = vmatpush1.bf16.msra.mxu0 %v6625_v26  ;;  %4819 = vmatpush1.bf16.msra.mxu1 %v6691_v48 }
 0x189   : > { %4789 = vmatprep.subr.bf16.mxu0 %v6638_v30  ;;  %4821 = vmatprep.subr.bf16.mxu1 %v6703_v52 }
 0x18c   : > { %4791 = vmatpush1.bf16.msra.mxu0 %v6674_v42  ;;  %4823 = vmatpush1.bf16.msra.mxu1 %v6733_v62 }
 0x18d   : > { %4793 = vmatprep.subr.bf16.mxu0 %v6685_v46  ;;  %4825 = vmatprep.subr.bf16.mxu1 %v6739_v0 }
 0x190   : > { %4795 = vmatpush1.bf16.msra.mxu0 %v6712_v55  ;;  %4827 = vmatpush1.bf16.msra.mxu1 %v6769_v15 }
 0x191   : > { %4797 = vmatprep.subr.bf16.mxu0 %v6721_v58  ;;  %4829 = vmatprep.subr.bf16.mxu1 %v6775_v18 }
 0x194   : > { %4799 = vmatpush1.bf16.msra.mxu0 %v6754_v6  ;;  %4831 = vmatpush1.bf16.msra.mxu1 %v6802_v31 }
 0x195   : > { %4801 = vmatprep.subr.bf16.mxu0 %v6757_v10  ;;  %4833 = vmatprep.subr.bf16.mxu1 %v6805_v32 }
 0x198   : > { %4803 = vmatpush1.bf16.msra.mxu0 %v6790_v24  ;;  %4835 = vmatpush1.bf16.msra.mxu1 %v6824_v40 }
 0x199   : > { %4805 = vmatprep.subr.bf16.mxu0 %v6793_v27  ;;  %4837 = vmatprep.subr.bf16.mxu1 %v6827_v41 }
 0x19c   : > { %4807 = vmatpush1.bf16.msra.mxu0 %v6820_v39  ;;  %4839 = vmatpush1.bf16.msra.mxu1 %v6837_v47 }
 0x19d   : > { %4841 = vmatprep.subr.bf16.mxu0 %v6560_v3  ;;  %4873 = vmatprep.subr.bf16.mxu1 %v6614_v22 }
 0x251   : > { %v788_v49 = vpop.f32.mrb[4].mxu0  ;;  %v865_v50 = vpop.f32.mrb[4].mxu1 }
 0x252   : > { %v876_v51 = vadd.f32 %v4400_v43, %v788_v49  ;;  %v790_v53 = vpop.f32.mrb[5].mxu0  ;;  %v867_v54 = vpop.f32.mrb[5].mxu1  ;;  %v878_v35 = vadd.f32 %v4402_v28, %v865_v50 }
 0x253   : > { %v877_v56 = vadd.f32 %v4401_v44, %v790_v53  ;;  %v879_v19 = vadd.f32 %v4403_v2, %v867_v54 }
 0x254   : > { %v4408_v59 = vmul.f32 -1.442695, %v876_v51 }
 0x255   : > { %v4410_v61 = vmul.f32 -1.442695, %v877_v56  ;;  %v794_v63 = vpop.f32.mrb[6].mxu0  ;;  %v871_v1 = vpop.f32.mrb[6].mxu1  ;;  %v4412_v29 = vmul.f32 -1.442695, %v879_v19 }
 0x256   : > { %5729 = vpow2.f32 %v4408_v59  ;;  %v880_v4 = vadd.f32 %v4404_v57, %v794_v63  ;;  %v796_v5 = vpop.f32.mrb[7].mxu0  ;;  %v873_v11 = vpop.f32.mrb[7].mxu1  ;;  %v882_v53 = vadd.f32 %v4406_v36, %v871_v1 }
 0x257   : > { %5731 = vpow2.f32 %v4410_v61  ;;  %v881_v12 = vadd.f32 %v4405_v60, %v796_v5  ;;  %v883_v34 = vadd.f32 %v4407_v21, %v873_v11 }
 0x258   : > { %v4409_v16 = vmul.f32 -1.442695, %v880_v4 }
 0x259   : > { %v4411_v20 = vmul.f32 -1.442695, %v881_v12  ;;  %v4413_v49 = vmul.f32 -1.442695, %v883_v34 }
 0x25a   : > { %5733 = vpow2.f32 %v4409_v16 }
 0x25b   : > { %5735 = vpow2.f32 %v4411_v20 }
 0x25c   : > { %5737 = vpow2.f32 %v4412_v29 }
 0x25d   : > { %5739 = vtanh.f32 %v878_v35 }
 0x260   : > { %v5730_v38 = vpop.eup %5729 }
 0x261   : > { %v5732_v43 = vpop.eup %5731  ;;  %v890_v44 = vadd.f32 1.0, %v5730_v38 }
 0x262   : > { %v902_v51 = vadd.f32 1.0, %v5732_v43 }
 0x263   : > { %5741 = vrcp.f32 %v890_v44  ;;  %v4417_v44 = vld [vmem:[%s6886_s29 + $0x88] sm:$0xff] }
 0x264   : > { %v5734_v56 = vpop.eup %5733  ;;  %5743 = vrcp.f32 %v902_v51 }
 0x265   : > { %v5736_v54 = vpop.eup %5735  ;;  %v891_v57 = vadd.f32 1.0, %v5734_v56  ;;  %5745 = vpow2.f32 %v4413_v49 }
 0x266   : > { %5747 = vtanh.f32 %v882_v53  ;;  %v903_v59 = vadd.f32 1.0, %v5736_v54  ;;  %v5738_v50 = vpop.eup %5737 }
 0x267   : > { %5749 = vrcp.f32 %v891_v57  ;;  %v5740_v60 = vpop.eup %5739  ;;  %v916_v4 = vadd.f32 1.0, %v5738_v50 }
 0x268   : > { %5751 = vrcp.f32 %v903_v59  ;;  %v4420_v59 = vld [vmem:[%s6886_s29 + $0xa0] sm:$0xff] }
 0x269   : > { %5753 = vrcp.f32 %v916_v4  ;;  %v4419_v4 = vld [vmem:[%s6886_s29 + $0x98] sm:$0xff] }
 0x26d   : > { %v5742_v61 = vpop.eup %5741 }
 0x26e   : > { %v5744_v63 = vpop.eup %5743  ;;  %v926_v2 = vmul.f32 %v5742_v61, %v5740_v60  ;;  %v4421_v60 = vld [vmem:[%s6886_s29 + $0xa8] sm:$0xff] }
 0x26f   : > { %v5746_v5 = vpop.eup %5745  ;;  %v924_v11 = vmul.f32 %v5744_v63, %v6896_v13 }
 0x270   : > { %v5748_v1 = vpop.eup %5747  ;;  %v917_v21 = vadd.f32 1.0, %v5746_v5 }
 0x271   : > { %v5750_v12 = vpop.eup %5749  ;;  %v6953_v16 = vadd.f32 %v926_v2, %v924_v11 }
 0x272   : > { %v5752_v19 = vpop.eup %5751  ;;  %v927_v20 = vmul.f32 %v5750_v12, %v5748_v1 }
 0x273   : > { %5755 = vtanh.f32 %v6953_v16  ;;  %v925_v28 = vmul.f32 %v5752_v19, %v6899_v23  ;;  %v5754_v13 = vpop.eup %5753  ;;  %v4416_v23 = vld [vmem:[%s6886_s29 + $0x80] sm:$0xff] }
 0x274   : > { %5757 = vrcp.f32 %v917_v21 }
 0x275   : > { %v6957_v29 = vadd.f32 %v927_v20, %v925_v28  ;;  %v4423_v28 = vld [vmem:[%s6886_s29 + $0xb8] sm:$0xff] }
 0x277   : > { %5759 = vtanh.f32 %v6957_v29 }
 0x27d   : > { %v5756_v34 = vpop.eup %5755 }
 0x27e   : > { %v932_v35 = vmul.f32 %v5756_v34, %v5754_v13  ;;  %v5758_v36 = vpop.eup %5757  ;;  %v4418_v13 = vld [vmem:[%s6886_s29 + $0x90] sm:$0xff] }
 0x280   : > { %4414 = vst [vmem:[%s6904_s3 + $0x10] sm:$0xff] %v932_v35  ;;  %1017 = vmatmul.mubr.f32.vlgmr.msra.gmra.mrb[8].mxu0 %v932_v35  ;;  %1094 = vmatmul.mubr.f32.vlgmr.msra.gmra.mrb[8].mxu1 %v932_v35 }
 0x281   : > { %v5760_v38 = vpop.eup %5759  ;;  %1022 = vmatprep.mubr.f32.mxu0 %v6233_v7  ;;  %1099 = vmatprep.mubr.f32.mxu1 %v6233_v7 }
 0x282   : > { %v933_v43 = vmul.f32 %v5760_v38, %v5758_v36  ;;  %4843 = vmatpush1.bf16.msra.mxu0 %v6573_v8  ;;  %4875 = vmatpush1.bf16.msra.mxu1 %v6622_v25  ;;  %v4422_v38 = vld [vmem:[%s6886_s29 + $0xb0] sm:$0xff] }
 0x283   : > { %4845 = vmatprep.subr.bf16.mxu0 %v6575_v9  ;;  %4877 = vmatprep.subr.bf16.mxu1 %v6647_v33 }
 0x284   : > { %4415 = vst [vmem:[%s6904_s3 + $0x18] sm:$0xff] %v933_v43  ;;  %1023 = vmatmul.mubr.f32.gmra.mrb[10].mxu0 %v933_v43  ;;  %1100 = vmatmul.mubr.f32.gmra.mrb[10].mxu1 %v933_v43 }
 0x285   : > { %1246 = vmatprep.mubr.f32.mxu0 %v6233_v7  ;;  %1323 = vmatprep.mubr.f32.mxu1 %v6233_v7 }
 0x286   : > { %4847 = vmatpush1.bf16.msra.mxu0 %v6591_v14  ;;  %4879 = vmatpush1.bf16.msra.mxu1 %v6658_v37 }
 0x287   : > { %4849 = vmatprep.subr.bf16.mxu0 %v6600_v17  ;;  %4881 = vmatprep.subr.bf16.mxu1 %v6682_v45 }
 0x28a   : > { %4851 = vmatpush1.bf16.msra.mxu0 %v6625_v26  ;;  %4883 = vmatpush1.bf16.msra.mxu1 %v6691_v48 }
 0x28b   : > { %4853 = vmatprep.subr.bf16.mxu0 %v6638_v30  ;;  %4885 = vmatprep.subr.bf16.mxu1 %v6703_v52 }
 0x28e   : > { %4855 = vmatpush1.bf16.msra.mxu0 %v6674_v42  ;;  %4887 = vmatpush1.bf16.msra.mxu1 %v6733_v62 }
 0x28f   : > { %4857 = vmatprep.subr.bf16.mxu0 %v6685_v46  ;;  %4889 = vmatprep.subr.bf16.mxu1 %v6739_v0 }
 0x292   : > { %4859 = vmatpush1.bf16.msra.mxu0 %v6712_v55  ;;  %4891 = vmatpush1.bf16.msra.mxu1 %v6769_v15 }
 0x293   : > { %4861 = vmatprep.subr.bf16.mxu0 %v6721_v58  ;;  %4893 = vmatprep.subr.bf16.mxu1 %v6775_v18 }
 0x296   : > { %4863 = vmatpush1.bf16.msra.mxu0 %v6754_v6  ;;  %4895 = vmatpush1.bf16.msra.mxu1 %v6802_v31 }
 0x297   : > { %4865 = vmatprep.subr.bf16.mxu0 %v6757_v10  ;;  %4897 = vmatprep.subr.bf16.mxu1 %v6805_v32 }
 0x29a   : > { %4867 = vmatpush1.bf16.msra.mxu0 %v6790_v24  ;;  %4899 = vmatpush1.bf16.msra.mxu1 %v6824_v40 }
 0x29b   : > { %4869 = vmatprep.subr.bf16.mxu0 %v6793_v27  ;;  %4901 = vmatprep.subr.bf16.mxu1 %v6827_v41 }
 0x29e   : > { %4871 = vmatpush1.bf16.msra.mxu0 %v6820_v39  ;;  %4903 = vmatpush1.bf16.msra.mxu1 %v6837_v47 }
 0x29f   : > { %4905 = vmatprep.subr.bf16.mxu0 %v6560_v3  ;;  %4937 = vmatprep.subr.bf16.mxu1 %v6614_v22 }
 0x353   : > { %v1018_v49 = vpop.f32.mrb[8].mxu0  ;;  %v1095_v51 = vpop.f32.mrb[8].mxu1 }
 0x354   : > { %v1106_v53 = vadd.f32 %v4416_v23, %v1018_v49  ;;  %v1020_v56 = vpop.f32.mrb[9].mxu0  ;;  %v1097_v54 = vpop.f32.mrb[9].mxu1  ;;  %v1108_v36 = vadd.f32 %v4418_v13, %v1095_v51 }
 0x355   : > { %v1107_v57 = vadd.f32 %v4417_v44, %v1020_v56  ;;  %v1109_v20 = vadd.f32 %v4419_v4, %v1097_v54 }
 0x356   : > { %v4424_v50 = vmul.f32 -1.442695, %v1106_v53 }
 0x357   : > { %v4426_v61 = vmul.f32 -1.442695, %v1107_v57  ;;  %v1024_v63 = vpop.f32.mrb[10].mxu0  ;;  %v1101_v2 = vpop.f32.mrb[10].mxu1  ;;  %v4428_v34 = vmul.f32 -1.442695, %v1109_v20 }
 0x358   : > { %5761 = vpow2.f32 %v4424_v50  ;;  %v1110_v5 = vadd.f32 %v4420_v59, %v1024_v63  ;;  %v1026_v11 = vpop.f32.mrb[11].mxu0  ;;  %v1103_v1 = vpop.f32.mrb[11].mxu1  ;;  %v1112_v56 = vadd.f32 %v4422_v38, %v1101_v2 }
 0x359   : > { %5763 = vpow2.f32 %v4426_v61  ;;  %v1111_v12 = vadd.f32 %v4421_v60, %v1026_v11  ;;  %v1113_v35 = vadd.f32 %v4423_v28, %v1103_v1 }
 0x35a   : > { %v4425_v19 = vmul.f32 -1.442695, %v1110_v5 }
 0x35b   : > { %v4427_v21 = vmul.f32 -1.442695, %v1111_v12  ;;  %v4429_v49 = vmul.f32 -1.442695, %v1113_v35 }
 0x35c   : > { %5765 = vpow2.f32 %v4425_v19 }
 0x35d   : > { %5767 = vpow2.f32 %v4427_v21 }
 0x35e   : > { %5769 = vpow2.f32 %v4428_v34 }
 0x35f   : > { %5771 = vtanh.f32 %v1108_v36 }
 0x362   : > { %v5762_v43 = vpop.eup %5761 }
 0x363   : > { %v5764_v23 = vpop.eup %5763  ;;  %v1120_v44 = vadd.f32 1.0, %v5762_v43 }
 0x364   : > { %v1132_v53 = vadd.f32 1.0, %v5764_v23 }
 0x365   : > { %5773 = vrcp.f32 %v1120_v44  ;;  %v4433_v44 = vld [vmem:[%s6886_s29 + $0xc8] sm:$0xff] }
 0x366   : > { %v5766_v57 = vpop.eup %5765  ;;  %5775 = vrcp.f32 %v1132_v53 }
 0x367   : > { %v5768_v54 = vpop.eup %5767  ;;  %v1121_v59 = vadd.f32 1.0, %v5766_v57  ;;  %5777 = vpow2.f32 %v4429_v49 }
 0x368   : > { %5779 = vtanh.f32 %v1112_v56  ;;  %v1133_v50 = vadd.f32 1.0, %v5768_v54  ;;  %v5770_v51 = vpop.eup %5769 }
 0x369   : > { %5781 = vrcp.f32 %v1121_v59  ;;  %v5772_v60 = vpop.eup %5771  ;;  %v1146_v5 = vadd.f32 1.0, %v5770_v51 }
 0x36a   : > { %5783 = vrcp.f32 %v1133_v50  ;;  %v4436_v50 = vld [vmem:[%s6886_s29 + $0xe0] sm:$0xff] }
 0x36b   : > { %5785 = vrcp.f32 %v1146_v5  ;;  %v4435_v5 = vld [vmem:[%s6886_s29 + $0xd8] sm:$0xff] }
 0x36f   : > { %v5774_v61 = vpop.eup %5773 }
 0x370   : > { %v5776_v63 = vpop.eup %5775  ;;  %v1156_v4 = vmul.f32 %v5774_v61, %v5772_v60  ;;  %v4437_v60 = vld [vmem:[%s6886_s29 + $0xe8] sm:$0xff] }
 0x371   : > { %v5778_v11 = vpop.eup %5777  ;;  %v1154_v1 = vmul.f32 %v5776_v63, %v6953_v16 }
 0x372   : > { %v5780_v2 = vpop.eup %5779  ;;  %v1147_v28 = vadd.f32 1.0, %v5778_v11 }
 0x373   : > { %v5782_v12 = vpop.eup %5781  ;;  %v7007_v19 = vadd.f32 %v1156_v4, %v1154_v1 }
 0x374   : > { %v5784_v20 = vpop.eup %5783  ;;  %v1157_v21 = vmul.f32 %v5782_v12, %v5780_v2 }
 0x375   : > { %5787 = vtanh.f32 %v7007_v19  ;;  %v1155_v13 = vmul.f32 %v5784_v20, %v6957_v29  ;;  %v5786_v16 = vpop.eup %5785  ;;  %v4432_v29 = vld [vmem:[%s6886_s29 + $0xc0] sm:$0xff] }
 0x376   : > { %5789 = vrcp.f32 %v1147_v28 }
 0x377   : > { %v7011_v34 = vadd.f32 %v1157_v21, %v1155_v13  ;;  %v4439_v13 = vld [vmem:[%s6886_s29 + $0xf8] sm:$0xff] }
 0x379   : > { %5791 = vtanh.f32 %v7011_v34 }
 0x37f   : > { %v5788_v35 = vpop.eup %5787 }
 0x380   : > { %v1162_v36 = vmul.f32 %v5788_v35, %v5786_v16  ;;  %v5790_v38 = vpop.eup %5789  ;;  %v4434_v16 = vld [vmem:[%s6886_s29 + $0xd0] sm:$0xff] }
 0x382   : > { %4430 = vst [vmem:[%s6904_s3 + $0x20] sm:$0xff] %v1162_v36  ;;  %1247 = vmatmul.mubr.f32.vlgmr.msra.gmra.mrb[12].mxu0 %v1162_v36  ;;  %1324 = vmatmul.mubr.f32.vlgmr.msra.gmra.mrb[12].mxu1 %v1162_v36 }
 0x383   : > { %v5792_v43 = vpop.eup %5791  ;;  %1252 = vmatprep.mubr.f32.mxu0 %v6233_v7  ;;  %1329 = vmatprep.mubr.f32.mxu1 %v6233_v7 }
 0x384   : > { %v1163_v23 = vmul.f32 %v5792_v43, %v5790_v38  ;;  %4907 = vmatpush1.bf16.msra.mxu0 %v6573_v8  ;;  %4939 = vmatpush1.bf16.msra.mxu1 %v6622_v25  ;;  %v4438_v43 = vld [vmem:[%s6886_s29 + $0xf0] sm:$0xff] }
 0x385   : > { %4909 = vmatprep.subr.bf16.mxu0 %v6575_v9  ;;  %4941 = vmatprep.subr.bf16.mxu1 %v6647_v33 }
 0x386   : > { %4431 = vst [vmem:[%s6904_s3 + $0x28] sm:$0xff] %v1163_v23  ;;  %1253 = vmatmul.mubr.f32.gmra.mrb[14].mxu0 %v1163_v23  ;;  %1330 = vmatmul.mubr.f32.gmra.mrb[14].mxu1 %v1163_v23 }
 0x387   : > { %1476 = vmatprep.mubr.f32.mxu0 %v6233_v7  ;;  %1553 = vmatprep.mubr.f32.mxu1 %v6233_v7 }
 0x388   : > { %4911 = vmatpush1.bf16.msra.mxu0 %v6591_v14  ;;  %4943 = vmatpush1.bf16.msra.mxu1 %v6658_v37 }
 0x389   : > { %4913 = vmatprep.subr.bf16.mxu0 %v6600_v17  ;;  %4945 = vmatprep.subr.bf16.mxu1 %v6682_v45 }
 0x38c   : > { %4915 = vmatpush1.bf16.msra.mxu0 %v6625_v26  ;;  %4947 = vmatpush1.bf16.msra.mxu1 %v6691_v48 }
 0x38d   : > { %4917 = vmatprep.subr.bf16.mxu0 %v6638_v30  ;;  %4949 = vmatprep.subr.bf16.mxu1 %v6703_v52 }
 0x390   : > { %4919 = vmatpush1.bf16.msra.mxu0 %v6674_v42  ;;  %4951 = vmatpush1.bf16.msra.mxu1 %v6733_v62 }
 0x391   : > { %4921 = vmatprep.subr.bf16.mxu0 %v6685_v46  ;;  %4953 = vmatprep.subr.bf16.mxu1 %v6739_v0 }
 0x394   : > { %4923 = vmatpush1.bf16.msra.mxu0 %v6712_v55  ;;  %4955 = vmatpush1.bf16.msra.mxu1 %v6769_v15 }
 0x395   : > { %4925 = vmatprep.subr.bf16.mxu0 %v6721_v58  ;;  %4957 = vmatprep.subr.bf16.mxu1 %v6775_v18 }
 0x398   : > { %4927 = vmatpush1.bf16.msra.mxu0 %v6754_v6  ;;  %4959 = vmatpush1.bf16.msra.mxu1 %v6802_v31 }
 0x399   : > { %4929 = vmatprep.subr.bf16.mxu0 %v6757_v10  ;;  %4961 = vmatprep.subr.bf16.mxu1 %v6805_v32 }
 0x39c   : > { %4931 = vmatpush1.bf16.msra.mxu0 %v6790_v24  ;;  %4963 = vmatpush1.bf16.msra.mxu1 %v6824_v40 }
 0x39d   : > { %4933 = vmatprep.subr.bf16.mxu0 %v6793_v27  ;;  %4965 = vmatprep.subr.bf16.mxu1 %v6827_v41 }
 0x3a0   : > { %4935 = vmatpush1.bf16.msra.mxu0 %v6820_v39  ;;  %4967 = vmatpush1.bf16.msra.mxu1 %v6837_v47 }
 0x3a1   : > { %4969 = vmatprep.subr.bf16.mxu0 %v6560_v3  ;;  %5001 = vmatprep.subr.bf16.mxu1 %v6614_v22 }
 0x455   : > { %v1248_v49 = vpop.f32.mrb[12].mxu0  ;;  %v1325_v53 = vpop.f32.mrb[12].mxu1 }
 0x456   : > { %v1336_v56 = vadd.f32 %v4432_v29, %v1248_v49  ;;  %v1250_v57 = vpop.f32.mrb[13].mxu0  ;;  %v1327_v54 = vpop.f32.mrb[13].mxu1  ;;  %v1338_v38 = vadd.f32 %v4434_v16, %v1325_v53 }
 0x457   : > { %v1337_v59 = vadd.f32 %v4433_v44, %v1250_v57  ;;  %v1339_v21 = vadd.f32 %v4435_v5, %v1327_v54 }
 0x458   : > { %v4440_v51 = vmul.f32 -1.442695, %v1336_v56 }
 0x459   : > { %v4442_v61 = vmul.f32 -1.442695, %v1337_v59  ;;  %v1254_v63 = vpop.f32.mrb[14].mxu0  ;;  %v1331_v4 = vpop.f32.mrb[14].mxu1  ;;  %v4444_v35 = vmul.f32 -1.442695, %v1339_v21 }
 0x45a   : > { %5793 = vpow2.f32 %v4440_v51  ;;  %v1340_v11 = vadd.f32 %v4436_v50, %v1254_v63  ;;  %v1256_v1 = vpop.f32.mrb[15].mxu0  ;;  %v1333_v2 = vpop.f32.mrb[15].mxu1  ;;  %v1342_v57 = vadd.f32 %v4438_v43, %v1331_v4 }
 0x45b   : > { %5795 = vpow2.f32 %v4442_v61  ;;  %v1341_v12 = vadd.f32 %v4437_v60, %v1256_v1  ;;  %v1343_v36 = vadd.f32 %v4439_v13, %v1333_v2 }
 0x45c   : > { %v4441_v20 = vmul.f32 -1.442695, %v1340_v11 }
 0x45d   : > { %v4443_v28 = vmul.f32 -1.442695, %v1341_v12  ;;  %v4445_v49 = vmul.f32 -1.442695, %v1343_v36 }
 0x45e   : > { %5797 = vpow2.f32 %v4441_v20 }
 0x45f   : > { %5799 = vpow2.f32 %v4443_v28 }
 0x460   : > { %5801 = vpow2.f32 %v4444_v35 }
 0x461   : > { %5803 = vtanh.f32 %v1338_v38 }
 0x464   : > { %v5794_v23 = vpop.eup %5793 }
 0x465   : > { %v5796_v29 = vpop.eup %5795  ;;  %v1350_v44 = vadd.f32 1.0, %v5794_v23 }
 0x466   : > { %v1362_v56 = vadd.f32 1.0, %v5796_v29 }
 0x467   : > { %5805 = vrcp.f32 %v1350_v44  ;;  %v4449_v44 = vld [vmem:[%s6886_s29 + $0x108] sm:$0xff] }
 0x468   : > { %v5798_v59 = vpop.eup %5797  ;;  %5807 = vrcp.f32 %v1362_v56 }
 0x469   : > { %v5800_v54 = vpop.eup %5799  ;;  %v1351_v50 = vadd.f32 1.0, %v5798_v59  ;;  %5809 = vpow2.f32 %v4445_v49 }
 0x46a   : > { %5811 = vtanh.f32 %v1342_v57  ;;  %v1363_v51 = vadd.f32 1.0, %v5800_v54  ;;  %v5802_v53 = vpop.eup %5801 }
 0x46b   : > { %5813 = vrcp.f32 %v1351_v50  ;;  %v5804_v60 = vpop.eup %5803  ;;  %v1376_v11 = vadd.f32 1.0, %v5802_v53 }
 0x46c   : > { %5815 = vrcp.f32 %v1363_v51  ;;  %v4452_v51 = vld [vmem:[%s6886_s29 + $0x120] sm:$0xff] }
 0x46d   : > { %5817 = vrcp.f32 %v1376_v11  ;;  %v4451_v11 = vld [vmem:[%s6886_s29 + $0x118] sm:$0xff] }
 0x471   : > { %v5806_v61 = vpop.eup %5805 }
 0x472   : > { %v5808_v63 = vpop.eup %5807  ;;  %v1386_v5 = vmul.f32 %v5806_v61, %v5804_v60  ;;  %v4453_v60 = vld [vmem:[%s6886_s29 + $0x128] sm:$0xff] }
 0x473   : > { %v5810_v1 = vpop.eup %5809  ;;  %v1384_v2 = vmul.f32 %v5808_v63, %v7007_v19 }
 0x474   : > { %v5812_v4 = vpop.eup %5811  ;;  %v1377_v13 = vadd.f32 1.0, %v5810_v1 }
 0x475   : > { %v5814_v12 = vpop.eup %5813  ;;  %v7061_v20 = vadd.f32 %v1386_v5, %v1384_v2 }
 0x476   : > { %v5816_v21 = vpop.eup %5815  ;;  %v1387_v28 = vmul.f32 %v5814_v12, %v5812_v4 }
 0x477   : > { %5819 = vtanh.f32 %v7061_v20  ;;  %v1385_v16 = vmul.f32 %v5816_v21, %v7011_v34  ;;  %v5818_v19 = vpop.eup %5817  ;;  %v4448_v34 = vld [vmem:[%s6886_s29 + $0x100] sm:$0xff] }
 0x478   : > { %5821 = vrcp.f32 %v1377_v13 }
 0x479   : > { %v7065_v35 = vadd.f32 %v1387_v28, %v1385_v16  ;;  %v4455_v16 = vld [vmem:[%s6886_s29 + $0x138] sm:$0xff] }
 0x47b   : > { %5823 = vtanh.f32 %v7065_v35 }
 0x481   : > { %v5820_v36 = vpop.eup %5819 }
 0x482   : > { %v1392_v38 = vmul.f32 %v5820_v36, %v5818_v19  ;;  %v5822_v43 = vpop.eup %5821  ;;  %v4450_v19 = vld [vmem:[%s6886_s29 + $0x110] sm:$0xff] }
 0x484   : > { %4446 = vst [vmem:[%s6904_s3 + $0x30] sm:$0xff] %v1392_v38  ;;  %1477 = vmatmul.mubr.f32.vlgmr.msra.gmra.mrb[16].mxu0 %v1392_v38  ;;  %1554 = vmatmul.mubr.f32.vlgmr.msra.gmra.mrb[16].mxu1 %v1392_v38 }
 0x485   : > { %v5824_v23 = vpop.eup %5823  ;;  %1482 = vmatprep.mubr.f32.mxu0 %v6233_v7  ;;  %1559 = vmatprep.mubr.f32.mxu1 %v6233_v7 }
 0x486   : > { %v1393_v29 = vmul.f32 %v5824_v23, %v5822_v43  ;;  %4971 = vmatpush1.bf16.msra.mxu0 %v6573_v8  ;;  %5003 = vmatpush1.bf16.msra.mxu1 %v6622_v25  ;;  %v4454_v23 = vld [vmem:[%s6886_s29 + $0x130] sm:$0xff] }
 0x487   : > { %4973 = vmatprep.subr.bf16.mxu0 %v6575_v9  ;;  %5005 = vmatprep.subr.bf16.mxu1 %v6647_v33 }
 0x488   : > { %4447 = vst [vmem:[%s6904_s3 + $0x38] sm:$0xff] %v1393_v29  ;;  %1483 = vmatmul.mubr.f32.gmra.mrb[18].mxu0 %v1393_v29  ;;  %1560 = vmatmul.mubr.f32.gmra.mrb[18].mxu1 %v1393_v29 }
 0x489   : > { %1706 = vmatprep.mubr.f32.mxu0 %v6233_v7  ;;  %1783 = vmatprep.mubr.f32.mxu1 %v6233_v7 }
 0x48a   : > { %4975 = vmatpush1.bf16.msra.mxu0 %v6591_v14  ;;  %5007 = vmatpush1.bf16.msra.mxu1 %v6658_v37 }
 0x48b   : > { %4977 = vmatprep.subr.bf16.mxu0 %v6600_v17  ;;  %5009 = vmatprep.subr.bf16.mxu1 %v6682_v45 }
 0x48e   : > { %4979 = vmatpush1.bf16.msra.mxu0 %v6625_v26  ;;  %5011 = vmatpush1.bf16.msra.mxu1 %v6691_v48 }
 0x48f   : > { %4981 = vmatprep.subr.bf16.mxu0 %v6638_v30  ;;  %5013 = vmatprep.subr.bf16.mxu1 %v6703_v52 }
 0x492   : > { %4983 = vmatpush1.bf16.msra.mxu0 %v6674_v42  ;;  %5015 = vmatpush1.bf16.msra.mxu1 %v6733_v62 }
 0x493   : > { %4985 = vmatprep.subr.bf16.mxu0 %v6685_v46  ;;  %5017 = vmatprep.subr.bf16.mxu1 %v6739_v0 }
 0x496   : > { %4987 = vmatpush1.bf16.msra.mxu0 %v6712_v55  ;;  %5019 = vmatpush1.bf16.msra.mxu1 %v6769_v15 }
 0x497   : > { %4989 = vmatprep.subr.bf16.mxu0 %v6721_v58  ;;  %5021 = vmatprep.subr.bf16.mxu1 %v6775_v18 }
 0x49a   : > { %4991 = vmatpush1.bf16.msra.mxu0 %v6754_v6  ;;  %5023 = vmatpush1.bf16.msra.mxu1 %v6802_v31 }
 0x49b   : > { %4993 = vmatprep.subr.bf16.mxu0 %v6757_v10  ;;  %5025 = vmatprep.subr.bf16.mxu1 %v6805_v32 }
 0x49e   : > { %4995 = vmatpush1.bf16.msra.mxu0 %v6790_v24  ;;  %5027 = vmatpush1.bf16.msra.mxu1 %v6824_v40 }
 0x49f   : > { %4997 = vmatprep.subr.bf16.mxu0 %v6793_v27  ;;  %5029 = vmatprep.subr.bf16.mxu1 %v6827_v41 }
 0x4a2   : > { %4999 = vmatpush1.bf16.msra.mxu0 %v6820_v39  ;;  %5031 = vmatpush1.bf16.msra.mxu1 %v6837_v47 }
 0x4a3   : > { %5033 = vmatprep.subr.bf16.mxu0 %v6560_v3  ;;  %5065 = vmatprep.subr.bf16.mxu1 %v6614_v22 }
 0x557   : > { %v1478_v49 = vpop.f32.mrb[16].mxu0  ;;  %v1555_v56 = vpop.f32.mrb[16].mxu1 }
 0x558   : > { %v1566_v57 = vadd.f32 %v4448_v34, %v1478_v49  ;;  %v1480_v59 = vpop.f32.mrb[17].mxu0  ;;  %v1557_v54 = vpop.f32.mrb[17].mxu1  ;;  %v1568_v43 = vadd.f32 %v4450_v19, %v1555_v56 }
 0x559   : > { %v1567_v50 = vadd.f32 %v4449_v44, %v1480_v59  ;;  %v1569_v28 = vadd.f32 %v4451_v11, %v1557_v54 }
 0x55a   : > { %v4456_v53 = vmul.f32 -1.442695, %v1566_v57 }
 0x55b   : > { %v4458_v61 = vmul.f32 -1.442695, %v1567_v50  ;;  %v1484_v63 = vpop.f32.mrb[18].mxu0  ;;  %v1561_v5 = vpop.f32.mrb[18].mxu1  ;;  %v4460_v36 = vmul.f32 -1.442695, %v1569_v28 }
 0x55c   : > { %5825 = vpow2.f32 %v4456_v53  ;;  %v1570_v1 = vadd.f32 %v4452_v51, %v1484_v63  ;;  %v1486_v2 = vpop.f32.mrb[19].mxu0  ;;  %v1563_v4 = vpop.f32.mrb[19].mxu1  ;;  %v1572_v59 = vadd.f32 %v4454_v23, %v1561_v5 }
 0x55d   : > { %5827 = vpow2.f32 %v4458_v61  ;;  %v1571_v12 = vadd.f32 %v4453_v60, %v1486_v2  ;;  %v1573_v38 = vadd.f32 %v4455_v16, %v1563_v4 }
 0x55e   : > { %v4457_v21 = vmul.f32 -1.442695, %v1570_v1 }
 0x55f   : > { %v4459_v13 = vmul.f32 -1.442695, %v1571_v12  ;;  %v4461_v49 = vmul.f32 -1.442695, %v1573_v38 }
 0x560   : > { %5829 = vpow2.f32 %v4457_v21 }
 0x561   : > { %5831 = vpow2.f32 %v4459_v13 }
 0x562   : > { %5833 = vpow2.f32 %v4460_v36 }
 0x563   : > { %5835 = vtanh.f32 %v1568_v43 }
 0x566   : > { %v5826_v29 = vpop.eup %5825 }
 0x567   : > { %v5828_v34 = vpop.eup %5827  ;;  %v1580_v44 = vadd.f32 1.0, %v5826_v29 }
 0x568   : > { %v1592_v57 = vadd.f32 1.0, %v5828_v34 }
 0x569   : > { %5837 = vrcp.f32 %v1580_v44  ;;  %v4465_v44 = vld [vmem:[%s6886_s29 + $0x148] sm:$0xff] }
 0x56a   : > { %v5830_v50 = vpop.eup %5829  ;;  %5839 = vrcp.f32 %v1592_v57 }
 0x56b   : > { %v5832_v54 = vpop.eup %5831  ;;  %v1581_v51 = vadd.f32 1.0, %v5830_v50  ;;  %5841 = vpow2.f32 %v4461_v49 }
 0x56c   : > { %5843 = vtanh.f32 %v1572_v59  ;;  %v1593_v53 = vadd.f32 1.0, %v5832_v54  ;;  %v5834_v56 = vpop.eup %5833 }
 0x56d   : > { %5845 = vrcp.f32 %v1581_v51  ;;  %v5836_v60 = vpop.eup %5835  ;;  %v1606_v1 = vadd.f32 1.0, %v5834_v56 }
 0x56e   : > { %5847 = vrcp.f32 %v1593_v53  ;;  %v4468_v53 = vld [vmem:[%s6886_s29 + $0x160] sm:$0xff] }
 0x56f   : > { %5849 = vrcp.f32 %v1606_v1  ;;  %v4467_v1 = vld [vmem:[%s6886_s29 + $0x158] sm:$0xff] }
 0x573   : > { %v5838_v61 = vpop.eup %5837 }
 0x574   : > { %v5840_v63 = vpop.eup %5839  ;;  %v1616_v11 = vmul.f32 %v5838_v61, %v5836_v60  ;;  %v4469_v60 = vld [vmem:[%s6886_s29 + $0x168] sm:$0xff] }
 0x575   : > { %v5842_v2 = vpop.eup %5841  ;;  %v1614_v4 = vmul.f32 %v5840_v63, %v7061_v20 }
 0x576   : > { %v5844_v5 = vpop.eup %5843  ;;  %v1607_v16 = vadd.f32 1.0, %v5842_v2 }
 0x577   : > { %v5846_v12 = vpop.eup %5845  ;;  %v7115_v21 = vadd.f32 %v1616_v11, %v1614_v4 }
 0x578   : > { %v5848_v28 = vpop.eup %5847  ;;  %v1617_v13 = vmul.f32 %v5846_v12, %v5844_v5 }
 0x579   : > { %5851 = vtanh.f32 %v7115_v21  ;;  %v1615_v19 = vmul.f32 %v5848_v28, %v7065_v35  ;;  %v5850_v20 = vpop.eup %5849  ;;  %v4464_v35 = vld [vmem:[%s6886_s29 + $0x140] sm:$0xff] }
 0x57a   : > { %5853 = vrcp.f32 %v1607_v16 }
 0x57b   : > { %v7119_v36 = vadd.f32 %v1617_v13, %v1615_v19  ;;  %v4471_v19 = vld [vmem:[%s6886_s29 + $0x178] sm:$0xff] }
 0x57d   : > { %5855 = vtanh.f32 %v7119_v36 }
 0x583   : > { %v5852_v38 = vpop.eup %5851 }
 0x584   : > { %v1622_v43 = vmul.f32 %v5852_v38, %v5850_v20  ;;  %v5854_v23 = vpop.eup %5853  ;;  %v4466_v20 = vld [vmem:[%s6886_s29 + $0x150] sm:$0xff] }
 0x586   : > { %4462 = vst [vmem:[%s6904_s3 + $0x40] sm:$0xff] %v1622_v43  ;;  %1707 = vmatmul.mubr.f32.vlgmr.msra.gmra.mrb[20].mxu0 %v1622_v43  ;;  %1784 = vmatmul.mubr.f32.vlgmr.msra.gmra.mrb[20].mxu1 %v1622_v43 }
 0x587   : > { %v5856_v29 = vpop.eup %5855  ;;  %1712 = vmatprep.mubr.f32.mxu0 %v6233_v7  ;;  %1789 = vmatprep.mubr.f32.mxu1 %v6233_v7 }
 0x588   : > { %v1623_v34 = vmul.f32 %v5856_v29, %v5854_v23  ;;  %5035 = vmatpush1.bf16.msra.mxu0 %v6573_v8  ;;  %5067 = vmatpush1.bf16.msra.mxu1 %v6622_v25  ;;  %v4470_v29 = vld [vmem:[%s6886_s29 + $0x170] sm:$0xff] }
 0x589   : > { %5037 = vmatprep.subr.bf16.mxu0 %v6575_v9  ;;  %5069 = vmatprep.subr.bf16.mxu1 %v6647_v33 }
 0x58a   : > { %4463 = vst [vmem:[%s6904_s3 + $0x48] sm:$0xff] %v1623_v34  ;;  %1713 = vmatmul.mubr.f32.gmra.mrb[22].mxu0 %v1623_v34  ;;  %1790 = vmatmul.mubr.f32.gmra.mrb[22].mxu1 %v1623_v34 }
 0x58b   : > { %1936 = vmatprep.mubr.f32.mxu0 %v6233_v7  ;;  %2013 = vmatprep.mubr.f32.mxu1 %v6233_v7 }
 0x58c   : > { %5039 = vmatpush1.bf16.msra.mxu0 %v6591_v14  ;;  %5071 = vmatpush1.bf16.msra.mxu1 %v6658_v37 }
 0x58d   : > { %5041 = vmatprep.subr.bf16.mxu0 %v6600_v17  ;;  %5073 = vmatprep.subr.bf16.mxu1 %v6682_v45 }
 0x590   : > { %5043 = vmatpush1.bf16.msra.mxu0 %v6625_v26  ;;  %5075 = vmatpush1.bf16.msra.mxu1 %v6691_v48 }
 0x591   : > { %5045 = vmatprep.subr.bf16.mxu0 %v6638_v30  ;;  %5077 = vmatprep.subr.bf16.mxu1 %v6703_v52 }
 0x594   : > { %5047 = vmatpush1.bf16.msra.mxu0 %v6674_v42  ;;  %5079 = vmatpush1.bf16.msra.mxu1 %v6733_v62 }
 0x595   : > { %5049 = vmatprep.subr.bf16.mxu0 %v6685_v46  ;;  %5081 = vmatprep.subr.bf16.mxu1 %v6739_v0 }
 0x598   : > { %5051 = vmatpush1.bf16.msra.mxu0 %v6712_v55  ;;  %5083 = vmatpush1.bf16.msra.mxu1 %v6769_v15 }
 0x599   : > { %5053 = vmatprep.subr.bf16.mxu0 %v6721_v58  ;;  %5085 = vmatprep.subr.bf16.mxu1 %v6775_v18 }
 0x59c   : > { %5055 = vmatpush1.bf16.msra.mxu0 %v6754_v6  ;;  %5087 = vmatpush1.bf16.msra.mxu1 %v6802_v31 }
 0x59d   : > { %5057 = vmatprep.subr.bf16.mxu0 %v6757_v10  ;;  %5089 = vmatprep.subr.bf16.mxu1 %v6805_v32 }
 0x5a0   : > { %5059 = vmatpush1.bf16.msra.mxu0 %v6790_v24  ;;  %5091 = vmatpush1.bf16.msra.mxu1 %v6824_v40 }
 0x5a1   : > { %5061 = vmatprep.subr.bf16.mxu0 %v6793_v27  ;;  %5093 = vmatprep.subr.bf16.mxu1 %v6827_v41 }
 0x5a4   : > { %5063 = vmatpush1.bf16.msra.mxu0 %v6820_v39  ;;  %5095 = vmatpush1.bf16.msra.mxu1 %v6837_v47 }
 0x5a5   : > { %5097 = vmatprep.subr.bf16.mxu0 %v6560_v3  ;;  %5129 = vmatprep.subr.bf16.mxu1 %v6614_v22 }
 0x659   : > { %v1708_v49 = vpop.f32.mrb[20].mxu0  ;;  %v1785_v57 = vpop.f32.mrb[20].mxu1 }
 0x65a   : > { %v1796_v59 = vadd.f32 %v4464_v35, %v1708_v49  ;;  %v1710_v50 = vpop.f32.mrb[21].mxu0  ;;  %v1787_v54 = vpop.f32.mrb[21].mxu1  ;;  %v1798_v23 = vadd.f32 %v4466_v20, %v1785_v57 }
 0x65b   : > { %v1797_v51 = vadd.f32 %v4465_v44, %v1710_v50  ;;  %v1799_v13 = vadd.f32 %v4467_v1, %v1787_v54 }
 0x65c   : > { %v4472_v56 = vmul.f32 -1.442695, %v1796_v59 }
 0x65d   : > { %v4474_v61 = vmul.f32 -1.442695, %v1797_v51  ;;  %v1714_v63 = vpop.f32.mrb[22].mxu0  ;;  %v1791_v11 = vpop.f32.mrb[22].mxu1  ;;  %v4476_v38 = vmul.f32 -1.442695, %v1799_v13 }
 0x65e   : > { %5857 = vpow2.f32 %v4472_v56  ;;  %v1800_v2 = vadd.f32 %v4468_v53, %v1714_v63  ;;  %v1716_v4 = vpop.f32.mrb[23].mxu0  ;;  %v1793_v5 = vpop.f32.mrb[23].mxu1  ;;  %v1802_v50 = vadd.f32 %v4470_v29, %v1791_v11 }
 0x65f   : > { %5859 = vpow2.f32 %v4474_v61  ;;  %v1801_v12 = vadd.f32 %v4469_v60, %v1716_v4  ;;  %v1803_v43 = vadd.f32 %v4471_v19, %v1793_v5 }
 0x660   : > { %v4473_v28 = vmul.f32 -1.442695, %v1800_v2 }
 0x661   : > { %v4475_v16 = vmul.f32 -1.442695, %v1801_v12  ;;  %v4477_v49 = vmul.f32 -1.442695, %v1803_v43 }
 0x662   : > { %5861 = vpow2.f32 %v4473_v28 }
 0x663   : > { %5863 = vpow2.f32 %v4475_v16 }
 0x664   : > { %5865 = vpow2.f32 %v4476_v38 }
 0x665   : > { %5867 = vtanh.f32 %v1798_v23 }
 0x668   : > { %v5858_v34 = vpop.eup %5857 }
 0x669   : > { %v5860_v35 = vpop.eup %5859  ;;  %v1810_v44 = vadd.f32 1.0, %v5858_v34 }
 0x66a   : > { %v1822_v59 = vadd.f32 1.0, %v5860_v35 }
 0x66b   : > { %5869 = vrcp.f32 %v1810_v44  ;;  %v4481_v44 = vld [vmem:[%s6886_s29 + $0x188] sm:$0xff] }
 0x66c   : > { %v5862_v51 = vpop.eup %5861  ;;  %5871 = vrcp.f32 %v1822_v59 }
 0x66d   : > { %v5864_v54 = vpop.eup %5863  ;;  %v1811_v53 = vadd.f32 1.0, %v5862_v51  ;;  %5873 = vpow2.f32 %v4477_v49 }
 0x66e   : > { %5875 = vtanh.f32 %v1802_v50  ;;  %v1823_v56 = vadd.f32 1.0, %v5864_v54  ;;  %v5866_v57 = vpop.eup %5865 }
 0x66f   : > { %5877 = vrcp.f32 %v1811_v53  ;;  %v5868_v60 = vpop.eup %5867  ;;  %v1836_v2 = vadd.f32 1.0, %v5866_v57 }
 0x670   : > { %5879 = vrcp.f32 %v1823_v56  ;;  %v4484_v56 = vld [vmem:[%s6886_s29 + $0x1a0] sm:$0xff] }
 0x671   : > { %5881 = vrcp.f32 %v1836_v2  ;;  %v4483_v2 = vld [vmem:[%s6886_s29 + $0x198] sm:$0xff] }
 0x675   : > { %v5870_v61 = vpop.eup %5869 }
 0x676   : > { %v5872_v63 = vpop.eup %5871  ;;  %v1846_v1 = vmul.f32 %v5870_v61, %v5868_v60  ;;  %v4485_v60 = vld [vmem:[%s6886_s29 + $0x1a8] sm:$0xff] }
 0x677   : > { %v5874_v4 = vpop.eup %5873  ;;  %v1844_v5 = vmul.f32 %v5872_v63, %v7115_v21 }
 0x678   : > { %v5876_v11 = vpop.eup %5875  ;;  %v1837_v19 = vadd.f32 1.0, %v5874_v4 }
 0x679   : > { %v5878_v12 = vpop.eup %5877  ;;  %v7169_v28 = vadd.f32 %v1846_v1, %v1844_v5 }
 0x67a   : > { %v5880_v13 = vpop.eup %5879  ;;  %v1847_v16 = vmul.f32 %v5878_v12, %v5876_v11 }
 0x67b   : > { %5883 = vtanh.f32 %v7169_v28  ;;  %v1845_v20 = vmul.f32 %v5880_v13, %v7119_v36  ;;  %v5882_v21 = vpop.eup %5881  ;;  %v4480_v36 = vld [vmem:[%s6886_s29 + $0x180] sm:$0xff] }
 0x67c   : > { %5885 = vrcp.f32 %v1837_v19 }
 0x67d   : > { %v7173_v38 = vadd.f32 %v1847_v16, %v1845_v20  ;;  %v4487_v20 = vld [vmem:[%s6886_s29 + $0x1b8] sm:$0xff] }
 0x67f   : > { %5887 = vtanh.f32 %v7173_v38 }
 0x685   : > { %v5884_v43 = vpop.eup %5883 }
 0x686   : > { %v1852_v23 = vmul.f32 %v5884_v43, %v5882_v21  ;;  %v5886_v29 = vpop.eup %5885  ;;  %v4482_v21 = vld [vmem:[%s6886_s29 + $0x190] sm:$0xff] }
 0x688   : > { %4478 = vst [vmem:[%s6904_s3 + $0x50] sm:$0xff] %v1852_v23  ;;  %1937 = vmatmul.mubr.f32.vlgmr.msra.gmra.mrb[24].mxu0 %v1852_v23  ;;  %2014 = vmatmul.mubr.f32.vlgmr.msra.gmra.mrb[24].mxu1 %v1852_v23 }
 0x689   : > { %v5888_v34 = vpop.eup %5887  ;;  %1942 = vmatprep.mubr.f32.mxu0 %v6233_v7  ;;  %2019 = vmatprep.mubr.f32.mxu1 %v6233_v7 }
 0x68a   : > { %v1853_v35 = vmul.f32 %v5888_v34, %v5886_v29  ;;  %5099 = vmatpush1.bf16.msra.mxu0 %v6573_v8  ;;  %5131 = vmatpush1.bf16.msra.mxu1 %v6622_v25  ;;  %v4486_v34 = vld [vmem:[%s6886_s29 + $0x1b0] sm:$0xff] }
 0x68b   : > { %5101 = vmatprep.subr.bf16.mxu0 %v6575_v9  ;;  %5133 = vmatprep.subr.bf16.mxu1 %v6647_v33 }
 0x68c   : > { %4479 = vst [vmem:[%s6904_s3 + $0x58] sm:$0xff] %v1853_v35  ;;  %1943 = vmatmul.mubr.f32.gmra.mrb[26].mxu0 %v1853_v35  ;;  %2020 = vmatmul.mubr.f32.gmra.mrb[26].mxu1 %v1853_v35 }
 0x68d   : > { %2166 = vmatprep.mubr.f32.mxu0 %v6233_v7  ;;  %2243 = vmatprep.mubr.f32.mxu1 %v6233_v7 }
 0x68e   : > { %5103 = vmatpush1.bf16.msra.mxu0 %v6591_v14  ;;  %5135 = vmatpush1.bf16.msra.mxu1 %v6658_v37 }
 0x68f   : > { %5105 = vmatprep.subr.bf16.mxu0 %v6600_v17  ;;  %5137 = vmatprep.subr.bf16.mxu1 %v6682_v45 }
 0x692   : > { %5107 = vmatpush1.bf16.msra.mxu0 %v6625_v26  ;;  %5139 = vmatpush1.bf16.msra.mxu1 %v6691_v48 }
 0x693   : > { %5109 = vmatprep.subr.bf16.mxu0 %v6638_v30  ;;  %5141 = vmatprep.subr.bf16.mxu1 %v6703_v52 }
 0x696   : > { %5111 = vmatpush1.bf16.msra.mxu0 %v6674_v42  ;;  %5143 = vmatpush1.bf16.msra.mxu1 %v6733_v62 }
 0x697   : > { %5113 = vmatprep.subr.bf16.mxu0 %v6685_v46  ;;  %5145 = vmatprep.subr.bf16.mxu1 %v6739_v0 }
 0x69a   : > { %5115 = vmatpush1.bf16.msra.mxu0 %v6712_v55  ;;  %5147 = vmatpush1.bf16.msra.mxu1 %v6769_v15 }
 0x69b   : > { %5117 = vmatprep.subr.bf16.mxu0 %v6721_v58  ;;  %5149 = vmatprep.subr.bf16.mxu1 %v6775_v18 }
 0x69e   : > { %5119 = vmatpush1.bf16.msra.mxu0 %v6754_v6  ;;  %5151 = vmatpush1.bf16.msra.mxu1 %v6802_v31 }
 0x69f   : > { %5121 = vmatprep.subr.bf16.mxu0 %v6757_v10  ;;  %5153 = vmatprep.subr.bf16.mxu1 %v6805_v32 }
 0x6a2   : > { %5123 = vmatpush1.bf16.msra.mxu0 %v6790_v24  ;;  %5155 = vmatpush1.bf16.msra.mxu1 %v6824_v40 }
 0x6a3   : > { %5125 = vmatprep.subr.bf16.mxu0 %v6793_v27  ;;  %5157 = vmatprep.subr.bf16.mxu1 %v6827_v41 }
 0x6a6   : > { %5127 = vmatpush1.bf16.msra.mxu0 %v6820_v39  ;;  %5159 = vmatpush1.bf16.msra.mxu1 %v6837_v47 }
 0x6a7   : > { %5161 = vmatprep.subr.bf16.mxu0 %v6560_v3  ;;  %5193 = vmatprep.subr.bf16.mxu1 %v6614_v22 }
 0x75b   : > { %v1938_v49 = vpop.f32.mrb[24].mxu0  ;;  %v2015_v59 = vpop.f32.mrb[24].mxu1 }
 0x75c   : > { %v2026_v50 = vadd.f32 %v4480_v36, %v1938_v49  ;;  %v1940_v51 = vpop.f32.mrb[25].mxu0  ;;  %v2017_v54 = vpop.f32.mrb[25].mxu1  ;;  %v2028_v29 = vadd.f32 %v4482_v21, %v2015_v59 }
 0x75d   : > { %v2027_v53 = vadd.f32 %v4481_v44, %v1940_v51  ;;  %v2029_v16 = vadd.f32 %v4483_v2, %v2017_v54 }
 0x75e   : > { %v4488_v57 = vmul.f32 -1.442695, %v2026_v50 }
 0x75f   : > { %v4490_v61 = vmul.f32 -1.442695, %v2027_v53  ;;  %v1944_v63 = vpop.f32.mrb[26].mxu0  ;;  %v2021_v1 = vpop.f32.mrb[26].mxu1  ;;  %v4492_v43 = vmul.f32 -1.442695, %v2029_v16 }
 0x760   : > { %5889 = vpow2.f32 %v4488_v57  ;;  %v2030_v4 = vadd.f32 %v4484_v56, %v1944_v63  ;;  %v1946_v5 = vpop.f32.mrb[27].mxu0  ;;  %v2023_v11 = vpop.f32.mrb[27].mxu1  ;;  %v2032_v51 = vadd.f32 %v4486_v34, %v2021_v1 }
 0x761   : > { %5891 = vpow2.f32 %v4490_v61  ;;  %v2031_v12 = vadd.f32 %v4485_v60, %v1946_v5  ;;  %v2033_v23 = vadd.f32 %v4487_v20, %v2023_v11 }
 0x762   : > { %v4489_v13 = vmul.f32 -1.442695, %v2030_v4 }
 0x763   : > { %v4491_v19 = vmul.f32 -1.442695, %v2031_v12  ;;  %v4493_v49 = vmul.f32 -1.442695, %v2033_v23 }
 0x764   : > { %5893 = vpow2.f32 %v4489_v13 }
 0x765   : > { %5895 = vpow2.f32 %v4491_v19 }
 0x766   : > { %5897 = vpow2.f32 %v4492_v43 }
 0x767   : > { %5899 = vtanh.f32 %v2028_v29 }
 0x76a   : > { %v5890_v35 = vpop.eup %5889 }
 0x76b   : > { %v5892_v36 = vpop.eup %5891  ;;  %v2040_v44 = vadd.f32 1.0, %v5890_v35 }
 0x76c   : > { %v2052_v50 = vadd.f32 1.0, %v5892_v36 }
 0x76d   : > { %5901 = vrcp.f32 %v2040_v44  ;;  %v4497_v44 = vld [vmem:[%s6886_s29 + $0x1c8] sm:$0xff] }
 0x76e   : > { %v5894_v53 = vpop.eup %5893  ;;  %5903 = vrcp.f32 %v2052_v50 }
 0x76f   : > { %v5896_v54 = vpop.eup %5895  ;;  %v2041_v56 = vadd.f32 1.0, %v5894_v53  ;;  %5905 = vpow2.f32 %v4493_v49 }
 0x770   : > { %5907 = vtanh.f32 %v2032_v51  ;;  %v2053_v57 = vadd.f32 1.0, %v5896_v54  ;;  %v5898_v59 = vpop.eup %5897 }
 0x771   : > { %5909 = vrcp.f32 %v2041_v56  ;;  %v5900_v60 = vpop.eup %5899  ;;  %v2066_v4 = vadd.f32 1.0, %v5898_v59 }
 0x772   : > { %5911 = vrcp.f32 %v2053_v57  ;;  %v4500_v57 = vld [vmem:[%s6886_s29 + $0x1e0] sm:$0xff] }
 0x773   : > { %5913 = vrcp.f32 %v2066_v4  ;;  %v4499_v4 = vld [vmem:[%s6886_s29 + $0x1d8] sm:$0xff] }
 0x777   : > { %v5902_v61 = vpop.eup %5901 }
 0x778   : > { %v5904_v63 = vpop.eup %5903  ;;  %v2076_v2 = vmul.f32 %v5902_v61, %v5900_v60  ;;  %v4501_v60 = vld [vmem:[%s6886_s29 + $0x1e8] sm:$0xff] }
 0x779   : > { %v5906_v5 = vpop.eup %5905  ;;  %v2074_v11 = vmul.f32 %v5904_v63, %v7169_v28 }
 0x77a   : > { %v5908_v1 = vpop.eup %5907  ;;  %v2067_v20 = vadd.f32 1.0, %v5906_v5 }
 0x77b   : > { %v5910_v12 = vpop.eup %5909  ;;  %v7223_v13 = vadd.f32 %v2076_v2, %v2074_v11 }
 0x77c   : > { %v5912_v16 = vpop.eup %5911  ;;  %v2077_v19 = vmul.f32 %v5910_v12, %v5908_v1 }
 0x77d   : > { %5915 = vtanh.f32 %v7223_v13  ;;  %v2075_v21 = vmul.f32 %v5912_v16, %v7173_v38  ;;  %v5914_v28 = vpop.eup %5913  ;;  %v4496_v38 = vld [vmem:[%s6886_s29 + $0x1c0] sm:$0xff] }
 0x77e   : > { %5917 = vrcp.f32 %v2067_v20 }
 0x77f   : > { %v7227_v43 = vadd.f32 %v2077_v19, %v2075_v21  ;;  %v4503_v21 = vld [vmem:[%s6886_s29 + $0x1f8] sm:$0xff] }
 0x781   : > { %5919 = vtanh.f32 %v7227_v43 }
 0x787   : > { %v5916_v23 = vpop.eup %5915 }
 0x788   : > { %v2082_v29 = vmul.f32 %v5916_v23, %v5914_v28  ;;  %v5918_v34 = vpop.eup %5917  ;;  %v4498_v28 = vld [vmem:[%s6886_s29 + $0x1d0] sm:$0xff] }
 0x78a   : > { %4494 = vst [vmem:[%s6904_s3 + $0x60] sm:$0xff] %v2082_v29  ;;  %2167 = vmatmul.mubr.f32.vlgmr.msra.gmra.mrb[28].mxu0 %v2082_v29  ;;  %2244 = vmatmul.mubr.f32.vlgmr.msra.gmra.mrb[28].mxu1 %v2082_v29 }
 0x78b   : > { %v5920_v35 = vpop.eup %5919  ;;  %2172 = vmatprep.mubr.f32.mxu0 %v6233_v7  ;;  %2249 = vmatprep.mubr.f32.mxu1 %v6233_v7 }
 0x78c   : > { %v2083_v36 = vmul.f32 %v5920_v35, %v5918_v34  ;;  %5163 = vmatpush1.bf16.msra.mxu0 %v6573_v8  ;;  %5195 = vmatpush1.bf16.msra.mxu1 %v6622_v25  ;;  %v4502_v35 = vld [vmem:[%s6886_s29 + $0x1f0] sm:$0xff] }
 0x78d   : > { %5165 = vmatprep.subr.bf16.mxu0 %v6575_v9  ;;  %5197 = vmatprep.subr.bf16.mxu1 %v6647_v33 }
 0x78e   : > { %4495 = vst [vmem:[%s6904_s3 + $0x68] sm:$0xff] %v2083_v36  ;;  %2173 = vmatmul.mubr.f32.gmra.mrb[30].mxu0 %v2083_v36  ;;  %2250 = vmatmul.mubr.f32.gmra.mrb[30].mxu1 %v2083_v36 }
 0x78f   : > { %2396 = vmatprep.mubr.f32.mxu0 %v6233_v7  ;;  %2473 = vmatprep.mubr.f32.mxu1 %v6233_v7 }
 0x790   : > { %5167 = vmatpush1.bf16.msra.mxu0 %v6591_v14  ;;  %5199 = vmatpush1.bf16.msra.mxu1 %v6658_v37 }
 0x791   : > { %5169 = vmatprep.subr.bf16.mxu0 %v6600_v17  ;;  %5201 = vmatprep.subr.bf16.mxu1 %v6682_v45 }
 0x794   : > { %5171 = vmatpush1.bf16.msra.mxu0 %v6625_v26  ;;  %5203 = vmatpush1.bf16.msra.mxu1 %v6691_v48 }
 0x795   : > { %5173 = vmatprep.subr.bf16.mxu0 %v6638_v30  ;;  %5205 = vmatprep.subr.bf16.mxu1 %v6703_v52 }
 0x798   : > { %5175 = vmatpush1.bf16.msra.mxu0 %v6674_v42  ;;  %5207 = vmatpush1.bf16.msra.mxu1 %v6733_v62 }
 0x799   : > { %5177 = vmatprep.subr.bf16.mxu0 %v6685_v46  ;;  %5209 = vmatprep.subr.bf16.mxu1 %v6739_v0 }
 0x79c   : > { %5179 = vmatpush1.bf16.msra.mxu0 %v6712_v55  ;;  %5211 = vmatpush1.bf16.msra.mxu1 %v6769_v15 }
 0x79d   : > { %5181 = vmatprep.subr.bf16.mxu0 %v6721_v58  ;;  %5213 = vmatprep.subr.bf16.mxu1 %v6775_v18 }
 0x7a0   : > { %5183 = vmatpush1.bf16.msra.mxu0 %v6754_v6  ;;  %5215 = vmatpush1.bf16.msra.mxu1 %v6802_v31 }
 0x7a1   : > { %5185 = vmatprep.subr.bf16.mxu0 %v6757_v10  ;;  %5217 = vmatprep.subr.bf16.mxu1 %v6805_v32 }
 0x7a4   : > { %5187 = vmatpush1.bf16.msra.mxu0 %v6790_v24  ;;  %5219 = vmatpush1.bf16.msra.mxu1 %v6824_v40 }
 0x7a5   : > { %5189 = vmatprep.subr.bf16.mxu0 %v6793_v27  ;;  %5221 = vmatprep.subr.bf16.mxu1 %v6827_v41 }
 0x7a8   : > { %5191 = vmatpush1.bf16.msra.mxu0 %v6820_v39  ;;  %5223 = vmatpush1.bf16.msra.mxu1 %v6837_v47 }
 0x7a9   : > { %5225 = vmatprep.subr.bf16.mxu0 %v6560_v3  ;;  %5257 = vmatprep.subr.bf16.mxu1 %v6614_v22 }
 0x85d   : > { %v2168_v49 = vpop.f32.mrb[28].mxu0  ;;  %v2245_v50 = vpop.f32.mrb[28].mxu1 }
 0x85e   : > { %v2256_v51 = vadd.f32 %v4496_v38, %v2168_v49  ;;  %v2170_v53 = vpop.f32.mrb[29].mxu0  ;;  %v2247_v54 = vpop.f32.mrb[29].mxu1  ;;  %v2258_v34 = vadd.f32 %v4498_v28, %v2245_v50 }
 0x85f   : > { %v2257_v56 = vadd.f32 %v4497_v44, %v2170_v53  ;;  %v2259_v19 = vadd.f32 %v4499_v4, %v2247_v54 }
 0x860   : > { %v4504_v59 = vmul.f32 -1.442695, %v2256_v51 }
 0x861   : > { %v4506_v61 = vmul.f32 -1.442695, %v2257_v56  ;;  %v2174_v63 = vpop.f32.mrb[30].mxu0  ;;  %v2251_v2 = vpop.f32.mrb[30].mxu1  ;;  %v4508_v23 = vmul.f32 -1.442695, %v2259_v19 }
 0x862   : > { %5921 = vpow2.f32 %v4504_v59  ;;  %v2260_v5 = vadd.f32 %v4500_v57, %v2174_v63  ;;  %v2176_v11 = vpop.f32.mrb[31].mxu0  ;;  %v2253_v1 = vpop.f32.mrb[31].mxu1  ;;  %v2262_v53 = vadd.f32 %v4502_v35, %v2251_v2 }
 0x863   : > { %5923 = vpow2.f32 %v4506_v61  ;;  %v2261_v12 = vadd.f32 %v4501_v60, %v2176_v11  ;;  %v2263_v29 = vadd.f32 %v4503_v21, %v2253_v1 }
 0x864   : > { %v4505_v16 = vmul.f32 -1.442695, %v2260_v5 }
 0x865   : > { %v4507_v20 = vmul.f32 -1.442695, %v2261_v12  ;;  %v4509_v49 = vmul.f32 -1.442695, %v2263_v29 }
 0x866   : > { %5925 = vpow2.f32 %v4505_v16 }
 0x867   : > { %5927 = vpow2.f32 %v4507_v20 }
 0x868   : > { %5929 = vpow2.f32 %v4508_v23 }
 0x869   : > { %5931 = vtanh.f32 %v2258_v34 }
 0x86c   : > { %v5922_v36 = vpop.eup %5921 }
 0x86d   : > { %v5924_v38 = vpop.eup %5923  ;;  %v2270_v44 = vadd.f32 1.0, %v5922_v36 }
 0x86e   : > { %v2282_v51 = vadd.f32 1.0, %v5924_v38 }
 0x86f   : > { %5933 = vrcp.f32 %v2270_v44  ;;  %v4513_v44 = vld [vmem:[%s6886_s29 + $0x208] sm:$0xff] }
 0x870   : > { %v5926_v56 = vpop.eup %5925  ;;  %5935 = vrcp.f32 %v2282_v51 }
 0x871   : > { %v5928_v54 = vpop.eup %5927  ;;  %v2271_v57 = vadd.f32 1.0, %v5926_v56  ;;  %5937 = vpow2.f32 %v4509_v49 }
 0x872   : > { %5939 = vtanh.f32 %v2262_v53  ;;  %v2283_v59 = vadd.f32 1.0, %v5928_v54  ;;  %v5930_v50 = vpop.eup %5929 }
 0x873   : > { %5941 = vrcp.f32 %v2271_v57  ;;  %v5932_v60 = vpop.eup %5931  ;;  %v2296_v5 = vadd.f32 1.0, %v5930_v50 }
 0x874   : > { %5943 = vrcp.f32 %v2283_v59  ;;  %v4516_v59 = vld [vmem:[%s6886_s29 + $0x220] sm:$0xff] }
 0x875   : > { %5945 = vrcp.f32 %v2296_v5  ;;  %v4515_v5 = vld [vmem:[%s6886_s29 + $0x218] sm:$0xff] }
 0x879   : > { %v5934_v61 = vpop.eup %5933 }
 0x87a   : > { %v5936_v63 = vpop.eup %5935  ;;  %v2306_v4 = vmul.f32 %v5934_v61, %v5932_v60  ;;  %v4517_v60 = vld [vmem:[%s6886_s29 + $0x228] sm:$0xff] }
 0x87b   : > { %v5938_v11 = vpop.eup %5937  ;;  %v2304_v1 = vmul.f32 %v5936_v63, %v7223_v13 }
 0x87c   : > { %v5940_v2 = vpop.eup %5939  ;;  %v2297_v21 = vadd.f32 1.0, %v5938_v11 }
 0x87d   : > { %v5942_v12 = vpop.eup %5941  ;;  %v7277_v16 = vadd.f32 %v2306_v4, %v2304_v1 }
 0x87e   : > { %v5944_v19 = vpop.eup %5943  ;;  %v2307_v20 = vmul.f32 %v5942_v12, %v5940_v2 }
 0x87f   : > { %5947 = vtanh.f32 %v7277_v16  ;;  %v2305_v28 = vmul.f32 %v5944_v19, %v7227_v43  ;;  %v5946_v13 = vpop.eup %5945  ;;  %v4512_v43 = vld [vmem:[%s6886_s29 + $0x200] sm:$0xff] }
 0x880   : > { %5949 = vrcp.f32 %v2297_v21 }
 0x881   : > { %v7281_v23 = vadd.f32 %v2307_v20, %v2305_v28  ;;  %v4519_v28 = vld [vmem:[%s6886_s29 + $0x238] sm:$0xff] }
 0x883   : > { %5951 = vtanh.f32 %v7281_v23 }
 0x889   : > { %v5948_v29 = vpop.eup %5947 }
 0x88a   : > { %v2312_v34 = vmul.f32 %v5948_v29, %v5946_v13  ;;  %v5950_v35 = vpop.eup %5949  ;;  %v4514_v13 = vld [vmem:[%s6886_s29 + $0x210] sm:$0xff] }
 0x88c   : > { %4510 = vst [vmem:[%s6904_s3 + $0x70] sm:$0xff] %v2312_v34  ;;  %2397 = vmatmul.mubr.f32.vlgmr.msra.gmra.mrb[32].mxu0 %v2312_v34  ;;  %2474 = vmatmul.mubr.f32.vlgmr.msra.gmra.mrb[32].mxu1 %v2312_v34 }
 0x88d   : > { %v5952_v36 = vpop.eup %5951  ;;  %2402 = vmatprep.mubr.f32.mxu0 %v6233_v7  ;;  %2479 = vmatprep.mubr.f32.mxu1 %v6233_v7 }
 0x88e   : > { %v2313_v38 = vmul.f32 %v5952_v36, %v5950_v35  ;;  %5227 = vmatpush1.bf16.msra.mxu0 %v6573_v8  ;;  %5259 = vmatpush1.bf16.msra.mxu1 %v6622_v25  ;;  %v4518_v36 = vld [vmem:[%s6886_s29 + $0x230] sm:$0xff] }
 0x88f   : > { %5229 = vmatprep.subr.bf16.mxu0 %v6575_v9  ;;  %5261 = vmatprep.subr.bf16.mxu1 %v6647_v33 }
 0x890   : > { %4511 = vst [vmem:[%s6904_s3 + $0x78] sm:$0xff] %v2313_v38  ;;  %2403 = vmatmul.mubr.f32.gmra.mrb[34].mxu0 %v2313_v38  ;;  %2480 = vmatmul.mubr.f32.gmra.mrb[34].mxu1 %v2313_v38 }
 0x891   : > { %2626 = vmatprep.mubr.f32.mxu0 %v6233_v7  ;;  %2703 = vmatprep.mubr.f32.mxu1 %v6233_v7 }
 0x892   : > { %5231 = vmatpush1.bf16.msra.mxu0 %v6591_v14  ;;  %5263 = vmatpush1.bf16.msra.mxu1 %v6658_v37 }
 0x893   : > { %5233 = vmatprep.subr.bf16.mxu0 %v6600_v17  ;;  %5265 = vmatprep.subr.bf16.mxu1 %v6682_v45 }
 0x896   : > { %5235 = vmatpush1.bf16.msra.mxu0 %v6625_v26  ;;  %5267 = vmatpush1.bf16.msra.mxu1 %v6691_v48 }
 0x897   : > { %5237 = vmatprep.subr.bf16.mxu0 %v6638_v30  ;;  %5269 = vmatprep.subr.bf16.mxu1 %v6703_v52 }
 0x89a   : > { %5239 = vmatpush1.bf16.msra.mxu0 %v6674_v42  ;;  %5271 = vmatpush1.bf16.msra.mxu1 %v6733_v62 }
 0x89b   : > { %5241 = vmatprep.subr.bf16.mxu0 %v6685_v46  ;;  %5273 = vmatprep.subr.bf16.mxu1 %v6739_v0 }
 0x89e   : > { %5243 = vmatpush1.bf16.msra.mxu0 %v6712_v55  ;;  %5275 = vmatpush1.bf16.msra.mxu1 %v6769_v15 }
 0x89f   : > { %5245 = vmatprep.subr.bf16.mxu0 %v6721_v58  ;;  %5277 = vmatprep.subr.bf16.mxu1 %v6775_v18 }
 0x8a2   : > { %5247 = vmatpush1.bf16.msra.mxu0 %v6754_v6  ;;  %5279 = vmatpush1.bf16.msra.mxu1 %v6802_v31 }
 0x8a3   : > { %5249 = vmatprep.subr.bf16.mxu0 %v6757_v10  ;;  %5281 = vmatprep.subr.bf16.mxu1 %v6805_v32 }
 0x8a6   : > { %5251 = vmatpush1.bf16.msra.mxu0 %v6790_v24  ;;  %5283 = vmatpush1.bf16.msra.mxu1 %v6824_v40 }
 0x8a7   : > { %5253 = vmatprep.subr.bf16.mxu0 %v6793_v27  ;;  %5285 = vmatprep.subr.bf16.mxu1 %v6827_v41 }
 0x8aa   : > { %5255 = vmatpush1.bf16.msra.mxu0 %v6820_v39  ;;  %5287 = vmatpush1.bf16.msra.mxu1 %v6837_v47 }
 0x8ab   : > { %5289 = vmatprep.subr.bf16.mxu0 %v6560_v3  ;;  %5321 = vmatprep.subr.bf16.mxu1 %v6614_v22 }
 0x95f   : > { %v2398_v49 = vpop.f32.mrb[32].mxu0  ;;  %v2475_v51 = vpop.f32.mrb[32].mxu1 }
 0x960   : > { %v2486_v53 = vadd.f32 %v4512_v43, %v2398_v49  ;;  %v2400_v56 = vpop.f32.mrb[33].mxu0  ;;  %v2477_v54 = vpop.f32.mrb[33].mxu1  ;;  %v2488_v35 = vadd.f32 %v4514_v13, %v2475_v51 }
 0x961   : > { %v2487_v57 = vadd.f32 %v4513_v44, %v2400_v56  ;;  %v2489_v20 = vadd.f32 %v4515_v5, %v2477_v54 }
 0x962   : > { %v4520_v50 = vmul.f32 -1.442695, %v2486_v53 }
 0x963   : > { %v4522_v61 = vmul.f32 -1.442695, %v2487_v57  ;;  %v2404_v63 = vpop.f32.mrb[34].mxu0  ;;  %v2481_v4 = vpop.f32.mrb[34].mxu1  ;;  %v4524_v29 = vmul.f32 -1.442695, %v2489_v20 }
 0x964   : > { %5953 = vpow2.f32 %v4520_v50  ;;  %v2490_v11 = vadd.f32 %v4516_v59, %v2404_v63  ;;  %v2406_v1 = vpop.f32.mrb[35].mxu0  ;;  %v2483_v2 = vpop.f32.mrb[35].mxu1  ;;  %v2492_v56 = vadd.f32 %v4518_v36, %v2481_v4 }
 0x965   : > { %5955 = vpow2.f32 %v4522_v61  ;;  %v2491_v12 = vadd.f32 %v4517_v60, %v2406_v1  ;;  %v2493_v34 = vadd.f32 %v4519_v28, %v2483_v2 }
 0x966   : > { %v4521_v19 = vmul.f32 -1.442695, %v2490_v11 }
 0x967   : > { %v4523_v21 = vmul.f32 -1.442695, %v2491_v12  ;;  %v4525_v49 = vmul.f32 -1.442695, %v2493_v34 }
 0x968   : > { %5957 = vpow2.f32 %v4521_v19 }
 0x969   : > { %5959 = vpow2.f32 %v4523_v21 }
 0x96a   : > { %5961 = vpow2.f32 %v4524_v29 }
 0x96b   : > { %5963 = vtanh.f32 %v2488_v35 }
 0x96e   : > { %v5954_v38 = vpop.eup %5953 }
 0x96f   : > { %v5956_v43 = vpop.eup %5955  ;;  %v2500_v44 = vadd.f32 1.0, %v5954_v38 }
 0x970   : > { %v2512_v53 = vadd.f32 1.0, %v5956_v43 }
 0x971   : > { %5965 = vrcp.f32 %v2500_v44  ;;  %v4529_v44 = vld [vmem:[%s6886_s29 + $0x248] sm:$0xff] }
 0x972   : > { %v5958_v57 = vpop.eup %5957  ;;  %5967 = vrcp.f32 %v2512_v53 }
 0x973   : > { %v5960_v54 = vpop.eup %5959  ;;  %v2501_v59 = vadd.f32 1.0, %v5958_v57  ;;  %5969 = vpow2.f32 %v4525_v49 }
 0x974   : > { %5971 = vtanh.f32 %v2492_v56  ;;  %v2513_v50 = vadd.f32 1.0, %v5960_v54  ;;  %v5962_v51 = vpop.eup %5961 }
 0x975   : > { %5973 = vrcp.f32 %v2501_v59  ;;  %v5964_v60 = vpop.eup %5963  ;;  %v2526_v11 = vadd.f32 1.0, %v5962_v51 }
 0x976   : > { %5975 = vrcp.f32 %v2513_v50  ;;  %v4532_v50 = vld [vmem:[%s6886_s29 + $0x260] sm:$0xff] }
 0x977   : > { %5977 = vrcp.f32 %v2526_v11  ;;  %v4531_v11 = vld [vmem:[%s6886_s29 + $0x258] sm:$0xff] }
 0x97b   : > { %v5966_v61 = vpop.eup %5965 }
 0x97c   : > { %v5968_v63 = vpop.eup %5967  ;;  %v2536_v5 = vmul.f32 %v5966_v61, %v5964_v60  ;;  %v4533_v60 = vld [vmem:[%s6886_s29 + $0x268] sm:$0xff] }
 0x97d   : > { %v5970_v1 = vpop.eup %5969  ;;  %v2534_v2 = vmul.f32 %v5968_v63, %v7277_v16 }
 0x97e   : > { %v5972_v4 = vpop.eup %5971  ;;  %v2527_v28 = vadd.f32 1.0, %v5970_v1 }
 0x97f   : > { %v5974_v12 = vpop.eup %5973  ;;  %v7331_v19 = vadd.f32 %v2536_v5, %v2534_v2 }
 0x980   : > { %v5976_v20 = vpop.eup %5975  ;;  %v2537_v21 = vmul.f32 %v5974_v12, %v5972_v4 }
 0x981   : > { %5979 = vtanh.f32 %v7331_v19  ;;  %v2535_v13 = vmul.f32 %v5976_v20, %v7281_v23  ;;  %v5978_v16 = vpop.eup %5977  ;;  %v4528_v23 = vld [vmem:[%s6886_s29 + $0x240] sm:$0xff] }
 0x982   : > { %5981 = vrcp.f32 %v2527_v28 }
 0x983   : > { %v7335_v29 = vadd.f32 %v2537_v21, %v2535_v13  ;;  %v4535_v13 = vld [vmem:[%s6886_s29 + $0x278] sm:$0xff] }
 0x985   : > { %5983 = vtanh.f32 %v7335_v29 }
 0x98b   : > { %v5980_v34 = vpop.eup %5979 }
 0x98c   : > { %v2542_v35 = vmul.f32 %v5980_v34, %v5978_v16  ;;  %v5982_v36 = vpop.eup %5981  ;;  %v4530_v16 = vld [vmem:[%s6886_s29 + $0x250] sm:$0xff] }
 0x98e   : > { %4526 = vst [vmem:[%s6904_s3 + $0x80] sm:$0xff] %v2542_v35  ;;  %2627 = vmatmul.mubr.f32.vlgmr.msra.gmra.mrb[36].mxu0 %v2542_v35  ;;  %2704 = vmatmul.mubr.f32.vlgmr.msra.gmra.mrb[36].mxu1 %v2542_v35 }
 0x98f   : > { %v5984_v38 = vpop.eup %5983  ;;  %2632 = vmatprep.mubr.f32.mxu0 %v6233_v7  ;;  %2709 = vmatprep.mubr.f32.mxu1 %v6233_v7 }
 0x990   : > { %v2543_v43 = vmul.f32 %v5984_v38, %v5982_v36  ;;  %5291 = vmatpush1.bf16.msra.mxu0 %v6573_v8  ;;  %5323 = vmatpush1.bf16.msra.mxu1 %v6622_v25  ;;  %v4534_v38 = vld [vmem:[%s6886_s29 + $0x270] sm:$0xff] }
 0x991   : > { %5293 = vmatprep.subr.bf16.mxu0 %v6575_v9  ;;  %5325 = vmatprep.subr.bf16.mxu1 %v6647_v33 }
 0x992   : > { %4527 = vst [vmem:[%s6904_s3 + $0x88] sm:$0xff] %v2543_v43  ;;  %2633 = vmatmul.mubr.f32.gmra.mrb[38].mxu0 %v2543_v43  ;;  %2710 = vmatmul.mubr.f32.gmra.mrb[38].mxu1 %v2543_v43 }
 0x993   : > { %2856 = vmatprep.mubr.f32.mxu0 %v6233_v7  ;;  %2933 = vmatprep.mubr.f32.mxu1 %v6233_v7 }
 0x994   : > { %5295 = vmatpush1.bf16.msra.mxu0 %v6591_v14  ;;  %5327 = vmatpush1.bf16.msra.mxu1 %v6658_v37 }
 0x995   : > { %5297 = vmatprep.subr.bf16.mxu0 %v6600_v17  ;;  %5329 = vmatprep.subr.bf16.mxu1 %v6682_v45 }
 0x998   : > { %5299 = vmatpush1.bf16.msra.mxu0 %v6625_v26  ;;  %5331 = vmatpush1.bf16.msra.mxu1 %v6691_v48 }
 0x999   : > { %5301 = vmatprep.subr.bf16.mxu0 %v6638_v30  ;;  %5333 = vmatprep.subr.bf16.mxu1 %v6703_v52 }
 0x99c   : > { %5303 = vmatpush1.bf16.msra.mxu0 %v6674_v42  ;;  %5335 = vmatpush1.bf16.msra.mxu1 %v6733_v62 }
 0x99d   : > { %5305 = vmatprep.subr.bf16.mxu0 %v6685_v46  ;;  %5337 = vmatprep.subr.bf16.mxu1 %v6739_v0 }
 0x9a0   : > { %5307 = vmatpush1.bf16.msra.mxu0 %v6712_v55  ;;  %5339 = vmatpush1.bf16.msra.mxu1 %v6769_v15 }
 0x9a1   : > { %5309 = vmatprep.subr.bf16.mxu0 %v6721_v58  ;;  %5341 = vmatprep.subr.bf16.mxu1 %v6775_v18 }
 0x9a4   : > { %5311 = vmatpush1.bf16.msra.mxu0 %v6754_v6  ;;  %5343 = vmatpush1.bf16.msra.mxu1 %v6802_v31 }
 0x9a5   : > { %5313 = vmatprep.subr.bf16.mxu0 %v6757_v10  ;;  %5345 = vmatprep.subr.bf16.mxu1 %v6805_v32 }
 0x9a8   : > { %5315 = vmatpush1.bf16.msra.mxu0 %v6790_v24  ;;  %5347 = vmatpush1.bf16.msra.mxu1 %v6824_v40 }
 0x9a9   : > { %5317 = vmatprep.subr.bf16.mxu0 %v6793_v27  ;;  %5349 = vmatprep.subr.bf16.mxu1 %v6827_v41 }
 0x9ac   : > { %5319 = vmatpush1.bf16.msra.mxu0 %v6820_v39  ;;  %5351 = vmatpush1.bf16.msra.mxu1 %v6837_v47 }
 0x9ad   : > { %5353 = vmatprep.subr.bf16.mxu0 %v6560_v3  ;;  %5385 = vmatprep.subr.bf16.mxu1 %v6614_v22 }
 0xa61   : > { %v2628_v49 = vpop.f32.mrb[36].mxu0  ;;  %v2705_v53 = vpop.f32.mrb[36].mxu1 }
 0xa62   : > { %v2716_v56 = vadd.f32 %v4528_v23, %v2628_v49  ;;  %v2630_v57 = vpop.f32.mrb[37].mxu0  ;;  %v2707_v54 = vpop.f32.mrb[37].mxu1  ;;  %v2718_v36 = vadd.f32 %v4530_v16, %v2705_v53 }
 0xa63   : > { %v2717_v59 = vadd.f32 %v4529_v44, %v2630_v57  ;;  %v2719_v21 = vadd.f32 %v4531_v11, %v2707_v54 }
 0xa64   : > { %v4536_v51 = vmul.f32 -1.442695, %v2716_v56 }
 0xa65   : > { %v4538_v61 = vmul.f32 -1.442695, %v2717_v59  ;;  %v2634_v63 = vpop.f32.mrb[38].mxu0  ;;  %v2711_v5 = vpop.f32.mrb[38].mxu1  ;;  %v4540_v34 = vmul.f32 -1.442695, %v2719_v21 }
 0xa66   : > { %5985 = vpow2.f32 %v4536_v51  ;;  %v2720_v1 = vadd.f32 %v4532_v50, %v2634_v63  ;;  %v2636_v2 = vpop.f32.mrb[39].mxu0  ;;  %v2713_v4 = vpop.f32.mrb[39].mxu1  ;;  %v2722_v57 = vadd.f32 %v4534_v38, %v2711_v5 }
 0xa67   : > { %5987 = vpow2.f32 %v4538_v61  ;;  %v2721_v12 = vadd.f32 %v4533_v60, %v2636_v2  ;;  %v2723_v35 = vadd.f32 %v4535_v13, %v2713_v4 }
 0xa68   : > { %v4537_v20 = vmul.f32 -1.442695, %v2720_v1 }
 0xa69   : > { %v4539_v28 = vmul.f32 -1.442695, %v2721_v12  ;;  %v4541_v49 = vmul.f32 -1.442695, %v2723_v35 }
 0xa6a   : > { %5989 = vpow2.f32 %v4537_v20 }
 0xa6b   : > { %5991 = vpow2.f32 %v4539_v28 }
 0xa6c   : > { %5993 = vpow2.f32 %v4540_v34 }
 0xa6d   : > { %5995 = vtanh.f32 %v2718_v36 }
 0xa70   : > { %v5986_v43 = vpop.eup %5985 }
 0xa71   : > { %v5988_v23 = vpop.eup %5987  ;;  %v2730_v44 = vadd.f32 1.0, %v5986_v43 }
 0xa72   : > { %v2742_v56 = vadd.f32 1.0, %v5988_v23 }
 0xa73   : > { %5997 = vrcp.f32 %v2730_v44  ;;  %v4545_v44 = vld [vmem:[%s6886_s29 + $0x288] sm:$0xff] }
 0xa74   : > { %v5990_v59 = vpop.eup %5989  ;;  %5999 = vrcp.f32 %v2742_v56 }
 0xa75   : > { %v5992_v54 = vpop.eup %5991  ;;  %v2731_v50 = vadd.f32 1.0, %v5990_v59  ;;  %6001 = vpow2.f32 %v4541_v49 }
 0xa76   : > { %6003 = vtanh.f32 %v2722_v57  ;;  %v2743_v51 = vadd.f32 1.0, %v5992_v54  ;;  %v5994_v53 = vpop.eup %5993 }
 0xa77   : > { %6005 = vrcp.f32 %v2731_v50  ;;  %v5996_v60 = vpop.eup %5995  ;;  %v2756_v1 = vadd.f32 1.0, %v5994_v53 }
 0xa78   : > { %6007 = vrcp.f32 %v2743_v51  ;;  %v4548_v51 = vld [vmem:[%s6886_s29 + $0x2a0] sm:$0xff] }
 0xa79   : > { %6009 = vrcp.f32 %v2756_v1  ;;  %v4547_v1 = vld [vmem:[%s6886_s29 + $0x298] sm:$0xff] }
 0xa7d   : > { %v5998_v61 = vpop.eup %5997 }
 0xa7e   : > { %v6000_v63 = vpop.eup %5999  ;;  %v2766_v11 = vmul.f32 %v5998_v61, %v5996_v60  ;;  %v4549_v60 = vld [vmem:[%s6886_s29 + $0x2a8] sm:$0xff] }
 0xa7f   : > { %v6002_v2 = vpop.eup %6001  ;;  %v2764_v4 = vmul.f32 %v6000_v63, %v7331_v19 }
 0xa80   : > { %v6004_v5 = vpop.eup %6003  ;;  %v2757_v13 = vadd.f32 1.0, %v6002_v2 }
 0xa81   : > { %v6006_v12 = vpop.eup %6005  ;;  %v7385_v20 = vadd.f32 %v2766_v11, %v2764_v4 }
 0xa82   : > { %v6008_v21 = vpop.eup %6007  ;;  %v2767_v28 = vmul.f32 %v6006_v12, %v6004_v5 }
 0xa83   : > { %6011 = vtanh.f32 %v7385_v20  ;;  %v2765_v16 = vmul.f32 %v6008_v21, %v7335_v29  ;;  %v6010_v19 = vpop.eup %6009  ;;  %v4544_v29 = vld [vmem:[%s6886_s29 + $0x280] sm:$0xff] }
 0xa84   : > { %6013 = vrcp.f32 %v2757_v13 }
 0xa85   : > { %v7389_v34 = vadd.f32 %v2767_v28, %v2765_v16  ;;  %v4551_v16 = vld [vmem:[%s6886_s29 + $0x2b8] sm:$0xff] }
 0xa87   : > { %6015 = vtanh.f32 %v7389_v34 }
 0xa8d   : > { %v6012_v35 = vpop.eup %6011 }
 0xa8e   : > { %v2772_v36 = vmul.f32 %v6012_v35, %v6010_v19  ;;  %v6014_v38 = vpop.eup %6013  ;;  %v4546_v19 = vld [vmem:[%s6886_s29 + $0x290] sm:$0xff] }
 0xa90   : > { %4542 = vst [vmem:[%s6904_s3 + $0x90] sm:$0xff] %v2772_v36  ;;  %2857 = vmatmul.mubr.f32.vlgmr.msra.gmra.mrb[40].mxu0 %v2772_v36  ;;  %2934 = vmatmul.mubr.f32.vlgmr.msra.gmra.mrb[40].mxu1 %v2772_v36 }
 0xa91   : > { %v6016_v43 = vpop.eup %6015  ;;  %2862 = vmatprep.mubr.f32.mxu0 %v6233_v7  ;;  %2939 = vmatprep.mubr.f32.mxu1 %v6233_v7 }
 0xa92   : > { %v2773_v23 = vmul.f32 %v6016_v43, %v6014_v38  ;;  %5355 = vmatpush1.bf16.msra.mxu0 %v6573_v8  ;;  %5387 = vmatpush1.bf16.msra.mxu1 %v6622_v25  ;;  %v4550_v43 = vld [vmem:[%s6886_s29 + $0x2b0] sm:$0xff] }
 0xa93   : > { %5357 = vmatprep.subr.bf16.mxu0 %v6575_v9  ;;  %5389 = vmatprep.subr.bf16.mxu1 %v6647_v33 }
 0xa94   : > { %4543 = vst [vmem:[%s6904_s3 + $0x98] sm:$0xff] %v2773_v23  ;;  %2863 = vmatmul.mubr.f32.gmra.mrb[42].mxu0 %v2773_v23  ;;  %2940 = vmatmul.mubr.f32.gmra.mrb[42].mxu1 %v2773_v23 }
 0xa95   : > { %3086 = vmatprep.mubr.f32.mxu0 %v6233_v7  ;;  %3163 = vmatprep.mubr.f32.mxu1 %v6233_v7 }
 0xa96   : > { %5359 = vmatpush1.bf16.msra.mxu0 %v6591_v14  ;;  %5391 = vmatpush1.bf16.msra.mxu1 %v6658_v37 }
 0xa97   : > { %5361 = vmatprep.subr.bf16.mxu0 %v6600_v17  ;;  %5393 = vmatprep.subr.bf16.mxu1 %v6682_v45 }
 0xa9a   : > { %5363 = vmatpush1.bf16.msra.mxu0 %v6625_v26  ;;  %5395 = vmatpush1.bf16.msra.mxu1 %v6691_v48 }
 0xa9b   : > { %5365 = vmatprep.subr.bf16.mxu0 %v6638_v30  ;;  %5397 = vmatprep.subr.bf16.mxu1 %v6703_v52 }
 0xa9e   : > { %5367 = vmatpush1.bf16.msra.mxu0 %v6674_v42  ;;  %5399 = vmatpush1.bf16.msra.mxu1 %v6733_v62 }
 0xa9f   : > { %5369 = vmatprep.subr.bf16.mxu0 %v6685_v46  ;;  %5401 = vmatprep.subr.bf16.mxu1 %v6739_v0 }
 0xaa2   : > { %5371 = vmatpush1.bf16.msra.mxu0 %v6712_v55  ;;  %5403 = vmatpush1.bf16.msra.mxu1 %v6769_v15 }
 0xaa3   : > { %5373 = vmatprep.subr.bf16.mxu0 %v6721_v58  ;;  %5405 = vmatprep.subr.bf16.mxu1 %v6775_v18 }
 0xaa6   : > { %5375 = vmatpush1.bf16.msra.mxu0 %v6754_v6  ;;  %5407 = vmatpush1.bf16.msra.mxu1 %v6802_v31 }
 0xaa7   : > { %5377 = vmatprep.subr.bf16.mxu0 %v6757_v10  ;;  %5409 = vmatprep.subr.bf16.mxu1 %v6805_v32 }
 0xaaa   : > { %5379 = vmatpush1.bf16.msra.mxu0 %v6790_v24  ;;  %5411 = vmatpush1.bf16.msra.mxu1 %v6824_v40 }
 0xaab   : > { %5381 = vmatprep.subr.bf16.mxu0 %v6793_v27  ;;  %5413 = vmatprep.subr.bf16.mxu1 %v6827_v41 }
 0xaae   : > { %5383 = vmatpush1.bf16.msra.mxu0 %v6820_v39  ;;  %5415 = vmatpush1.bf16.msra.mxu1 %v6837_v47 }
 0xaaf   : > { %5417 = vmatprep.subr.bf16.mxu0 %v6560_v3  ;;  %5449 = vmatprep.subr.bf16.mxu1 %v6614_v22 }
 0xb63   : > { %v2858_v49 = vpop.f32.mrb[40].mxu0  ;;  %v2935_v56 = vpop.f32.mrb[40].mxu1 }
 0xb64   : > { %v2946_v57 = vadd.f32 %v4544_v29, %v2858_v49  ;;  %v2860_v59 = vpop.f32.mrb[41].mxu0  ;;  %v2937_v54 = vpop.f32.mrb[41].mxu1  ;;  %v2948_v38 = vadd.f32 %v4546_v19, %v2935_v56 }
 0xb65   : > { %v2947_v50 = vadd.f32 %v4545_v44, %v2860_v59  ;;  %v2949_v28 = vadd.f32 %v4547_v1, %v2937_v54 }
 0xb66   : > { %v4552_v53 = vmul.f32 -1.442695, %v2946_v57 }
 0xb67   : > { %v4554_v61 = vmul.f32 -1.442695, %v2947_v50  ;;  %v2864_v63 = vpop.f32.mrb[42].mxu0  ;;  %v2941_v11 = vpop.f32.mrb[42].mxu1  ;;  %v4556_v35 = vmul.f32 -1.442695, %v2949_v28 }
 0xb68   : > { %6017 = vpow2.f32 %v4552_v53  ;;  %v2950_v2 = vadd.f32 %v4548_v51, %v2864_v63  ;;  %v2866_v4 = vpop.f32.mrb[43].mxu0  ;;  %v2943_v5 = vpop.f32.mrb[43].mxu1  ;;  %v2952_v59 = vadd.f32 %v4550_v43, %v2941_v11 }
 0xb69   : > { %6019 = vpow2.f32 %v4554_v61  ;;  %v2951_v12 = vadd.f32 %v4549_v60, %v2866_v4  ;;  %v2953_v36 = vadd.f32 %v4551_v16, %v2943_v5 }
 0xb6a   : > { %v4553_v21 = vmul.f32 -1.442695, %v2950_v2 }
 0xb6b   : > { %v4555_v13 = vmul.f32 -1.442695, %v2951_v12  ;;  %v4557_v49 = vmul.f32 -1.442695, %v2953_v36 }
 0xb6c   : > { %6021 = vpow2.f32 %v4553_v21 }
 0xb6d   : > { %6023 = vpow2.f32 %v4555_v13 }
 0xb6e   : > { %6025 = vpow2.f32 %v4556_v35 }
 0xb6f   : > { %6027 = vtanh.f32 %v2948_v38 }
 0xb72   : > { %v6018_v23 = vpop.eup %6017 }
 0xb73   : > { %v6020_v29 = vpop.eup %6019  ;;  %v2960_v44 = vadd.f32 1.0, %v6018_v23 }
 0xb74   : > { %v2972_v57 = vadd.f32 1.0, %v6020_v29 }
 0xb75   : > { %6029 = vrcp.f32 %v2960_v44  ;;  %v4561_v44 = vld [vmem:[%s6886_s29 + $0x2c8] sm:$0xff] }
 0xb76   : > { %v6022_v50 = vpop.eup %6021  ;;  %6031 = vrcp.f32 %v2972_v57 }
 0xb77   : > { %v6024_v54 = vpop.eup %6023  ;;  %v2961_v51 = vadd.f32 1.0, %v6022_v50  ;;  %6033 = vpow2.f32 %v4557_v49 }
 0xb78   : > { %6035 = vtanh.f32 %v2952_v59  ;;  %v2973_v53 = vadd.f32 1.0, %v6024_v54  ;;  %v6026_v56 = vpop.eup %6025 }
 0xb79   : > { %6037 = vrcp.f32 %v2961_v51  ;;  %v6028_v60 = vpop.eup %6027  ;;  %v2986_v2 = vadd.f32 1.0, %v6026_v56 }
 0xb7a   : > { %6039 = vrcp.f32 %v2973_v53  ;;  %v4564_v53 = vld [vmem:[%s6886_s29 + $0x2e0] sm:$0xff] }
 0xb7b   : > { %6041 = vrcp.f32 %v2986_v2  ;;  %v4563_v2 = vld [vmem:[%s6886_s29 + $0x2d8] sm:$0xff] }
 0xb7f   : > { %v6030_v61 = vpop.eup %6029 }
 0xb80   : > { %v6032_v63 = vpop.eup %6031  ;;  %v2996_v1 = vmul.f32 %v6030_v61, %v6028_v60  ;;  %v4565_v60 = vld [vmem:[%s6886_s29 + $0x2e8] sm:$0xff] }
 0xb81   : > { %v6034_v4 = vpop.eup %6033  ;;  %v2994_v5 = vmul.f32 %v6032_v63, %v7385_v20 }
 0xb82   : > { %v6036_v11 = vpop.eup %6035  ;;  %v2987_v16 = vadd.f32 1.0, %v6034_v4 }
 0xb83   : > { %v6038_v12 = vpop.eup %6037  ;;  %v7439_v21 = vadd.f32 %v2996_v1, %v2994_v5 }
 0xb84   : > { %v6040_v28 = vpop.eup %6039  ;;  %v2997_v13 = vmul.f32 %v6038_v12, %v6036_v11 }
 0xb85   : > { %6043 = vtanh.f32 %v7439_v21  ;;  %v2995_v19 = vmul.f32 %v6040_v28, %v7389_v34  ;;  %v6042_v20 = vpop.eup %6041  ;;  %v4560_v34 = vld [vmem:[%s6886_s29 + $0x2c0] sm:$0xff] }
 0xb86   : > { %6045 = vrcp.f32 %v2987_v16 }
 0xb87   : > { %v7443_v35 = vadd.f32 %v2997_v13, %v2995_v19  ;;  %v4567_v19 = vld [vmem:[%s6886_s29 + $0x2f8] sm:$0xff] }
 0xb89   : > { %6047 = vtanh.f32 %v7443_v35 }
 0xb8f   : > { %v6044_v36 = vpop.eup %6043 }
 0xb90   : > { %v3002_v38 = vmul.f32 %v6044_v36, %v6042_v20  ;;  %v6046_v43 = vpop.eup %6045  ;;  %v4562_v20 = vld [vmem:[%s6886_s29 + $0x2d0] sm:$0xff] }
 0xb92   : > { %4558 = vst [vmem:[%s6904_s3 + $0xa0] sm:$0xff] %v3002_v38  ;;  %3087 = vmatmul.mubr.f32.vlgmr.msra.gmra.mrb[44].mxu0 %v3002_v38  ;;  %3164 = vmatmul.mubr.f32.vlgmr.msra.gmra.mrb[44].mxu1 %v3002_v38 }
 0xb93   : > { %v6048_v23 = vpop.eup %6047  ;;  %3092 = vmatprep.mubr.f32.mxu0 %v6233_v7  ;;  %3169 = vmatprep.mubr.f32.mxu1 %v6233_v7 }
 0xb94   : > { %v3003_v29 = vmul.f32 %v6048_v23, %v6046_v43  ;;  %5419 = vmatpush1.bf16.msra.mxu0 %v6573_v8  ;;  %5451 = vmatpush1.bf16.msra.mxu1 %v6622_v25  ;;  %v4566_v23 = vld [vmem:[%s6886_s29 + $0x2f0] sm:$0xff] }
 0xb95   : > { %5421 = vmatprep.subr.bf16.mxu0 %v6575_v9  ;;  %5453 = vmatprep.subr.bf16.mxu1 %v6647_v33 }
 0xb96   : > { %4559 = vst [vmem:[%s6904_s3 + $0xa8] sm:$0xff] %v3003_v29  ;;  %3093 = vmatmul.mubr.f32.gmra.mrb[46].mxu0 %v3003_v29  ;;  %3170 = vmatmul.mubr.f32.gmra.mrb[46].mxu1 %v3003_v29 }
 0xb97   : > { %3316 = vmatprep.mubr.f32.mxu0 %v6233_v7  ;;  %3393 = vmatprep.mubr.f32.mxu1 %v6233_v7 }
 0xb98   : > { %5423 = vmatpush1.bf16.msra.mxu0 %v6591_v14  ;;  %5455 = vmatpush1.bf16.msra.mxu1 %v6658_v37 }
 0xb99   : > { %5425 = vmatprep.subr.bf16.mxu0 %v6600_v17  ;;  %5457 = vmatprep.subr.bf16.mxu1 %v6682_v45 }
 0xb9c   : > { %5427 = vmatpush1.bf16.msra.mxu0 %v6625_v26  ;;  %5459 = vmatpush1.bf16.msra.mxu1 %v6691_v48 }
 0xb9d   : > { %5429 = vmatprep.subr.bf16.mxu0 %v6638_v30  ;;  %5461 = vmatprep.subr.bf16.mxu1 %v6703_v52 }
 0xba0   : > { %5431 = vmatpush1.bf16.msra.mxu0 %v6674_v42  ;;  %5463 = vmatpush1.bf16.msra.mxu1 %v6733_v62 }
 0xba1   : > { %5433 = vmatprep.subr.bf16.mxu0 %v6685_v46  ;;  %5465 = vmatprep.subr.bf16.mxu1 %v6739_v0 }
 0xba4   : > { %5435 = vmatpush1.bf16.msra.mxu0 %v6712_v55  ;;  %5467 = vmatpush1.bf16.msra.mxu1 %v6769_v15 }
 0xba5   : > { %5437 = vmatprep.subr.bf16.mxu0 %v6721_v58  ;;  %5469 = vmatprep.subr.bf16.mxu1 %v6775_v18 }
 0xba8   : > { %5439 = vmatpush1.bf16.msra.mxu0 %v6754_v6  ;;  %5471 = vmatpush1.bf16.msra.mxu1 %v6802_v31 }
 0xba9   : > { %5441 = vmatprep.subr.bf16.mxu0 %v6757_v10  ;;  %5473 = vmatprep.subr.bf16.mxu1 %v6805_v32 }
 0xbac   : > { %5443 = vmatpush1.bf16.msra.mxu0 %v6790_v24  ;;  %5475 = vmatpush1.bf16.msra.mxu1 %v6824_v40 }
 0xbad   : > { %5445 = vmatprep.subr.bf16.mxu0 %v6793_v27  ;;  %5477 = vmatprep.subr.bf16.mxu1 %v6827_v41 }
 0xbb0   : > { %5447 = vmatpush1.bf16.msra.mxu0 %v6820_v39  ;;  %5479 = vmatpush1.bf16.msra.mxu1 %v6837_v47 }
 0xbb1   : > { %5481 = vmatprep.subr.bf16.mxu0 %v6560_v3  ;;  %5513 = vmatprep.subr.bf16.mxu1 %v6614_v22 }
 0xc65   : > { %v3088_v49 = vpop.f32.mrb[44].mxu0  ;;  %v3165_v57 = vpop.f32.mrb[44].mxu1 }
 0xc66   : > { %v3176_v59 = vadd.f32 %v4560_v34, %v3088_v49  ;;  %v3090_v50 = vpop.f32.mrb[45].mxu0  ;;  %v3167_v54 = vpop.f32.mrb[45].mxu1  ;;  %v3178_v43 = vadd.f32 %v4562_v20, %v3165_v57 }
 0xc67   : > { %v3177_v51 = vadd.f32 %v4561_v44, %v3090_v50  ;;  %v3179_v13 = vadd.f32 %v4563_v2, %v3167_v54 }
 0xc68   : > { %v4568_v56 = vmul.f32 -1.442695, %v3176_v59 }
 0xc69   : > { %v4570_v61 = vmul.f32 -1.442695, %v3177_v51  ;;  %v3094_v63 = vpop.f32.mrb[46].mxu0  ;;  %v3171_v1 = vpop.f32.mrb[46].mxu1  ;;  %v4572_v36 = vmul.f32 -1.442695, %v3179_v13 }
 0xc6a   : > { %6049 = vpow2.f32 %v4568_v56  ;;  %v3180_v4 = vadd.f32 %v4564_v53, %v3094_v63  ;;  %v3096_v5 = vpop.f32.mrb[47].mxu0  ;;  %v3173_v11 = vpop.f32.mrb[47].mxu1  ;;  %v3182_v50 = vadd.f32 %v4566_v23, %v3171_v1 }
 0xc6b   : > { %6051 = vpow2.f32 %v4570_v61  ;;  %v3181_v12 = vadd.f32 %v4565_v60, %v3096_v5  ;;  %v3183_v38 = vadd.f32 %v4567_v19, %v3173_v11 }
 0xc6c   : > { %v4569_v28 = vmul.f32 -1.442695, %v3180_v4 }
 0xc6d   : > { %v4571_v16 = vmul.f32 -1.442695, %v3181_v12  ;;  %v4573_v49 = vmul.f32 -1.442695, %v3183_v38 }
 0xc6e   : > { %6053 = vpow2.f32 %v4569_v28 }
 0xc6f   : > { %6055 = vpow2.f32 %v4571_v16 }
 0xc70   : > { %6057 = vpow2.f32 %v4572_v36 }
 0xc71   : > { %6059 = vtanh.f32 %v3178_v43 }
 0xc74   : > { %v6050_v29 = vpop.eup %6049 }
 0xc75   : > { %v6052_v34 = vpop.eup %6051  ;;  %v3190_v44 = vadd.f32 1.0, %v6050_v29 }
 0xc76   : > { %v3202_v59 = vadd.f32 1.0, %v6052_v34 }
 0xc77   : > { %6061 = vrcp.f32 %v3190_v44  ;;  %v4577_v44 = vld [vmem:[%s6886_s29 + $0x308] sm:$0xff] }
 0xc78   : > { %v6054_v51 = vpop.eup %6053  ;;  %6063 = vrcp.f32 %v3202_v59 }
 0xc79   : > { %v6056_v54 = vpop.eup %6055  ;;  %v3191_v53 = vadd.f32 1.0, %v6054_v51  ;;  %6065 = vpow2.f32 %v4573_v49 }
 0xc7a   : > { %6067 = vtanh.f32 %v3182_v50  ;;  %v3203_v56 = vadd.f32 1.0, %v6056_v54  ;;  %v6058_v57 = vpop.eup %6057 }
 0xc7b   : > { %6069 = vrcp.f32 %v3191_v53  ;;  %v6060_v60 = vpop.eup %6059  ;;  %v3216_v4 = vadd.f32 1.0, %v6058_v57 }
 0xc7c   : > { %6071 = vrcp.f32 %v3203_v56  ;;  %v4580_v56 = vld [vmem:[%s6886_s29 + $0x320] sm:$0xff] }
 0xc7d   : > { %6073 = vrcp.f32 %v3216_v4  ;;  %v4579_v4 = vld [vmem:[%s6886_s29 + $0x318] sm:$0xff] }
 0xc81   : > { %v6062_v61 = vpop.eup %6061 }
 0xc82   : > { %v6064_v63 = vpop.eup %6063  ;;  %v3226_v2 = vmul.f32 %v6062_v61, %v6060_v60  ;;  %v4581_v60 = vld [vmem:[%s6886_s29 + $0x328] sm:$0xff] }
 0xc83   : > { %v6066_v5 = vpop.eup %6065  ;;  %v3224_v11 = vmul.f32 %v6064_v63, %v7439_v21 }
 0xc84   : > { %v6068_v1 = vpop.eup %6067  ;;  %v3217_v19 = vadd.f32 1.0, %v6066_v5 }
 0xc85   : > { %v6070_v12 = vpop.eup %6069  ;;  %v7493_v28 = vadd.f32 %v3226_v2, %v3224_v11 }
 0xc86   : > { %v6072_v13 = vpop.eup %6071  ;;  %v3227_v16 = vmul.f32 %v6070_v12, %v6068_v1 }
 0xc87   : > { %6075 = vtanh.f32 %v7493_v28  ;;  %v3225_v20 = vmul.f32 %v6072_v13, %v7443_v35  ;;  %v6074_v21 = vpop.eup %6073  ;;  %v4576_v35 = vld [vmem:[%s6886_s29 + $0x300] sm:$0xff] }
 0xc88   : > { %6077 = vrcp.f32 %v3217_v19 }
 0xc89   : > { %v7497_v36 = vadd.f32 %v3227_v16, %v3225_v20  ;;  %v4583_v20 = vld [vmem:[%s6886_s29 + $0x338] sm:$0xff] }
 0xc8b   : > { %6079 = vtanh.f32 %v7497_v36 }
 0xc91   : > { %v6076_v38 = vpop.eup %6075 }
 0xc92   : > { %v3232_v43 = vmul.f32 %v6076_v38, %v6074_v21  ;;  %v6078_v23 = vpop.eup %6077  ;;  %v4578_v21 = vld [vmem:[%s6886_s29 + $0x310] sm:$0xff] }
 0xc94   : > { %4574 = vst [vmem:[%s6904_s3 + $0xb0] sm:$0xff] %v3232_v43  ;;  %3317 = vmatmul.mubr.f32.vlgmr.msra.gmra.mrb[48].mxu0 %v3232_v43  ;;  %3394 = vmatmul.mubr.f32.vlgmr.msra.gmra.mrb[48].mxu1 %v3232_v43 }
 0xc95   : > { %v6080_v29 = vpop.eup %6079  ;;  %3322 = vmatprep.mubr.f32.mxu0 %v6233_v7  ;;  %3399 = vmatprep.mubr.f32.mxu1 %v6233_v7 }
 0xc96   : > { %v3233_v34 = vmul.f32 %v6080_v29, %v6078_v23  ;;  %5483 = vmatpush1.bf16.msra.mxu0 %v6573_v8  ;;  %5515 = vmatpush1.bf16.msra.mxu1 %v6622_v25  ;;  %v4582_v29 = vld [vmem:[%s6886_s29 + $0x330] sm:$0xff] }
 0xc97   : > { %5485 = vmatprep.subr.bf16.mxu0 %v6575_v9  ;;  %5517 = vmatprep.subr.bf16.mxu1 %v6647_v33 }
 0xc98   : > { %4575 = vst [vmem:[%s6904_s3 + $0xb8] sm:$0xff] %v3233_v34  ;;  %3323 = vmatmul.mubr.f32.gmra.mrb[50].mxu0 %v3233_v34  ;;  %3400 = vmatmul.mubr.f32.gmra.mrb[50].mxu1 %v3233_v34 }
 0xc99   : > { %3546 = vmatprep.mubr.f32.mxu0 %v6233_v7  ;;  %3623 = vmatprep.mubr.f32.mxu1 %v6233_v7 }
 0xc9a   : > { %5487 = vmatpush1.bf16.msra.mxu0 %v6591_v14  ;;  %5519 = vmatpush1.bf16.msra.mxu1 %v6658_v37 }
 0xc9b   : > { %5489 = vmatprep.subr.bf16.mxu0 %v6600_v17  ;;  %5521 = vmatprep.subr.bf16.mxu1 %v6682_v45 }
 0xc9e   : > { %5491 = vmatpush1.bf16.msra.mxu0 %v6625_v26  ;;  %5523 = vmatpush1.bf16.msra.mxu1 %v6691_v48 }
 0xc9f   : > { %5493 = vmatprep.subr.bf16.mxu0 %v6638_v30  ;;  %5525 = vmatprep.subr.bf16.mxu1 %v6703_v52 }
 0xca2   : > { %5495 = vmatpush1.bf16.msra.mxu0 %v6674_v42  ;;  %5527 = vmatpush1.bf16.msra.mxu1 %v6733_v62 }
 0xca3   : > { %5497 = vmatprep.subr.bf16.mxu0 %v6685_v46  ;;  %5529 = vmatprep.subr.bf16.mxu1 %v6739_v0 }
 0xca6   : > { %5499 = vmatpush1.bf16.msra.mxu0 %v6712_v55  ;;  %5531 = vmatpush1.bf16.msra.mxu1 %v6769_v15 }
 0xca7   : > { %5501 = vmatprep.subr.bf16.mxu0 %v6721_v58  ;;  %5533 = vmatprep.subr.bf16.mxu1 %v6775_v18 }
 0xcaa   : > { %5503 = vmatpush1.bf16.msra.mxu0 %v6754_v6  ;;  %5535 = vmatpush1.bf16.msra.mxu1 %v6802_v31 }
 0xcab   : > { %5505 = vmatprep.subr.bf16.mxu0 %v6757_v10  ;;  %5537 = vmatprep.subr.bf16.mxu1 %v6805_v32 }
 0xcae   : > { %5507 = vmatpush1.bf16.msra.mxu0 %v6790_v24  ;;  %5539 = vmatpush1.bf16.msra.mxu1 %v6824_v40 }
 0xcaf   : > { %5509 = vmatprep.subr.bf16.mxu0 %v6793_v27  ;;  %5541 = vmatprep.subr.bf16.mxu1 %v6827_v41 }
 0xcb2   : > { %5511 = vmatpush1.bf16.msra.mxu0 %v6820_v39  ;;  %5543 = vmatpush1.bf16.msra.mxu1 %v6837_v47 }
 0xcb3   : > { %5545 = vmatprep.subr.bf16.mxu0 %v6560_v3  ;;  %5577 = vmatprep.subr.bf16.mxu1 %v6614_v22 }
 0xd67   : > { %v3318_v49 = vpop.f32.mrb[48].mxu0  ;;  %v3395_v59 = vpop.f32.mrb[48].mxu1 }
 0xd68   : > { %v3406_v50 = vadd.f32 %v4576_v35, %v3318_v49  ;;  %v3320_v51 = vpop.f32.mrb[49].mxu0  ;;  %v3397_v54 = vpop.f32.mrb[49].mxu1  ;;  %v3408_v23 = vadd.f32 %v4578_v21, %v3395_v59 }
 0xd69   : > { %v3407_v53 = vadd.f32 %v4577_v44, %v3320_v51  ;;  %v3409_v16 = vadd.f32 %v4579_v4, %v3397_v54 }
 0xd6a   : > { %v4584_v57 = vmul.f32 -1.442695, %v3406_v50 }
 0xd6b   : > { %v4586_v61 = vmul.f32 -1.442695, %v3407_v53  ;;  %v3324_v63 = vpop.f32.mrb[50].mxu0  ;;  %v3401_v2 = vpop.f32.mrb[50].mxu1  ;;  %v4588_v38 = vmul.f32 -1.442695, %v3409_v16 }
 0xd6c   : > { %6081 = vpow2.f32 %v4584_v57  ;;  %v3410_v5 = vadd.f32 %v4580_v56, %v3324_v63  ;;  %v3326_v11 = vpop.f32.mrb[51].mxu0  ;;  %v3403_v1 = vpop.f32.mrb[51].mxu1  ;;  %v3412_v51 = vadd.f32 %v4582_v29, %v3401_v2 }
 0xd6d   : > { %6083 = vpow2.f32 %v4586_v61  ;;  %v3411_v12 = vadd.f32 %v4581_v60, %v3326_v11  ;;  %v3413_v43 = vadd.f32 %v4583_v20, %v3403_v1 }
 0xd6e   : > { %v4585_v13 = vmul.f32 -1.442695, %v3410_v5 }
 0xd6f   : > { %v4587_v19 = vmul.f32 -1.442695, %v3411_v12  ;;  %v4589_v49 = vmul.f32 -1.442695, %v3413_v43 }
 0xd70   : > { %6085 = vpow2.f32 %v4585_v13 }
 0xd71   : > { %6087 = vpow2.f32 %v4587_v19 }
 0xd72   : > { %6089 = vpow2.f32 %v4588_v38 }
 0xd73   : > { %6091 = vtanh.f32 %v3408_v23 }
 0xd76   : > { %v6082_v34 = vpop.eup %6081 }
 0xd77   : > { %v6084_v35 = vpop.eup %6083  ;;  %v3420_v44 = vadd.f32 1.0, %v6082_v34 }
 0xd78   : > { %v3432_v50 = vadd.f32 1.0, %v6084_v35 }
 0xd79   : > { %6093 = vrcp.f32 %v3420_v44  ;;  %v4593_v44 = vld [vmem:[%s6886_s29 + $0x348] sm:$0xff] }
 0xd7a   : > { %v6086_v53 = vpop.eup %6085  ;;  %6095 = vrcp.f32 %v3432_v50 }
 0xd7b   : > { %v6088_v54 = vpop.eup %6087  ;;  %v3421_v56 = vadd.f32 1.0, %v6086_v53  ;;  %6097 = vpow2.f32 %v4589_v49 }
 0xd7c   : > { %6099 = vtanh.f32 %v3412_v51  ;;  %v3433_v57 = vadd.f32 1.0, %v6088_v54  ;;  %v6090_v59 = vpop.eup %6089 }
 0xd7d   : > { %6101 = vrcp.f32 %v3421_v56  ;;  %v6092_v60 = vpop.eup %6091  ;;  %v3446_v5 = vadd.f32 1.0, %v6090_v59 }
 0xd7e   : > { %6103 = vrcp.f32 %v3433_v57  ;;  %v4596_v57 = vld [vmem:[%s6886_s29 + $0x360] sm:$0xff] }
 0xd7f   : > { %6105 = vrcp.f32 %v3446_v5 }
 0xd83   : > { %v6094_v61 = vpop.eup %6093 }
 0xd84   : > { %v6096_v63 = vpop.eup %6095  ;;  %v3456_v4 = vmul.f32 %v6094_v61, %v6092_v60  ;;  %v4597_v60 = vld [vmem:[%s6886_s29 + $0x368] sm:$0xff] }
 0xd85   : > { %v6098_v11 = vpop.eup %6097  ;;  %v3454_v1 = vmul.f32 %v6096_v63, %v7493_v28 }
 0xd86   : > { %v6100_v2 = vpop.eup %6099  ;;  %v3447_v20 = vadd.f32 1.0, %v6098_v11 }
 0xd87   : > { %v6102_v12 = vpop.eup %6101  ;;  %v7547_v13 = vadd.f32 %v3456_v4, %v3454_v1 }
 0xd88   : > { %v6104_v16 = vpop.eup %6103  ;;  %v3457_v19 = vmul.f32 %v6102_v12, %v6100_v2 }
 0xd89   : > { %6107 = vtanh.f32 %v7547_v13  ;;  %v3455_v21 = vmul.f32 %v6104_v16, %v7497_v36  ;;  %v6106_v28 = vpop.eup %6105  ;;  %v4592_v36 = vld [vmem:[%s6886_s29 + $0x340] sm:$0xff] }
 0xd8a   : > { %6109 = vrcp.f32 %v3447_v20  ;;  %v4594_v20 = vld [vmem:[%s6886_s29 + $0x350] sm:$0xff] }
 0xd8b   : > { %v7551_v38 = vadd.f32 %v3457_v19, %v3455_v21  ;;  %v4599_v19 = vld [vmem:[%s6886_s29 + $0x378] sm:$0xff] }
 0xd8d   : > { %6111 = vtanh.f32 %v7551_v38 }
 0xd93   : > { %v6108_v43 = vpop.eup %6107 }
 0xd94   : > { %v3462_v23 = vmul.f32 %v6108_v43, %v6106_v28  ;;  %v6110_v29 = vpop.eup %6109 }
 0xd96   : > { %4590 = vst [vmem:[%s6904_s3 + $0xc0] sm:$0xff] %v3462_v23  ;;  %3547 = vmatmul.mubr.f32.vlgmr.msra.gmra.mrb[52].mxu0 %v3462_v23  ;;  %3624 = vmatmul.mubr.f32.vlgmr.msra.gmra.mrb[52].mxu1 %v3462_v23  ;;  %v4598_v23 = vld [vmem:[%s6886_s29 + $0x370] sm:$0xff] }
 0xd97   : > { %v6112_v34 = vpop.eup %6111  ;;  %3552 = vmatprep.mubr.f32.mxu0 %v6233_v7  ;;  %3629 = vmatprep.mubr.f32.mxu1 %v6233_v7 }
 0xd98   : > { %v3463_v35 = vmul.f32 %v6112_v34, %v6110_v29  ;;  %5547 = vmatpush1.bf16.msra.mxu0 %v6573_v8  ;;  %5579 = vmatpush1.bf16.msra.mxu1 %v6622_v25 }
 0xd99   : > { %5549 = vmatprep.subr.bf16.mxu0 %v6575_v9  ;;  %5581 = vmatprep.subr.bf16.mxu1 %v6647_v33 }
 0xd9a   : > { %4591 = vst [vmem:[%s6904_s3 + $0xc8] sm:$0xff] %v3463_v35  ;;  %3553 = vmatmul.mubr.f32.gmra.mrb[54].mxu0 %v3463_v35  ;;  %3630 = vmatmul.mubr.f32.gmra.mrb[54].mxu1 %v3463_v35 }
 0xd9b   : > { %3776 = vmatprep.mubr.f32.mxu0 %v6233_v7  ;;  %3853 = vmatprep.mubr.f32.mxu1 %v6233_v7 }
 0xd9c   : > { %5551 = vmatpush1.bf16.msra.mxu0 %v6591_v14  ;;  %5583 = vmatpush1.bf16.msra.mxu1 %v6658_v37 }
 0xd9d   : > { %5553 = vmatprep.subr.bf16.mxu0 %v6600_v17  ;;  %5585 = vmatprep.subr.bf16.mxu1 %v6682_v45 }
 0xda0   : > { %5555 = vmatpush1.bf16.msra.mxu0 %v6625_v26  ;;  %5587 = vmatpush1.bf16.msra.mxu1 %v6691_v48 }
 0xda1   : > { %5557 = vmatprep.subr.bf16.mxu0 %v6638_v30  ;;  %5589 = vmatprep.subr.bf16.mxu1 %v6703_v52 }
 0xda4   : > { %5559 = vmatpush1.bf16.msra.mxu0 %v6674_v42  ;;  %5591 = vmatpush1.bf16.msra.mxu1 %v6733_v62 }
 0xda5   : > { %5561 = vmatprep.subr.bf16.mxu0 %v6685_v46  ;;  %5593 = vmatprep.subr.bf16.mxu1 %v6739_v0 }
 0xda8   : > { %5563 = vmatpush1.bf16.msra.mxu0 %v6712_v55  ;;  %5595 = vmatpush1.bf16.msra.mxu1 %v6769_v15 }
 0xda9   : > { %5565 = vmatprep.subr.bf16.mxu0 %v6721_v58  ;;  %5597 = vmatprep.subr.bf16.mxu1 %v6775_v18 }
 0xdac   : > { %5567 = vmatpush1.bf16.msra.mxu0 %v6754_v6  ;;  %5599 = vmatpush1.bf16.msra.mxu1 %v6802_v31 }
 0xdad   : > { %5569 = vmatprep.subr.bf16.mxu0 %v6757_v10  ;;  %5601 = vmatprep.subr.bf16.mxu1 %v6805_v32 }
 0xdb0   : > { %5571 = vmatpush1.bf16.msra.mxu0 %v6790_v24  ;;  %5603 = vmatpush1.bf16.msra.mxu1 %v6824_v40 }
 0xdb1   : > { %5573 = vmatprep.subr.bf16.mxu0 %v6793_v27  ;;  %5605 = vmatprep.subr.bf16.mxu1 %v6827_v41 }
 0xdb4   : > { %5575 = vmatpush1.bf16.msra.mxu0 %v6820_v39  ;;  %5607 = vmatpush1.bf16.msra.mxu1 %v6837_v47 }
 0xdb5   : > { %5609 = vmatprep.subr.bf16.mxu0 %v6560_v3  ;;  %5641 = vmatprep.subr.bf16.mxu1 %v6614_v22  ;;  %v4595_v3 = vld [vmem:[%s6886_s29 + $0x358] sm:$0xff] }
 0xe69   : > { %v3548_v49 = vpop.f32.mrb[52].mxu0  ;;  %v3625_v50 = vpop.f32.mrb[52].mxu1 }
 0xe6a   : > { %v3636_v51 = vadd.f32 %v4592_v36, %v3548_v49  ;;  %v3550_v53 = vpop.f32.mrb[53].mxu0  ;;  %v3627_v54 = vpop.f32.mrb[53].mxu1  ;;  %v3638_v43 = vadd.f32 %v4594_v20, %v3625_v50 }
 0xe6b   : > { %v3637_v56 = vadd.f32 %v4593_v44, %v3550_v53  ;;  %v3639_v12 = vadd.f32 %v4595_v3, %v3627_v54 }
 0xe6c   : > { %v4600_v59 = vmul.f32 -1.442695, %v3636_v51 }
 0xe6d   : > { %v4602_v61 = vmul.f32 -1.442695, %v3637_v56  ;;  %v3554_v63 = vpop.f32.mrb[54].mxu0  ;;  %v3631_v4 = vpop.f32.mrb[54].mxu1  ;;  %v4604_v21 = vmul.f32 -1.442695, %v3639_v12 }
 0xe6e   : > { %6113 = vpow2.f32 %v4600_v59  ;;  %v3640_v22 = vadd.f32 %v4596_v57, %v3554_v63  ;;  %v3556_v5 = vpop.f32.mrb[55].mxu0  ;;  %v3633_v11 = vpop.f32.mrb[55].mxu1  ;;  %v3642_v49 = vadd.f32 %v4598_v23, %v3631_v4 }
 0xe6f   : > { %6115 = vpow2.f32 %v4602_v61  ;;  %v3641_v1 = vadd.f32 %v4597_v60, %v3556_v5  ;;  %v3643_v28 = vadd.f32 %v4599_v19, %v3633_v11 }
 0xe70   : > { %v4601_v2 = vmul.f32 -1.442695, %v3640_v22 }
 0xe71   : > { %v4603_v16 = vmul.f32 -1.442695, %v3641_v1  ;;  %v4605_v36 = vmul.f32 -1.442695, %v3643_v28 }
 0xe72   : > { %6117 = vpow2.f32 %v4601_v2 }
 0xe73   : > { %6119 = vpow2.f32 %v4603_v16 }
 0xe74   : > { %6121 = vpow2.f32 %v4604_v21 }
 0xe75   : > { %6123 = vtanh.f32 %v3638_v43 }
 0xe78   : > { %v6114_v29 = vpop.eup %6113 }
 0xe79   : > { %v6116_v34 = vpop.eup %6115  ;;  %v3650_v35 = vadd.f32 1.0, %v6114_v29 }
 0xe7a   : > { %v3662_v44 = vadd.f32 1.0, %v6116_v34 }
 0xe7b   : > { %6125 = vrcp.f32 %v3650_v35 }
 0xe7c   : > { %v6118_v51 = vpop.eup %6117  ;;  %6127 = vrcp.f32 %v3662_v44 }
 0xe7d   : > { %v6120_v53 = vpop.eup %6119  ;;  %v3651_v54 = vadd.f32 1.0, %v6118_v51  ;;  %6129 = vpow2.f32 %v4605_v36 }
 0xe7e   : > { %6131 = vtanh.f32 %v3642_v49  ;;  %v3663_v56 = vadd.f32 1.0, %v6120_v53  ;;  %v6122_v50 = vpop.eup %6121 }
 0xe7f   : > { %6133 = vrcp.f32 %v3651_v54  ;;  %v6124_v57 = vpop.eup %6123  ;;  %v3676_v63 = vadd.f32 1.0, %v6122_v50 }
 0xe80   : > { %6135 = vrcp.f32 %v3663_v56 }
 0xe81   : > { %6137 = vrcp.f32 %v3676_v63 }
 0xe85   : > { %v6126_v59 = vpop.eup %6125 }
 0xe86   : > { %v6128_v60 = vpop.eup %6127  ;;  %v3686_v61 = vmul.f32 %v6126_v59, %v6124_v57 }
 0xe87   : > { %v6130_v3 = vpop.eup %6129  ;;  %v3684_v22 = vmul.f32 %v6128_v60, %v7547_v13 }
 0xe88   : > { %v6132_v4 = vpop.eup %6131  ;;  %v3677_v12 = vadd.f32 1.0, %v6130_v3 }
 0xe89   : > { %v6134_v5 = vpop.eup %6133  ;;  %v7601_v11 = vadd.f32 %v3686_v61, %v3684_v22 }
 0xe8a   : > { %v6136_v1 = vpop.eup %6135  ;;  %v3687_v2 = vmul.f32 %v6134_v5, %v6132_v4 }
 0xe8b   : > { %6139 = vtanh.f32 %v7601_v11  ;;  %v3685_v16 = vmul.f32 %v6136_v1, %v7551_v38  ;;  %v6138_v13 = vpop.eup %6137 }
 0xe8c   : > { %6141 = vrcp.f32 %v3677_v12 }
 0xe8d   : > { %v7605_v19 = vadd.f32 %v3687_v2, %v3685_v16 }
 0xe8f   : > { %6143 = vtanh.f32 %v7605_v19 }
 0xe95   : > { %v6140_v20 = vpop.eup %6139 }
 0xe96   : > { %v3692_v21 = vmul.f32 %v6140_v20, %v6138_v13  ;;  %v6142_v28 = vpop.eup %6141 }
 0xe98   : > { %4606 = vst [vmem:[%s6904_s3 + $0xd0] sm:$0xff] %v3692_v21  ;;  %3777 = vmatmul.mubr.f32.vlgmr.msra.gmra.mrb[56].mxu0 %v3692_v21  ;;  %3854 = vmatmul.mubr.f32.vlgmr.msra.gmra.mrb[56].mxu1 %v3692_v21 }
 0xe99   : > { %v6144_v43 = vpop.eup %6143  ;;  %3782 = vmatprep.mubr.f32.mxu0 %v6233_v7  ;;  %3859 = vmatprep.mubr.f32.mxu1 %v6233_v7 }
 0xe9a   : > { %v3693_v23 = vmul.f32 %v6144_v43, %v6142_v28  ;;  %5611 = vmatpush1.bf16.msra.mxu0 %v6573_v8  ;;  %5643 = vmatpush1.bf16.msra.mxu1 %v6622_v25  ;;  %v4608_v8 = vld [vmem:[%s6886_s29 + $0x380] sm:$0xff]  ;;  %v4625_v43 = vld [vmem:[%s6886_s29 + $0x3c8] sm:$0xff] }
 0xe9b   : > { %5613 = vmatprep.subr.bf16.mxu0 %v6575_v9  ;;  %5645 = vmatprep.subr.bf16.mxu1 %v6647_v33  ;;  %v4609_v9 = vld [vmem:[%s6886_s29 + $0x388] sm:$0xff]  ;;  %v4624_v28 = vld [vmem:[%s6886_s29 + $0x3c0] sm:$0xff] }
 0xe9c   : > { %4607 = vst [vmem:[%s6904_s3 + $0xd8] sm:$0xff] %v3693_v23  ;;  %3783 = vmatmul.mubr.f32.gmra.mrb[58].mxu0 %v3693_v23  ;;  %3860 = vmatmul.mubr.f32.gmra.mrb[58].mxu1 %v3693_v23 }
 0xe9d   : > { %4006 = vmatprep.mubr.f32.mxu0 %v6233_v7  ;;  %4083 = vmatprep.mubr.f32.mxu1 %v6233_v7 }
 0xe9e   : > { %5615 = vmatpush1.bf16.msra.mxu0 %v6591_v14  ;;  %5647 = vmatpush1.bf16.msra.mxu1 %v6658_v37  ;;  %v4612_v37 = vld [vmem:[%s6886_s29 + $0x3a0] sm:$0xff] }
 0xe9f   : > { %5617 = vmatprep.subr.bf16.mxu0 %v6600_v17  ;;  %5649 = vmatprep.subr.bf16.mxu1 %v6682_v45  ;;  %v4613_v45 = vld [vmem:[%s6886_s29 + $0x3a8] sm:$0xff] }
 0xea2   : > { %5619 = vmatpush1.bf16.msra.mxu0 %v6625_v26  ;;  %5651 = vmatpush1.bf16.msra.mxu1 %v6691_v48 }
 0xea3   : > { %5621 = vmatprep.subr.bf16.mxu0 %v6638_v30  ;;  %5653 = vmatprep.subr.bf16.mxu1 %v6703_v52 }
 0xea6   : > { %5623 = vmatpush1.bf16.msra.mxu0 %v6674_v42  ;;  %5655 = vmatpush1.bf16.msra.mxu1 %v6733_v62 }
 0xea7   : > { %5625 = vmatprep.subr.bf16.mxu0 %v6685_v46  ;;  %5657 = vmatprep.subr.bf16.mxu1 %v6739_v0 }
 0xeaa   : > { %5627 = vmatpush1.bf16.msra.mxu0 %v6712_v55  ;;  %5659 = vmatpush1.bf16.msra.mxu1 %v6769_v15  ;;  %v4611_v55 = vld [vmem:[%s6886_s29 + $0x398] sm:$0xff] }
 0xeab   : > { %5629 = vmatprep.subr.bf16.mxu0 %v6721_v58  ;;  %5661 = vmatprep.subr.bf16.mxu1 %v6775_v18 }
 0xeae   : > { %5631 = vmatpush1.bf16.msra.mxu0 %v6754_v6  ;;  %5663 = vmatpush1.bf16.msra.mxu1 %v6802_v31 }
 0xeaf   : > { %5633 = vmatprep.subr.bf16.mxu0 %v6757_v10  ;;  %5665 = vmatprep.subr.bf16.mxu1 %v6805_v32 }
 0xeb2   : > { %5635 = vmatpush1.bf16.msra.mxu0 %v6790_v24  ;;  %5667 = vmatpush1.bf16.msra.mxu1 %v6824_v40  ;;  %v4615_v24 = vld [vmem:[%s6886_s29 + $0x3b8] sm:$0xff]  ;;  %v4614_v40 = vld [vmem:[%s6886_s29 + $0x3b0] sm:$0xff] }
 0xeb3   : > { %5637 = vmatprep.subr.bf16.mxu0 %v6793_v27  ;;  %5669 = vmatprep.subr.bf16.mxu1 %v6827_v41  ;;  %v4610_v27 = vld [vmem:[%s6886_s29 + $0x390] sm:$0xff] }
 0xeb6   : > { %5639 = vmatpush1.bf16.msra.mxu0 %v6820_v39  ;;  %5671 = vmatpush1.bf16.msra.mxu1 %v6837_v47 }
 0xf6b   : > { %v3778_v14 = vpop.f32.mrb[56].mxu0  ;;  %v3855_v17 = vpop.f32.mrb[56].mxu1 }
 0xf6c   : > { %v3866_v25 = vadd.f32 %v4608_v8, %v3778_v14  ;;  %v3780_v26 = vpop.f32.mrb[57].mxu0  ;;  %v3857_v30 = vpop.f32.mrb[57].mxu1  ;;  %v3868_v39 = vadd.f32 %v4610_v27, %v3855_v17  ;;  %v4630_v27 = vld [vmem:[%s6886_s29 + $0x3f0] sm:$0xff] }
 0xf6d   : > { %v3867_v33 = vadd.f32 %v4609_v9, %v3780_v26  ;;  %v3869_v15 = vadd.f32 %v4611_v55, %v3857_v30  ;;  %v4628_v26 = vld [vmem:[%s6886_s29 + $0x3e0] sm:$0xff] }
 0xf6e   : > { %v4616_v42 = vmul.f32 -1.442695, %v3866_v25 }
 0xf6f   : > { %v4618_v46 = vmul.f32 -1.442695, %v3867_v33  ;;  %v3784_v48 = vpop.f32.mrb[58].mxu0  ;;  %v3861_v52 = vpop.f32.mrb[58].mxu1  ;;  %v4620_v31 = vmul.f32 -1.442695, %v3869_v15 }
 0xf70   : > { %6145 = vpow2.f32 %v4616_v42  ;;  %v3870_v58 = vadd.f32 %v4612_v37, %v3784_v48  ;;  %v3786_v62 = vpop.f32.mrb[59].mxu0  ;;  %v3863_v0 = vpop.f32.mrb[59].mxu1  ;;  %v3872_v35 = vadd.f32 %v4614_v40, %v3861_v52  ;;  %v4629_v33 = vld [vmem:[%s6886_s29 + $0x3e8] sm:$0xff] }
 0xf71   : > { %6147 = vpow2.f32 %v4618_v46  ;;  %v3871_v6 = vadd.f32 %v4613_v45, %v3786_v62  ;;  %v3873_v32 = vadd.f32 %v4615_v24, %v3863_v0  ;;  %v4627_v45 = vld [vmem:[%s6886_s29 + $0x3d8] sm:$0xff] }
 0xf72   : > { %v4617_v10 = vmul.f32 -1.442695, %v3870_v58 }
 0xf73   : > { %v4619_v18 = vmul.f32 -1.442695, %v3871_v6  ;;  %v4621_v29 = vmul.f32 -1.442695, %v3873_v32  ;;  %v4631_v6 = vld [vmem:[%s6886_s29 + $0x3f8] sm:$0xff] }
 0xf74   : > { %6149 = vpow2.f32 %v4617_v10  ;;  %v4626_v10 = vld [vmem:[%s6886_s29 + $0x3d0] sm:$0xff] }
 0xf75   : > { %6151 = vpow2.f32 %v4619_v18 }
 0xf76   : > { %6153 = vpow2.f32 %v4620_v31 }
 0xf77   : > { %6155 = vtanh.f32 %v3868_v39 }
 0xf7a   : > { %v6146_v41 = vpop.eup %6145 }
 0xf7b   : > { %v6148_v47 = vpop.eup %6147  ;;  %v3880_v38 = vadd.f32 1.0, %v6146_v41 }
 0xf7c   : > { %v3892_v34 = vadd.f32 1.0, %v6148_v47 }
 0xf7d   : > { %6157 = vrcp.f32 %v3880_v38 }
 0xf7e   : > { %v6150_v36 = vpop.eup %6149  ;;  %6159 = vrcp.f32 %v3892_v34 }
 0xf7f   : > { %v6152_v44 = vpop.eup %6151  ;;  %v3881_v49 = vadd.f32 1.0, %v6150_v36  ;;  %6161 = vpow2.f32 %v4621_v29 }
 0xf80   : > { %6163 = vtanh.f32 %v3872_v35  ;;  %v3893_v51 = vadd.f32 1.0, %v6152_v44  ;;  %v6154_v53 = vpop.eup %6153 }
 0xf81   : > { %6165 = vrcp.f32 %v3881_v49  ;;  %v6156_v54 = vpop.eup %6155  ;;  %v3906_v59 = vadd.f32 1.0, %v6154_v53 }
 0xf82   : > { %6167 = vrcp.f32 %v3893_v51 }
 0xf83   : > { %6169 = vrcp.f32 %v3906_v59 }
 0xf87   : > { %v6158_v56 = vpop.eup %6157 }
 0xf88   : > { %v6160_v50 = vpop.eup %6159  ;;  %v3916_v57 = vmul.f32 %v6158_v56, %v6156_v54 }
 0xf89   : > { %v6162_v60 = vpop.eup %6161  ;;  %v3914_v61 = vmul.f32 %v6160_v50, %v7601_v11 }
 0xf8a   : > { %v6164_v63 = vpop.eup %6163  ;;  %v3907_v1 = vadd.f32 1.0, %v6162_v60 }
 0xf8b   : > { %v6166_v3 = vpop.eup %6165  ;;  %v7653_v22 = vadd.f32 %v3916_v57, %v3914_v61 }
 0xf8c   : > { %v6168_v4 = vpop.eup %6167  ;;  %v3917_v5 = vmul.f32 %v6166_v3, %v6164_v63 }
 0xf8d   : > { %6171 = vtanh.f32 %v7653_v22  ;;  %v3915_v2 = vmul.f32 %v6168_v4, %v7605_v19  ;;  %v6170_v11 = vpop.eup %6169 }
 0xf8e   : > { %6173 = vrcp.f32 %v3907_v1 }
 0xf8f   : > { %v7657_v12 = vadd.f32 %v3917_v5, %v3915_v2 }
 0xf91   : > { %6175 = vtanh.f32 %v7657_v12 }
 0xf97   : > { %v6172_v16 = vpop.eup %6171 }
 0xf98   : > { %v3922_v13 = vmul.f32 %v6172_v16, %v6170_v11  ;;  %v6174_v20 = vpop.eup %6173 }
 0xf9a   : > { %4622 = vst [vmem:[%s6904_s3 + $0xe0] sm:$0xff] %v3922_v13  ;;  %4007 = vmatmul.mubr.f32.vlgmr.msra.gmra.mrb[60].mxu0 %v3922_v13  ;;  %4084 = vmatmul.mubr.f32.vlgmr.msra.gmra.mrb[60].mxu1 %v3922_v13 }
 0xf9b   : > { %v6176_v21 = vpop.eup %6175  ;;  %4012 = vmatprep.mubr.f32.mxu0 %v6233_v7  ;;  %4089 = vmatprep.mubr.f32.mxu1 %v6233_v7 }
 0xf9c   : > { %v3923_v19 = vmul.f32 %v6176_v21, %v6174_v20  ;;  %v4262_v20 = vld [vmem:[%s6904_s3 + $0x8] sm:$0xff] (%p6279_p5)  ;;  %v4264_v21 = vld [vmem:[%s6904_s3 + $0x10] sm:$0xff] (%p6279_p5) }
 0xf9d   : > { %4263 = vst [vmem:[%s7686_s17 + $0x8] sm:$0xff] (%p6279_p5), %v4262_v20  ;;  %4265 = vst [vmem:[%s7686_s17 + $0x20] sm:$0xff] (%p6279_p5), %v4264_v21 }
 0xf9e   : > { %4623 = vst [vmem:[%s6904_s3 + $0xe8] sm:$0xff] %v3923_v19  ;;  %4013 = vmatmul.mubr.f32.gmra.mrb[62].mxu0 %v3923_v19  ;;  %4090 = vmatmul.mubr.f32.gmra.mrb[62].mxu1 %v3923_v19  ;;  %v4266_v19 = vld [vmem:[%s6904_s3 + $0x18] sm:$0xff] (%p6279_p5) }
 0xf9f   : > { %4267 = vst [vmem:[%s7686_s17 + $0x28] sm:$0xff] (%p6279_p5), %v4266_v19 }
0x106d   : > { %v4008_v23 = vpop.f32.mrb[60].mxu0  ;;  %v4085_v8 = vpop.f32.mrb[60].mxu1 }
0x106e   : > { %v4096_v9 = vadd.f32 %v4624_v28, %v4008_v23  ;;  %v4010_v14 = vpop.f32.mrb[61].mxu0  ;;  %v4087_v17 = vpop.f32.mrb[61].mxu1  ;;  %v4098_v24 = vadd.f32 %v4626_v10, %v4085_v8  ;;  %v4268_v28 = vld [vmem:[%s6904_s3 + $0x20] sm:$0xff] (%p6279_p5)  ;;  %v4272_v23 = vld [vmem:[%s6904_s3 + $0x30] sm:$0xff] (%p6279_p5)  ;;  %v4274_v8 = vld [vmem:[%s6904_s3 + $0x38] sm:$0xff] (%p6279_p5) }
0x106f   : > { %v4097_v25 = vadd.f32 %v4625_v43, %v4010_v14  ;;  %v4099_v62 = vadd.f32 %v4627_v45, %v4087_v17  ;;  %v4270_v43 = vld [vmem:[%s6904_s3 + $0x28] sm:$0xff] (%p6279_p5)  ;;  %4269 = vst [vmem:[%s7686_s17 + $0x40] sm:$0xff] (%p6279_p5), %v4268_v28  ;;  %4273 = vst [vmem:[%s7686_s17 + $0x60] sm:$0xff] (%p6279_p5), %v4272_v23  ;;  %v4280_v17 = vld [vmem:[%s6904_s3 + $0x50] sm:$0xff] (%p6279_p5) }
0x1070   : > { %v4632_v30 = vmul.f32 -1.442695, %v4096_v9  ;;  %4271 = vst [vmem:[%s7686_s17 + $0x48] sm:$0xff] (%p6279_p5), %v4270_v43  ;;  %v4276_v9 = vld [vmem:[%s6904_s3 + $0x40] sm:$0xff] (%p6279_p5)  ;;  %4275 = vst [vmem:[%s7686_s17 + $0x68] sm:$0xff] (%p6279_p5), %v4274_v8  ;;  %v4278_v14 = vld [vmem:[%s6904_s3 + $0x48] sm:$0xff] (%p6279_p5) }
0x1071   : > { %v4634_v37 = vmul.f32 -1.442695, %v4097_v25  ;;  %v4014_v7 = vpop.f32.mrb[62].mxu0  ;;  %v4091_v42 = vpop.f32.mrb[62].mxu1  ;;  %v4636_v15 = vmul.f32 -1.442695, %v4099_v62 }
0x1072   : > { %6177 = vpow2.f32 %v4632_v30  ;;  %v4100_v46 = vadd.f32 %v4628_v26, %v4014_v7  ;;  %v4016_v48 = vpop.f32.mrb[63].mxu0  ;;  %v4093_v52 = vpop.f32.mrb[63].mxu1  ;;  %v4102_v47 = vadd.f32 %v4630_v27, %v4091_v42  ;;  %4277 = vst [vmem:[%s7686_s17 + $0x80] sm:$0xff] (%p6279_p5), %v4276_v9  ;;  %v4282_v25 = vld [vmem:[%s6904_s3 + $0x58] sm:$0xff] (%p6279_p5)  ;;  %4279 = vst [vmem:[%s7686_s17 + $0x88] sm:$0xff] (%p6279_p5), %v4278_v14  ;;  %v4284_v26 = vld [vmem:[%s6904_s3 + $0x60] sm:$0xff] (%p6279_p5) }
0x1073   : > { %6179 = vpow2.f32 %v4634_v37  ;;  %v4101_v55 = vadd.f32 %v4629_v33, %v4016_v48  ;;  %v4103_v18 = vadd.f32 %v4631_v6, %v4093_v52  ;;  %4281 = vst [vmem:[%s7686_s17 + $0xa0] sm:$0xff] (%p6279_p5), %v4280_v17  ;;  %4283 = vst [vmem:[%s7686_s17 + $0xa8] sm:$0xff] (%p6279_p5), %v4282_v25  ;;  %v4286_v30 = vld [vmem:[%s6904_s3 + $0x68] sm:$0xff] (%p6279_p5)  ;;  %v4288_v33 = vld [vmem:[%s6904_s3 + $0x70] sm:$0xff] (%p6279_p5) }
0x1074   : > { %v4633_v58 = vmul.f32 -1.442695, %v4100_v46  ;;  %4285 = vst [vmem:[%s7686_s17 + $0xc0] sm:$0xff] (%p6279_p5), %v4284_v26  ;;  %4287 = vst [vmem:[%s7686_s17 + $0xc8] sm:$0xff] (%p6279_p5), %v4286_v30  ;;  %v4290_v37 = vld [vmem:[%s6904_s3 + $0x78] sm:$0xff] (%p6279_p5)  ;;  %v4292_v7 = vld [vmem:[%s6904_s3 + $0x80] sm:$0xff] (%p6279_p5) }
0x1075   : > { %v4635_v0 = vmul.f32 -1.442695, %v4101_v55  ;;  %v4637_v40 = vmul.f32 -1.442695, %v4103_v18  ;;  %4289 = vst [vmem:[%s7686_s17 + $0xe0] sm:$0xff] (%p6279_p5), %v4288_v33  ;;  %v4294_v42 = vld [vmem:[%s6904_s3 + $0x88] sm:$0xff] (%p6279_p5) }
0x1076   : > { %6181 = vpow2.f32 %v4633_v58  ;;  %4291 = vst [vmem:[%s7686_s17 + $0xe8] sm:$0xff] (%p6279_p5), %v4290_v37  ;;  %4293 = vst [vmem:[%s7686_s17 + $0x100] sm:$0xff] (%p6279_p5), %v4292_v7  ;;  %v4296_v45 = vld [vmem:[%s6904_s3 + $0x90] sm:$0xff] (%p6279_p5)  ;;  %v4298_v46 = vld [vmem:[%s6904_s3 + $0x98] sm:$0xff] (%p6279_p5) }
0x1077   : > { %6183 = vpow2.f32 %v4635_v0  ;;  %4295 = vst [vmem:[%s7686_s17 + $0x108] sm:$0xff] (%p6279_p5), %v4294_v42  ;;  %v4300_v48 = vld [vmem:[%s6904_s3 + $0xa0] sm:$0xff] (%p6279_p5)  ;;  %4297 = vst [vmem:[%s7686_s17 + $0x120] sm:$0xff] (%p6279_p5), %v4296_v45  ;;  %v4302_v52 = vld [vmem:[%s6904_s3 + $0xa8] sm:$0xff] (%p6279_p5) }
0x1078   : > { %6185 = vpow2.f32 %v4636_v15  ;;  %4299 = vst [vmem:[%s7686_s17 + $0x128] sm:$0xff] (%p6279_p5), %v4298_v46  ;;  %4301 = vst [vmem:[%s7686_s17 + $0x140] sm:$0xff] (%p6279_p5), %v4300_v48  ;;  %v4304_v55 = vld [vmem:[%s6904_s3 + $0xb0] sm:$0xff] (%p6279_p5)  ;;  %v4306_v58 = vld [vmem:[%s6904_s3 + $0xb8] sm:$0xff] (%p6279_p5) }
0x1079   : > { %6187 = vtanh.f32 %v4098_v24  ;;  %4303 = vst [vmem:[%s7686_s17 + $0x148] sm:$0xff] (%p6279_p5), %v4302_v52  ;;  %4305 = vst [vmem:[%s7686_s17 + $0x160] sm:$0xff] (%p6279_p5), %v4304_v55  ;;  %v4308_v62 = vld [vmem:[%s6904_s3 + $0xc0] sm:$0xff] (%p6279_p5)  ;;  %v4310_v0 = vld [vmem:[%s6904_s3 + $0xc8] sm:$0xff] (%p6279_p5) }
0x107a   : > { %4307 = vst [vmem:[%s7686_s17 + $0x168] sm:$0xff] (%p6279_p5), %v4306_v58  ;;  %v4312_v6 = vld [vmem:[%s6904_s3 + $0xd0] sm:$0xff] (%p6279_p5)  ;;  %4309 = vst [vmem:[%s7686_s17 + $0x180] sm:$0xff] (%p6279_p5), %v4308_v62  ;;  %v4314_v10 = vld [vmem:[%s6904_s3 + $0xd8] sm:$0xff] (%p6279_p5) }
0x107b   : > { %4311 = vst [vmem:[%s7686_s17 + $0x188] sm:$0xff] (%p6279_p5), %v4310_v0  ;;  %4313 = vst [vmem:[%s7686_s17 + $0x1a0] sm:$0xff] (%p6279_p5), %v4312_v6  ;;  %v4316_v15 = vld [vmem:[%s6904_s3 + $0xe0] sm:$0xff] (%p6279_p5)  ;;  %v4318_v18 = vld [vmem:[%s6904_s3 + $0xe8] sm:$0xff] (%p6279_p5) }
0x107c   : > { %v6178_v31 = vpop.eup %6177  ;;  %4315 = vst [vmem:[%s7686_s17 + $0x1a8] sm:$0xff] (%p6279_p5), %v4314_v10  ;;  %4317 = vst [vmem:[%s7686_s17 + $0x1c0] sm:$0xff] (%p6279_p5), %v4316_v15 }
0x107d   : > { %v6180_v32 = vpop.eup %6179  ;;  %v4110_v39 = vadd.f32 1.0, %v6178_v31  ;;  %4319 = vst [vmem:[%s7686_s17 + $0x1c8] sm:$0xff] (%p6279_p5), %v4318_v18 }
0x107e   : > { %v4122_v41 = vadd.f32 1.0, %v6180_v32 }
0x107f   : > { %6189 = vrcp.f32 %v4110_v39 }
0x1080   : > { %v6182_v38 = vpop.eup %6181  ;;  %6191 = vrcp.f32 %v4122_v41 }
0x1081   : > { %v6184_v29 = vpop.eup %6183  ;;  %v4111_v34 = vadd.f32 1.0, %v6182_v38  ;;  %6193 = vpow2.f32 %v4637_v40 }
0x1082   : > { %6195 = vtanh.f32 %v4102_v47  ;;  %v4123_v35 = vadd.f32 1.0, %v6184_v29  ;;  %v6186_v36 = vpop.eup %6185 }
0x1083   : > { %6197 = vrcp.f32 %v4111_v34  ;;  %v6188_v44 = vpop.eup %6187  ;;  %v4136_v54 = vadd.f32 1.0, %v6186_v36 }
0x1084   : > { %6199 = vrcp.f32 %v4123_v35 }
0x1085   : > { %6201 = vrcp.f32 %v4136_v54 }
0x1089   : > { %v6190_v49 = vpop.eup %6189 }
0x108a   : > { %v6192_v51 = vpop.eup %6191  ;;  %v4146_v53 = vmul.f32 %v6190_v49, %v6188_v44 }
0x108b   : > { %v6194_v56 = vpop.eup %6193  ;;  %v4144_v50 = vmul.f32 %v6192_v51, %v7653_v22 }
0x108c   : > { %v6196_v57 = vpop.eup %6195  ;;  %v4137_v3 = vadd.f32 1.0, %v6194_v56 }
0x108d   : > { %v6198_v59 = vpop.eup %6197  ;;  %v4148_v60 = vadd.f32 %v4146_v53, %v4144_v50 }
0x108e   : > { %v6200_v61 = vpop.eup %6199  ;;  %v4147_v63 = vmul.f32 %v6198_v59, %v6196_v57 }
0x108f   : > { %6203 = vtanh.f32 %v4148_v60  ;;  %v4145_v4 = vmul.f32 %v6200_v61, %v7657_v12  ;;  %v6202_v1 = vpop.eup %6201  ;;  %v4260_v12 = vld [vmem:[%s6904_s3] sm:$0xff] (%p6279_p5) }
0x1090   : > { %6205 = vrcp.f32 %v4137_v3  ;;  %4261 = vst [vmem:[%s7686_s17] sm:$0xff] (%p6279_p5), %v4260_v12 }
0x1091   : > { %v4149_v5 = vadd.f32 %v4147_v63, %v4145_v4 }
0x1093   : > { %6207 = vtanh.f32 %v4149_v5 }
0x1099   : > { %v6204_v2 = vpop.eup %6203 }
0x109a   : > { %v4152_v11 = vmul.f32 %v6204_v2, %v6202_v1  ;;  %v6206_v16 = vpop.eup %6205  ;;  %4167 = sbr.rel (!%p6279_p5) target bundleno = 4265 (0x10a9), region = 55 }
0x109c   : > { %4638 = vst [vmem:[%s6904_s3 + $0xf0] sm:$0xff] %v4152_v11 }
0x109d   : > { %v6208_v22 = vpop.eup %6207 }
0x109e   : > { %v4153_v13 = vmul.f32 %v6208_v22, %v6206_v16 }
0x10a0   : > { %4639 = vst [vmem:[%s6904_s3 + $0xf8] sm:$0xff] %v4153_v13 }
0x10a3   : > { %v4320_v24 = vld [vmem:[%s6904_s3 + $0xf0] sm:$0xff] }
0x10a4   : > { %4321 = vst [vmem:[%s7686_s17 + $0x1e0] sm:$0xff] %v4320_v24 }
0x10a7   : > { %v4322_v27 = vld [vmem:[%s6904_s3 + $0xf8] sm:$0xff] }
0x10a8   : > { %4323 = vst [vmem:[%s7686_s17 + $0x1e8] sm:$0xff] %v4322_v27 }
0x10a9 PF: > { %p9_p10 = scmp.ge.s32.totalorder %s6266_s13, 4   ;;  %s7763_s9 = smov %s6227_s10 }
0x10aa   : > { %s7764_s10 = smov %s6277_s16  ;;  %s7765_s11 = smov %s6266_s13 }
0x10ab   :  { %11 = sbr.rel (!%p9_p10) target bundleno = 2 (0x2), region = 154 }

</bundles_post_ra>
